<compile_context>
chip_gen: v7x
topology: tpu7x:2x2x1
jax: 0.10.0
libtpu: 0.0.40
codegen_flags: <defaults>
</compile_context>

<pallas_src>
import jax
import jax.numpy as jnp
from jax import lax
from jax.experimental import pallas as pl
from jax.experimental.pallas import tpu as pltpu


# ----------------------------------------------------------------------------
# Pallas kernel: one fully-fused residual stage.
# ----------------------------------------------------------------------------
def _stage_kernel(len_ref, p_ref, pp_ref, wm_ref, wp_ref, bm_ref, bp_ref,
                  t_ref, o_ref):
    b = pl.program_id(0)

    # Main conv path: (Cout, K) @ (K, tn) on the MXU; eval-mode BN already
    # folded into wm/bm, so conv+BN is one matmul + bias.
    y = jnp.dot(wm_ref[...], p_ref[0], preferred_element_type=jnp.float32)
    y = jnp.clip(y + bm_ref[...], 0.0, 20.0)          # Hardtanh(0, 20)

    # 1x1 strided projection path (its own folded BN + Hardtanh).
    yp = jnp.dot(wp_ref[...], pp_ref[0], preferred_element_type=jnp.float32)
    yp = jnp.clip(yp + bp_ref[...], 0.0, 20.0)

    y = y + yp

    # MaskConv time mask: zero columns whose time index >= lengths[b].
    y = jnp.where(t_ref[...] >= len_ref[b], 0.0, y)
    o_ref[0] = y.astype(o_ref.dtype)


# ----------------------------------------------------------------------------
# Helpers / glue
# ----------------------------------------------------------------------------
def _fold_bn(w, b, gamma, beta, mean, var, eps=1e-5):
    """Fold eval-mode BatchNorm2d into the preceding conv's weight/bias."""
    scale = gamma / jnp.sqrt(var + eps)
    return w * scale[:, None, None, None], b * scale + (beta - mean * scale)


def _round_up(v, m):
    return (v + m - 1) // m * m


def _pick_tile_n(n):
    """Tile the Ho*Wo lane axis: multiples of 128 when large, full extent when small."""
    if n % 128 != 0 or n <= 512:
        return n
    for cand in (512, 256, 128):
        if n % cand == 0:
            return cand
    return n


def skip_stage(x, lengths, *, wm, bm, wp, bp, stride, padding):
    """One residual stage:
         masked(htanh(BN-folded conv))(x) + masked(htanh(BN-folded 1x1 proj))(x)
    wm/bm: folded main conv weight (Cout,Cin,KH,KW) / bias (Cout,)
    wp/bp: folded projection weight (Cout,Cin,1,1)  / bias (Cout,)
    """
    B, Cin, D, T = x.shape
    Cout, _, KH, KW = wm.shape
    sh, sw = stride
    ph, pw = padding
    Ho = (D + 2 * ph - KH) // sh + 1
    Wo = (T + 2 * pw - KW) // sw + 1
    N = Ho * Wo
    K = Cin * KH * KW

    # --- glue: im2col for the main conv; K on sublanes, Ho*Wo on lanes.
    #     Feature order (ci, kh, kw) matches the OIHW weight flatten.
    xp = jnp.pad(x, ((0, 0), (0, 0), (ph, ph), (pw, pw)))
    pats = []
    for kh in range(KH):
        for kw in range(KW):
            sl = lax.slice(
                xp, (0, 0, kh, kw),
                (B, Cin, kh + (Ho - 1) * sh + 1, kw + (Wo - 1) * sw + 1),
                (1, 1, sh, sw))                              # (B, Cin, Ho, Wo)
            pats.append(sl)
    P = jnp.stack(pats, axis=2).reshape(B, K, N)             # (B, K, Ho*Wo)
    Wm = wm.reshape(Cout, K)

    # --- glue: strided input for the 1x1 projection conv (no padding).
    xs = x[:, :, ::sh, ::sw]
    assert xs.shape[2] == Ho and xs.shape[3] == Wo, (xs.shape, Ho, Wo)
    Pp = xs.reshape(B, Cin, N)
    Wp = wp.reshape(Cout, Cin)

    # Zero-pad contraction dims to multiples of 8 (sublane alignment).
    Km_pad = _round_up(K, 8)
    Kp_pad = _round_up(Cin, 8)
    P = jnp.pad(P, ((0, 0), (0, Km_pad - K), (0, 0)))
    Wm = jnp.pad(Wm, ((0, 0), (0, Km_pad - K)))
    Pp = jnp.pad(Pp, ((0, 0), (0, Kp_pad - Cin), (0, 0)))
    Wp = jnp.pad(Wp, ((0, 0), (0, Kp_pad - Cin)))

    bm2 = bm.reshape(Cout, 1)
    bp2 = bp.reshape(Cout, 1)
    # Precomputed per-column time index (column = ho*Wo + wo -> time = wo).
    t_idx = jnp.tile(jnp.arange(Wo, dtype=jnp.int32), Ho).reshape(1, N)

    tn = _pick_tile_n(N)
    grid = (B, N // tn)

    out = pl.pallas_call(
        _stage_kernel,
        out_shape=jax.ShapeDtypeStruct((B, Cout, N), x.dtype),
        grid_spec=pltpu.PrefetchScalarGridSpec(
            num_scalar_prefetch=1,
            grid=grid,
            in_specs=[
                pl.BlockSpec((1, Km_pad, tn), lambda b, n, lens: (b, 0, n)),
                pl.BlockSpec((1, Kp_pad, tn), lambda b, n, lens: (b, 0, n)),
                pl.BlockSpec((Cout, Km_pad), lambda b, n, lens: (0, 0)),
                pl.BlockSpec((Cout, Kp_pad), lambda b, n, lens: (0, 0)),
                pl.BlockSpec((Cout, 1), lambda b, n, lens: (0, 0)),
                pl.BlockSpec((Cout, 1), lambda b, n, lens: (0, 0)),
                pl.BlockSpec((1, tn), lambda b, n, lens: (0, n)),
            ],
            out_specs=pl.BlockSpec((1, Cout, tn), lambda b, n, lens: (b, 0, n)),
        ),
        compiler_params=pltpu.CompilerParams(
            dimension_semantics=("parallel", "parallel"),
            vmem_limit_bytes=32 * 1024 * 1024,
        ),
    )(lengths, P, Pp, Wm, Wp, bm2, bp2, t_idx)

    return out.reshape(B, Cout, Ho, Wo)       # NCHW, free reshape (lane-dense store)


def get_seq_lens(lengths):
    """Mirror of get_seq_lens: only the Conv2d's inside self.conv (conv1, conv2)."""
    seq = lengths
    for (pad_t, dil_t, k_t, s_t) in ((5, 1, 11, 2), (5, 1, 11, 1)):
        seq = (seq + 2 * pad_t - dil_t * (k_t - 1) - 1) // s_t + 1
    return seq.astype(jnp.int32)


class SkipOneStep2:
    """JAX/Pallas equivalent of the PyTorch SkipOneStep2 forward (eval-mode BN)."""

    def __init__(self, params):
        self.p = params

    def __call__(self, x, lengths):
        p = self.p
        x = skip_stage(x, lengths, wm=p["wm1"], bm=p["bm1"], wp=p["wp1"], bp=p["bp1"],
                       stride=(2, 2), padding=(20, 5))
        x = skip_stage(x, lengths, wm=p["wm2"], bm=p["bm2"], wp=p["wp2"], bp=p["bp2"],
                       stride=(2, 1), padding=(10, 5))
        return x, get_seq_lens(lengths)


# ----------------------------------------------------------------------------
# Pure-JAX reference replicating the exact PyTorch semantics (incl. the mask
# applied after every sub-module of every MaskConv).
# ----------------------------------------------------------------------------
def _ref_mask(x, lengths):
    t = jnp.arange(x.shape[3])[None, None, None, :]
    return jnp.where(t >= lengths[:, None, None, None], 0.0, x)


def _ref_maskconv(x, lengths, w, b, scale, shift, stride, padding):
    y = lax.conv_general_dilated(
        x, w, window_strides=stride,
        padding=[(padding[0], padding[0]), (padding[1], padding[1])],
        dimension_numbers=("NCHW", "OIHW", "NCHW"),
        precision=lax.Precision.HIGHEST)
    y = y + b[None, :, None, None]
    y = _ref_mask(y, lengths)                                # after Conv2d
    y = y * scale[None, :, None, None] + shift[None, :, None, None]
    y = _ref_mask(y, lengths)                                # after BatchNorm2d
    y = jnp.clip(y, 0.0, 20.0)
    y = _ref_mask(y, lengths)                                # after Hardtanh
    return y


# ----------------------------------------------------------------------------
if __name__ == "__main__":
    key = jax.random.PRNGKey(0)
    ks = jax.random.split(key, 26)

    B, Cin, D, T = 2, 1, 16, 16
    x = jax.random.normal(ks[0], (B, Cin, D, T), jnp.float32)
    lengths = jnp.array([6, 3], jnp.int32)     # short enough that masking is active
    eps = 1e-5
    C = 32

    def bn_params(k0, k1, k2, k3, c):
        g = 1.0 + 0.1 * jax.random.normal(k0, (c,), jnp.float32)
        be = 0.1 * jax.random.normal(k1, (c,), jnp.float32)
        m = 0.1 * jax.random.normal(k2, (c,), jnp.float32)
        v = 0.8 + 0.4 * jax.random.uniform(k3, (c,), jnp.float32)
        return g, be, m, v

    # conv1 : Conv2d(1, 32, (41, 11), stride (2,2), pad (20,5)) + BN + Hardtanh
    w1 = 0.05 * jax.random.normal(ks[1], (C, Cin, 41, 11), jnp.float32)
    b1 = 0.05 * jax.random.normal(ks[2], (C,), jnp.float32)
    g1, be1, m1, v1 = bn_params(ks[3], ks[4], ks[5], ks[6], C)
    s1 = g1 / jnp.sqrt(v1 + eps); t1 = be1 - m1 * s1
    # projection1 : Conv2d(1, 32, (1,1), stride (2,2)) + BN + Hardtanh
    wq1 = 0.5 * jax.random.normal(ks[7], (C, Cin, 1, 1), jnp.float32)
    bq1 = 0.05 * jax.random.normal(ks[8], (C,), jnp.float32)
    gq1, beq1, mq1, vq1 = bn_params(ks[9], ks[10], ks[11], ks[12], C)
    sq1 = gq1 / jnp.sqrt(vq1 + eps); tq1 = beq1 - mq1 * sq1
    # conv2 : Conv2d(32, 32, (21, 11), stride (2,1), pad (10,5)) + BN + Hardtanh
    w2 = 0.01 * jax.random.normal(ks[13], (C, C, 21, 11), jnp.float32)
    b2 = 0.05 * jax.random.normal(ks[14], (C,), jnp.float32)
    g2, be2, m2, v2 = bn_params(ks[15], ks[16], ks[17], ks[18], C)
    s2 = g2 / jnp.sqrt(v2 + eps); t2 = be2 - m2 * s2
    # projection2 : Conv2d(32, 32, (1,1), stride (2,1)) + BN + Hardtanh
    wq2 = 0.1 * jax.random.normal(ks[19], (C, C, 1, 1), jnp.float32)
    bq2 = 0.05 * jax.random.normal(ks[20], (C,), jnp.float32)
    gq2, beq2, mq2, vq2 = bn_params(ks[21], ks[22], ks[23], ks[24], C)
    sq2 = gq2 / jnp.sqrt(vq2 + eps); tq2 = beq2 - mq2 * sq2

    # Fold BN into the conv weights for the Pallas path.
    wm1, bm1 = _fold_bn(w1, b1, g1, be1, m1, v1, eps)
    wp1, bp1 = _fold_bn(wq1, bq1, gq1, beq1, mq1, vq1, eps)
    wm2, bm2 = _fold_bn(w2, b2, g2, be2, m2, v2, eps)
    wp2, bp2 = _fold_bn(wq2, bq2, gq2, beq2, mq2, vq2, eps)

    model = SkipOneStep2(dict(wm1=wm1, bm1=bm1, wp1=wp1, bp1=bp1,
                              wm2=wm2, bm2=bm2, wp2=wp2, bp2=bp2))
    fwd = jax.jit(model.__call__)
    out, out_lengths = fwd(x, lengths)
    out = jax.block_until_ready(out)
    out_lengths = jax.block_until_ready(out_lengths)

    # ---- verify against the pure-JAX reference of the PyTorch semantics ----
    out1 = _ref_maskconv(x, lengths, w1, b1, s1, t1, (2, 2), (20, 5))
    pr1 = _ref_maskconv(x, lengths, wq1, bq1, sq1, tq1, (2, 2), (0, 0))
    xr = pr1 + out1
    out2 = _ref_maskconv(xr, lengths, w2, b2, s2, t2, (2, 1), (10, 5))
    pr2 = _ref_maskconv(xr, lengths, wq2, bq2, sq2, tq2, (2, 1), (0, 0))
    ref = pr2 + out2
    ref_lengths = get_seq_lens(lengths)

    assert out.shape == ref.shape, (out.shape, ref.shape)
    max_err = float(jnp.max(jnp.abs(out - ref)))
    assert jnp.allclose(out, ref, atol=2e-3, rtol=2e-3), max_err
    assert jnp.array_equal(out_lengths, ref_lengths), (out_lengths, ref_lengths)

    print("KERNEL_OK")
</pallas_src>

<mosaic_0001>
module attributes {stable_mosaic.version = 11 : i64} {
  func.func @_stage_kernel(%arg0: i32, %arg1: i32, %arg2: memref<2xi32, #tpu.memory_space<smem>>, %arg3: memref<1x456x64xf32, #tpu.memory_space<vmem>>, %arg4: memref<1x8x64xf32, #tpu.memory_space<vmem>>, %arg5: memref<32x456xf32, #tpu.memory_space<vmem>>, %arg6: memref<32x8xf32, #tpu.memory_space<vmem>>, %arg7: memref<32x1xf32, #tpu.memory_space<vmem>>, %arg8: memref<32x1xf32, #tpu.memory_space<vmem>>, %arg9: memref<1x64xi32, #tpu.memory_space<vmem>>, %arg10: memref<1x32x64xf32, #tpu.memory_space<vmem>>) attributes {dimension_semantics = [#tpu.dimension_semantics<parallel>, #tpu.dimension_semantics<parallel>], iteration_bounds = array<i64: 2, 1>, scalar_prefetch = 1 : i64, scratch_operands = 0 : i64, tpu.core_type = #tpu.core_type<tc>, window_params = [{transform_indices = @transform_0, window_bounds = array<i64: 1, 456, 64>}, {transform_indices = @transform_1, window_bounds = array<i64: 1, 8, 64>}, {pipeline_mode = #tpu.pipeline_mode<synchronous>, transform_indices = @transform_2, window_bounds = array<i64: 32, 456>}, {pipeline_mode = #tpu.pipeline_mode<synchronous>, transform_indices = @transform_3, window_bounds = array<i64: 32, 8>}, {pipeline_mode = #tpu.pipeline_mode<synchronous>, transform_indices = @transform_4, window_bounds = array<i64: 32, 1>}, {pipeline_mode = #tpu.pipeline_mode<synchronous>, transform_indices = @transform_5, window_bounds = array<i64: 32, 1>}, {transform_indices = @transform_6, window_bounds = array<i64: 1, 64>}, {transform_indices = @transform_7, window_bounds = array<i64: 1, 32, 64>}]} {
    %c0 = arith.constant 0 : index
    %c0_0 = arith.constant 0 : index
    %0 = vector.load %arg5[%c0, %c0_0] : memref<32x456xf32, #tpu.memory_space<vmem>>, vector<32x456xf32>
    %c0_1 = arith.constant 0 : index
    %c0_2 = arith.constant 0 : index
    %c0_3 = arith.constant 0 : index
    %1 = vector.load %arg3[%c0_1, %c0_2, %c0_3] : memref<1x456x64xf32, #tpu.memory_space<vmem>>, vector<1x456x64xf32>
    %2 = vector.shape_cast %1 : vector<1x456x64xf32> to vector<456x64xf32>
    %cst = arith.constant dense<0.000000e+00> : vector<32x64xf32>
    %3 = tpu.matmul %0, %2, %cst {dimension_numbers = #tpu.dot_dimension_numbers<[1], [0], [0], [1], [0, 0, 1, 1], [], []>} : vector<32x456xf32>, vector<456x64xf32>, vector<32x64xf32> -> vector<32x64xf32>
    %c0_4 = arith.constant 0 : index
    %c0_5 = arith.constant 0 : index
    %4 = vector.load %arg7[%c0_4, %c0_5] : memref<32x1xf32, #tpu.memory_space<vmem>>, vector<32x1xf32>
    %5 = vector.broadcast %4 : vector<32x1xf32> to vector<32x64xf32>
    %6 = arith.addf %3, %5 : vector<32x64xf32>
    %cst_6 = arith.constant 0.000000e+00 : f32
    %cst_7 = arith.constant 2.000000e+01 : f32
    %7 = vector.broadcast %cst_6 : f32 to vector<32x64xf32>
    %8 = arith.maximumf %7, %6 : vector<32x64xf32>
    %9 = vector.broadcast %cst_7 : f32 to vector<32x64xf32>
    %10 = arith.minimumf %9, %8 : vector<32x64xf32>
    %c0_8 = arith.constant 0 : index
    %c0_9 = arith.constant 0 : index
    %11 = vector.load %arg6[%c0_8, %c0_9] : memref<32x8xf32, #tpu.memory_space<vmem>>, vector<32x8xf32>
    %c0_10 = arith.constant 0 : index
    %c0_11 = arith.constant 0 : index
    %c0_12 = arith.constant 0 : index
    %12 = vector.load %arg4[%c0_10, %c0_11, %c0_12] : memref<1x8x64xf32, #tpu.memory_space<vmem>>, vector<1x8x64xf32>
    %13 = vector.shape_cast %12 : vector<1x8x64xf32> to vector<8x64xf32>
    %cst_13 = arith.constant dense<0.000000e+00> : vector<32x64xf32>
    %14 = tpu.matmul %11, %13, %cst_13 {dimension_numbers = #tpu.dot_dimension_numbers<[1], [0], [0], [1], [0, 0, 1, 1], [], []>} : vector<32x8xf32>, vector<8x64xf32>, vector<32x64xf32> -> vector<32x64xf32>
    %c0_14 = arith.constant 0 : index
    %c0_15 = arith.constant 0 : index
    %15 = vector.load %arg8[%c0_14, %c0_15] : memref<32x1xf32, #tpu.memory_space<vmem>>, vector<32x1xf32>
    %16 = vector.broadcast %15 : vector<32x1xf32> to vector<32x64xf32>
    %17 = arith.addf %14, %16 : vector<32x64xf32>
    %cst_16 = arith.constant 0.000000e+00 : f32
    %cst_17 = arith.constant 2.000000e+01 : f32
    %18 = vector.broadcast %cst_16 : f32 to vector<32x64xf32>
    %19 = arith.maximumf %18, %17 : vector<32x64xf32>
    %20 = vector.broadcast %cst_17 : f32 to vector<32x64xf32>
    %21 = arith.minimumf %20, %19 : vector<32x64xf32>
    %22 = arith.addf %10, %21 : vector<32x64xf32>
    %c0_18 = arith.constant 0 : index
    %c0_19 = arith.constant 0 : index
    %23 = vector.load %arg9[%c0_18, %c0_19] : memref<1x64xi32, #tpu.memory_space<vmem>>, vector<1x64xi32>
    %24 = arith.index_cast %arg0 : i32 to index
    %25 = memref.load %arg2[%24] : memref<2xi32, #tpu.memory_space<smem>>
    %26 = vector.broadcast %25 : i32 to vector<1x64xi32>
    %27 = arith.cmpi sge, %23, %26 : vector<1x64xi32>
    %cst_20 = arith.constant 0.000000e+00 : f32
    %28 = vector.shape_cast %27 : vector<1x64xi1> to vector<1x64xi1>
    %29 = vector.broadcast %28 : vector<1x64xi1> to vector<32x64xi1>
    %30 = vector.broadcast %cst_20 : f32 to vector<32x64xf32>
    %31 = arith.select %29, %30, %22 : vector<32x64xi1>, vector<32x64xf32>
    %c0_21 = arith.constant 0 : index
    %c0_22 = arith.constant 0 : index
    %c0_23 = arith.constant 0 : index
    %32 = vector.load %arg10[%c0_21, %c0_22, %c0_23] : memref<1x32x64xf32, #tpu.memory_space<vmem>>, vector<1x32x64xf32>
    %33 = vector.shape_cast %32 : vector<1x32x64xf32> to vector<32x64xf32>
    %34 = vector.shape_cast %31 : vector<32x64xf32> to vector<1x32x64xf32>
    tpu.vector_store %arg10[%c0_21, %c0_22, %c0_23], %34 {strides = array<i32>} : memref<1x32x64xf32, #tpu.memory_space<vmem>>, vector<1x32x64xf32>,
    return
  }
  func.func @transform_0(%arg0: i32, %arg1: i32, %arg2: memref<2xi32, #tpu.memory_space<smem>>) -> (i32, i32, i32) {
    %c0_i32 = arith.constant 0 : i32
    %c0_i32_0 = arith.constant 0 : i32
    return %arg0, %c0_i32, %arg1 : i32, i32, i32
  }
  func.func @transform_1(%arg0: i32, %arg1: i32, %arg2: memref<2xi32, #tpu.memory_space<smem>>) -> (i32, i32, i32) {
    %c0_i32 = arith.constant 0 : i32
    %c0_i32_0 = arith.constant 0 : i32
    return %arg0, %c0_i32, %arg1 : i32, i32, i32
  }
  func.func @transform_2(%arg0: i32, %arg1: i32, %arg2: memref<2xi32, #tpu.memory_space<smem>>) -> (i32, i32) {
    %c0_i32 = arith.constant 0 : i32
    %c0_i32_0 = arith.constant 0 : i32
    %c0_i32_1 = arith.constant 0 : i32
    return %c0_i32, %c0_i32_0 : i32, i32
  }
  func.func @transform_3(%arg0: i32, %arg1: i32, %arg2: memref<2xi32, #tpu.memory_space<smem>>) -> (i32, i32) {
    %c0_i32 = arith.constant 0 : i32
    %c0_i32_0 = arith.constant 0 : i32
    %c0_i32_1 = arith.constant 0 : i32
    return %c0_i32, %c0_i32_0 : i32, i32
  }
  func.func @transform_4(%arg0: i32, %arg1: i32, %arg2: memref<2xi32, #tpu.memory_space<smem>>) -> (i32, i32) {
    %c0_i32 = arith.constant 0 : i32
    %c0_i32_0 = arith.constant 0 : i32
    %c0_i32_1 = arith.constant 0 : i32
    return %c0_i32, %c0_i32_0 : i32, i32
  }
  func.func @transform_5(%arg0: i32, %arg1: i32, %arg2: memref<2xi32, #tpu.memory_space<smem>>) -> (i32, i32) {
    %c0_i32 = arith.constant 0 : i32
    %c0_i32_0 = arith.constant 0 : i32
    %c0_i32_1 = arith.constant 0 : i32
    return %c0_i32, %c0_i32_0 : i32, i32
  }
  func.func @transform_6(%arg0: i32, %arg1: i32, %arg2: memref<2xi32, #tpu.memory_space<smem>>) -> (i32, i32) {
    %c0_i32 = arith.constant 0 : i32
    %c0_i32_0 = arith.constant 0 : i32
    return %c0_i32, %arg1 : i32, i32
  }
  func.func @transform_7(%arg0: i32, %arg1: i32, %arg2: memref<2xi32, #tpu.memory_space<smem>>) -> (i32, i32, i32) {
    %c0_i32 = arith.constant 0 : i32
    %c0_i32_0 = arith.constant 0 : i32
    return %arg0, %c0_i32, %arg1 : i32, i32, i32
  }
}

module attributes {stable_mosaic.version = 11 : i64} {
  func.func @_stage_kernel(%arg0: i32, %arg1: i32, %arg2: memref<2xi32, #tpu.memory_space<smem>>, %arg3: memref<1x7392x32xf32, #tpu.memory_space<vmem>>, %arg4: memref<1x32x32xf32, #tpu.memory_space<vmem>>, %arg5: memref<32x7392xf32, #tpu.memory_space<vmem>>, %arg6: memref<32x32xf32, #tpu.memory_space<vmem>>, %arg7: memref<32x1xf32, #tpu.memory_space<vmem>>, %arg8: memref<32x1xf32, #tpu.memory_space<vmem>>, %arg9: memref<1x32xi32, #tpu.memory_space<vmem>>, %arg10: memref<1x32x32xf32, #tpu.memory_space<vmem>>) attributes {dimension_semantics = [#tpu.dimension_semantics<parallel>, #tpu.dimension_semantics<parallel>], iteration_bounds = array<i64: 2, 1>, scalar_prefetch = 1 : i64, scratch_operands = 0 : i64, tpu.core_type = #tpu.core_type<tc>, window_params = [{transform_indices = @transform_0, window_bounds = array<i64: 1, 7392, 32>}, {transform_indices = @transform_1, window_bounds = array<i64: 1, 32, 32>}, {pipeline_mode = #tpu.pipeline_mode<synchronous>, transform_indices = @transform_2, window_bounds = array<i64: 32, 7392>}, {pipeline_mode = #tpu.pipeline_mode<synchronous>, transform_indices = @transform_3, window_bounds = array<i64: 32, 32>}, {pipeline_mode = #tpu.pipeline_mode<synchronous>, transform_indices = @transform_4, window_bounds = array<i64: 32, 1>}, {pipeline_mode = #tpu.pipeline_mode<synchronous>, transform_indices = @transform_5, window_bounds = array<i64: 32, 1>}, {transform_indices = @transform_6, window_bounds = array<i64: 1, 32>}, {transform_indices = @transform_7, window_bounds = array<i64: 1, 32, 32>}]} {
    %c0 = arith.constant 0 : index
    %c0_0 = arith.constant 0 : index
    %0 = vector.load %arg5[%c0, %c0_0] : memref<32x7392xf32, #tpu.memory_space<vmem>>, vector<32x7392xf32>
    %c0_1 = arith.constant 0 : index
    %c0_2 = arith.constant 0 : index
    %c0_3 = arith.constant 0 : index
    %1 = vector.load %arg3[%c0_1, %c0_2, %c0_3] : memref<1x7392x32xf32, #tpu.memory_space<vmem>>, vector<1x7392x32xf32>
    %2 = vector.shape_cast %1 : vector<1x7392x32xf32> to vector<7392x32xf32>
    %cst = arith.constant dense<0.000000e+00> : vector<32x32xf32>
    %3 = tpu.matmul %0, %2, %cst {dimension_numbers = #tpu.dot_dimension_numbers<[1], [0], [0], [1], [0, 0, 1, 1], [], []>} : vector<32x7392xf32>, vector<7392x32xf32>, vector<32x32xf32> -> vector<32x32xf32>
    %c0_4 = arith.constant 0 : index
    %c0_5 = arith.constant 0 : index
    %4 = vector.load %arg7[%c0_4, %c0_5] : memref<32x1xf32, #tpu.memory_space<vmem>>, vector<32x1xf32>
    %5 = vector.broadcast %4 : vector<32x1xf32> to vector<32x32xf32>
    %6 = arith.addf %3, %5 : vector<32x32xf32>
    %cst_6 = arith.constant 0.000000e+00 : f32
    %cst_7 = arith.constant 2.000000e+01 : f32
    %7 = vector.broadcast %cst_6 : f32 to vector<32x32xf32>
    %8 = arith.maximumf %7, %6 : vector<32x32xf32>
    %9 = vector.broadcast %cst_7 : f32 to vector<32x32xf32>
    %10 = arith.minimumf %9, %8 : vector<32x32xf32>
    %c0_8 = arith.constant 0 : index
    %c0_9 = arith.constant 0 : index
    %11 = vector.load %arg6[%c0_8, %c0_9] : memref<32x32xf32, #tpu.memory_space<vmem>>, vector<32x32xf32>
    %c0_10 = arith.constant 0 : index
    %c0_11 = arith.constant 0 : index
    %c0_12 = arith.constant 0 : index
    %12 = vector.load %arg4[%c0_10, %c0_11, %c0_12] : memref<1x32x32xf32, #tpu.memory_space<vmem>>, vector<1x32x32xf32>
    %13 = vector.shape_cast %12 : vector<1x32x32xf32> to vector<32x32xf32>
    %cst_13 = arith.constant dense<0.000000e+00> : vector<32x32xf32>
    %14 = tpu.matmul %11, %13, %cst_13 {dimension_numbers = #tpu.dot_dimension_numbers<[1], [0], [0], [1], [0, 0, 1, 1], [], []>} : vector<32x32xf32>, vector<32x32xf32>, vector<32x32xf32> -> vector<32x32xf32>
    %c0_14 = arith.constant 0 : index
    %c0_15 = arith.constant 0 : index
    %15 = vector.load %arg8[%c0_14, %c0_15] : memref<32x1xf32, #tpu.memory_space<vmem>>, vector<32x1xf32>
    %16 = vector.broadcast %15 : vector<32x1xf32> to vector<32x32xf32>
    %17 = arith.addf %14, %16 : vector<32x32xf32>
    %cst_16 = arith.constant 0.000000e+00 : f32
    %cst_17 = arith.constant 2.000000e+01 : f32
    %18 = vector.broadcast %cst_16 : f32 to vector<32x32xf32>
    %19 = arith.maximumf %18, %17 : vector<32x32xf32>
    %20 = vector.broadcast %cst_17 : f32 to vector<32x32xf32>
    %21 = arith.minimumf %20, %19 : vector<32x32xf32>
    %22 = arith.addf %10, %21 : vector<32x32xf32>
    %c0_18 = arith.constant 0 : index
    %c0_19 = arith.constant 0 : index
    %23 = vector.load %arg9[%c0_18, %c0_19] : memref<1x32xi32, #tpu.memory_space<vmem>>, vector<1x32xi32>
    %24 = arith.index_cast %arg0 : i32 to index
    %25 = memref.load %arg2[%24] : memref<2xi32, #tpu.memory_space<smem>>
    %26 = vector.broadcast %25 : i32 to vector<1x32xi32>
    %27 = arith.cmpi sge, %23, %26 : vector<1x32xi32>
    %cst_20 = arith.constant 0.000000e+00 : f32
    %28 = vector.shape_cast %27 : vector<1x32xi1> to vector<1x32xi1>
    %29 = vector.broadcast %28 : vector<1x32xi1> to vector<32x32xi1>
    %30 = vector.broadcast %cst_20 : f32 to vector<32x32xf32>
    %31 = arith.select %29, %30, %22 : vector<32x32xi1>, vector<32x32xf32>
    %c0_21 = arith.constant 0 : index
    %c0_22 = arith.constant 0 : index
    %c0_23 = arith.constant 0 : index
    %32 = vector.load %arg10[%c0_21, %c0_22, %c0_23] : memref<1x32x32xf32, #tpu.memory_space<vmem>>, vector<1x32x32xf32>
    %33 = vector.shape_cast %32 : vector<1x32x32xf32> to vector<32x32xf32>
    %34 = vector.shape_cast %31 : vector<32x32xf32> to vector<1x32x32xf32>
    tpu.vector_store %arg10[%c0_21, %c0_22, %c0_23], %34 {strides = array<i32>} : memref<1x32x32xf32, #tpu.memory_space<vmem>>, vector<1x32x32xf32>,
    return
  }
  func.func @transform_0(%arg0: i32, %arg1: i32, %arg2: memref<2xi32, #tpu.memory_space<smem>>) -> (i32, i32, i32) {
    %c0_i32 = arith.constant 0 : i32
    %c0_i32_0 = arith.constant 0 : i32
    return %arg0, %c0_i32, %arg1 : i32, i32, i32
  }
  func.func @transform_1(%arg0: i32, %arg1: i32, %arg2: memref<2xi32, #tpu.memory_space<smem>>) -> (i32, i32, i32) {
    %c0_i32 = arith.constant 0 : i32
    %c0_i32_0 = arith.constant 0 : i32
    return %arg0, %c0_i32, %arg1 : i32, i32, i32
  }
  func.func @transform_2(%arg0: i32, %arg1: i32, %arg2: memref<2xi32, #tpu.memory_space<smem>>) -> (i32, i32) {
    %c0_i32 = arith.constant 0 : i32
    %c0_i32_0 = arith.constant 0 : i32
    %c0_i32_1 = arith.constant 0 : i32
    return %c0_i32, %c0_i32_0 : i32, i32
  }
  func.func @transform_3(%arg0: i32, %arg1: i32, %arg2: memref<2xi32, #tpu.memory_space<smem>>) -> (i32, i32) {
    %c0_i32 = arith.constant 0 : i32
    %c0_i32_0 = arith.constant 0 : i32
    %c0_i32_1 = arith.constant 0 : i32
    return %c0_i32, %c0_i32_0 : i32, i32
  }
  func.func @transform_4(%arg0: i32, %arg1: i32, %arg2: memref<2xi32, #tpu.memory_space<smem>>) -> (i32, i32) {
    %c0_i32 = arith.constant 0 : i32
    %c0_i32_0 = arith.constant 0 : i32
    %c0_i32_1 = arith.constant 0 : i32
    return %c0_i32, %c0_i32_0 : i32, i32
  }
  func.func @transform_5(%arg0: i32, %arg1: i32, %arg2: memref<2xi32, #tpu.memory_space<smem>>) -> (i32, i32) {
    %c0_i32 = arith.constant 0 : i32
    %c0_i32_0 = arith.constant 0 : i32
    %c0_i32_1 = arith.constant 0 : i32
    return %c0_i32, %c0_i32_0 : i32, i32
  }
  func.func @transform_6(%arg0: i32, %arg1: i32, %arg2: memref<2xi32, #tpu.memory_space<smem>>) -> (i32, i32) {
    %c0_i32 = arith.constant 0 : i32
    %c0_i32_0 = arith.constant 0 : i32
    return %c0_i32, %arg1 : i32, i32
  }
  func.func @transform_7(%arg0: i32, %arg1: i32, %arg2: memref<2xi32, #tpu.memory_space<smem>>) -> (i32, i32, i32) {
    %c0_i32 = arith.constant 0 : i32
    %c0_i32_0 = arith.constant 0 : i32
    return %arg0, %c0_i32, %arg1 : i32, i32, i32
  }
}

</mosaic_0001>

<bundles_post_ra>
// kernel: tile.14
= control target key start
LH: loop header
LB: loop body
LE: loop exit
PB: predicated region body
PF: predicated region fallthrough
CT: control target
= control target key end

     0   :  { %s67_s10 = smov 56   ;;  %s68_s11 = smov 40   ;;  %vm3_vm0 = vcmask 64512   ;;  %vm9_vm1 = vcmask 523712   ;;  %vm15_vm2 = vcmask 458112   ;;  %vm21_vm3 = vcmask 392512   ;;  %s111_s0 = inlined_call_operand.vmem [shape: s32[8,8], index: 0, kind: input, shape index: {}]   ;;  %s112_s1 = inlined_call_operand.vmem [shape: s32[1,64], index: 1, kind: output, shape index: {}]  }
   0x1   :  { %v53_v0 = vld [vmem:[%s111_s0 + $0x7] sm:$0x1]   ;;  %v55_v1 = vld [vmem:[%s111_s0 + $0x5] sm:$0x1]   ;;  %v54_v2 = vld [vmem:[%s111_s0 + $0x6] sm:$0x1]  }
   0x2   :  { %7 = vrot.lane.b32.xlu0 %v53_v0, %s67_s10  ;;  %19 = vrot.lane.b32.xlu1 %v55_v1, %s68_s11  ;;  %v56_v3 = vld [vmem:[%s111_s0 + $0x4] sm:$0x1]   ;;  %v2_v4 = vld [vmem:[%s111_s0] sm:$0x1]   ;;  %s69_s18 = smov 48   ;;  %s70_s19 = smov 32  }
   0x3   :  { %4 = vst.msk [vmem:[#allocation0] sm:$0x1] %vm3_vm0, %v2_v4   ;;  %v57_v5 = vld [vmem:[%s111_s0 + $0x3] sm:$0x1]   ;;  %v58_v6 = vld [vmem:[%s111_s0 + $0x2] sm:$0x1]  }
   0x4   :  { %s71_s24 = smov 24   ;;  %s72_s25 = smov 16   ;;  %v59_v7 = vld [vmem:[%s111_s0 + $0x1] sm:$0x1]   ;;  %vm27_vm4 = vcmask 326912   ;;  %vm33_vm5 = vcmask 261312  }
   0x5   :  { %s73_s0 = smov 8   ;;  %vm39_vm6 = vcmask 195712   ;;  %vm45_vm7 = vcmask 130112  }
   0x6   :  { %13 = vrot.lane.b32.xlu0 %v54_v2, %s69_s18  ;;  %25 = vrot.lane.b32.xlu1 %v56_v3, %s70_s19 }
   0xa   :  { %31 = vrot.lane.b32.xlu0 %v57_v5, %s71_s24  ;;  %37 = vrot.lane.b32.xlu1 %v58_v6, %s72_s25 }
   0xe   :  { %43 = vrot.lane.b32.xlu0 %v59_v7, %s73_s0 }
  0x74   :  { %v8_v8 = vpop.permute.xlu0 %7   ;;  %v20_v9 = vpop.permute.xlu1 %19  }
  0x75   :  { %10 = vst.msk [vmem:[#allocation0] sm:$0x1] %vm9_vm1, %v8_v8  }
  0x78   :  { %v14_v10 = vpop.permute.xlu0 %13   ;;  %v26_v11 = vpop.permute.xlu1 %25  }
  0x79   :  { %16 = vst.msk [vmem:[#allocation0] sm:$0x1] %vm15_vm2, %v14_v10  }
  0x7a   :  { %22 = vst.msk [vmem:[#allocation0] sm:$0x1] %vm21_vm3, %v20_v9  }
  0x7b   :  { %28 = vst.msk [vmem:[#allocation0] sm:$0x1] %vm27_vm4, %v26_v11  }
  0x7c   :  { %v32_v12 = vpop.permute.xlu0 %31   ;;  %v38_v13 = vpop.permute.xlu1 %37  }
  0x7d   :  { %34 = vst.msk [vmem:[#allocation0] sm:$0x1] %vm33_vm5, %v32_v12  }
  0x7e   :  { %40 = vst.msk [vmem:[#allocation0] sm:$0x1] %vm39_vm6, %v38_v13  }
  0x80   :  { %v44_v14 = vpop.permute.xlu0 %43  }
  0x81   :  { %46 = vst.msk [vmem:[#allocation0] sm:$0x1] %vm45_vm7, %v44_v14  }
  0x88   :  { %v50_v15 = vld [vmem:[#allocation0] sm:$0x1] }
  0x89   :  { %52 = vst [vmem:[%s112_s1] sm:$0x1] %v50_v15 }

// kernel: a_call__.2
= control target key start
LH: loop header
LB: loop body
LE: loop exit
PB: predicated region body
PF: predicated region fallthrough
CT: control target
= control target key end

     0   :  { %s1412_s0 = inlined_call_operand.vmem [shape: s32[2], index: 0, kind: input, shape index: {}]   ;;  %s1413_s1 = inlined_call_operand.vmem [shape: f32[2,456,64], index: 1, kind: input, shape index: {}]   ;;  %s1414_s2 = inlined_call_operand.vmem [shape: f32[2,8,64], index: 2, kind: input, shape index: {}]   ;;  %s1415_s3 = inlined_call_operand.vmem [shape: f32[32,456], index: 3, kind: input, shape index: {}]   ;;  %s1416_s4 = inlined_call_operand.vmem [shape: f32[32,8], index: 4, kind: input, shape index: {}]   ;;  %s1417_s5 = inlined_call_operand.vmem [shape: f32[32,1], index: 5, kind: input, shape index: {}]   ;;  %s1418_s6 = inlined_call_operand.vmem [shape: f32[32,1], index: 6, kind: input, shape index: {}]   ;;  %s1419_s7 = inlined_call_operand.vmem [shape: s32[1,64], index: 7, kind: input, shape index: {}]   ;;  %s1420_s8 = inlined_call_operand.vmem [shape: f32[2,32,64], index: 8, kind: output, shape index: {}]  }
   0x1   :  { %s13_s29 = sshll.u32 %s1412_s0, 4  ;;  %s14_s29 = int_to_ptr.vmem [resolvable:$true] %s13_s29 }
   0x2   :  { %s1093_s30 = scalar_lea.vmem %s14_s29, 16  ;;  %p1098_p1 = scmp.lt.s32.totalorder %s14_s29, %s14_s29 }
   0x3   :  { %p1094_p0 = scmp.ne.s32.totalorder %s14_s29, %s1093_s30  ;;  %p1099_p2 = scmp.lt.s32.totalorder %s1093_s30, %s1093_s30 }
   0x5   :  { %p1100_p3 = por %p1099_p2, %p1098_p1 }
   0x7   :  { %p1101_p4 = pnand %p1100_p3, %p1094_p0 }
   0x9   :  { %1104 = shalt.err (!%p1101_p4)  }
   0xa   :  { %s1131_s9 = smov [#allocation3]  }
   0xb   :  { %16 = dma.vmem_to_smem %s14_s29, 16, %s1131_s9, [#allocation2] }
   0xc   :  { %1117 = dma.done.wait [#allocation2], 16 }
   0xd   :  { %1118 = vsyncadd [#allocation2], 4294967280 }
   0xe   :  { %18 = sfence }
   0xf   :  { %s1183_s10 = smov 0   ;;  %s1185_s11 = smov 0  }
  0x10   :  { %s1187_s12 = smov 0  }
  0x11 LB: > { %s36_s0 = sadd.s32 1, %s1125_s11  ;;  %p921_p5 = scmp.ge.s32.totalorder %s1129_s12, 1  ;;  %s1129_s12 = sphi %s1187_s12, %s24_s12   ;;  %s1125_s11 = sphi %s1185_s11, %s1422_s11   ;;  %s1121_s10 = sphi %s1183_s10, %s1421_s10  }
  0x12   : > { %p38_p6 = scmp.ge.s32.totalorder %s36_s0, 2  ;;  %p285_p7 = scmp.lt.s32.totalorder %s1129_s12, 3 }
  0x14   : > { %s1424_s0 = smov (%p38_p6, %s36_s0), 0  ;;  %p286_p8 = pnand %p921_p5, %p285_p7 }
  0x15   : > { %p333_p9 = scmp.lt.s32.totalorder (!%p286_p8), %s1121_s10, 1  ;;  %v360_v0 = vld [vmem:[%s1415_s3 + $0x8] sm:$0xff] (!%p286_p8)  ;;  %v1132_v1 = vmov (!%p286_p8), 0.0|0.0   ;;  %vm456_vm0 = vcmask (!%p286_p8), 588800   ;;  %v1133_v2 = vmov (!%p286_p8), 0   ;;  %v362_v3 = vld [vmem:[%s1415_s3 + $0x18] sm:$0xff] (!%p286_p8) }
  0x16   : > { %289 = sbr.rel (%p286_p8) target bundleno = 321 (0x141), region = 48  ;;  %1026 = vmatprep.subr.bf16.mxu1 (!%p286_p8), %v1132_v1  ;;  %533 = vmatprep.mubr.f32.mxu0 (!%p286_p8), %v360_v0  ;;  %v434_v58 = vld [vmem:[%s1417_s5 + $0x10] sm:$0xff] (!%p286_p8)  ;;  %v432_v59 = vld [vmem:[%s1417_s5] sm:$0xff] (!%p286_p8)  ;;  %vm676_vm1 = vcmask (!%p286_p8), 64512   ;;  %s787_s26 = sld [smem:[#allocation3 + %s1121_s10]] (!%p286_p8)  ;;  %vm800_vm4 = vcmask (!%p286_p8), 523264  }
  0x17   : > { %1092 = vset.pattern.permute.xlu1 (!%p286_p8), %v1133_v2  ;;  %1091 = vset.pattern.permute.xlu0 (!%p286_p8), %v1133_v2 }
  0x18   : > { %926 = vmatprep.mubr.msk.f32.mxu1 (!%p286_p8), %vm456_vm0, %v362_v3  ;;  %448 = vperm.xlu1 (!%p286_p8), %1092, %v434_v58  }
  0x19   : > { %438 = vperm.xlu0 (!%p286_p8), %1091, %v432_v59  }
  0x1d   : > { %s1209_s15 = scalar_select %p333_p9, %s1121_s10, 1 }
  0x1f   : > { %s1062_s18 = smul.u32 456, %s1209_s15  ;;  %s923_s30 = sshll.u32 %s1209_s15, 3 }
  0x20   : > { %s347_s14 = scalar_lea.vmem %s1414_s2, %s923_s30  ;;  %s936_s10 = sshll.u32 %s1209_s15, 5 }
  0x21   : > { %s1221_s21 = scalar_lea.vmem %s1413_s1, %s1062_s18  ;;  %s1389_s9 = scalar_lea.vmem %s1420_s8, %s936_s10 }
  0x22   : > { %v391_v4 = vld [vmem:[%s1221_s21 + $0x80] sm:$0xff]  ;;  %v392_v5 = vld [vmem:[%s1221_s21 + $0x88] sm:$0xff]  ;;  %v393_v13 = vld [vmem:[%s1221_s21 + $0x90] sm:$0xff] }
  0x23   : > { %v407_v6 = vld [vmem:[%s1221_s21 + $0x100] sm:$0xff]  ;;  %v994_v7 = vpack.c.bf16 %v392_v5, %v391_v4  ;;  %v408_v8 = vld [vmem:[%s1221_s21 + $0x108] sm:$0xff]  ;;  %v394_v14 = vld [vmem:[%s1221_s21 + $0x98] sm:$0xff] }
  0x24   : > { %v375_v9 = vld [vmem:[%s1221_s21] sm:$0xff]  ;;  %v376_v10 = vld [vmem:[%s1221_s21 + $0x8] sm:$0xff]  ;;  %v1027_v11 = vpack.c.bf16 %v408_v8, %v407_v6  ;;  %v409_v15 = vld [vmem:[%s1221_s21 + $0x110] sm:$0xff]  ;;  %v998_v16 = vpack.c.bf16 %v394_v14, %v393_v13 }
  0x25   : > { %v996_v12 = vpack.c.bf16 %v376_v10, %v375_v9  ;;  %995 = vmatprep.subr.bf16.mxu0 %v994_v7  ;;  %v410_v17 = vld [vmem:[%s1221_s21 + $0x118] sm:$0xff]  ;;  %v377_v18 = vld [vmem:[%s1221_s21 + $0x10] sm:$0xff]  ;;  %v395_v22 = vld [vmem:[%s1221_s21 + $0xa0] sm:$0xff] }
  0x26   : > { %v378_v19 = vld [vmem:[%s1221_s21 + $0x18] sm:$0xff]  ;;  %1028 = vmatpush1.bf16.msra.mxu1 %v1027_v11  ;;  %v1030_v20 = vpack.c.bf16 %v410_v17, %v409_v15  ;;  %v396_v23 = vld [vmem:[%s1221_s21 + $0xa8] sm:$0xff]  ;;  %v411_v24 = vld [vmem:[%s1221_s21 + $0x120] sm:$0xff] }
  0x27   : > { %997 = vmatpush3.bf16.msra.mxu0 %v996_v12  ;;  %v1000_v21 = vpack.c.bf16 %v378_v19, %v377_v18  ;;  %1029 = vmatprep.subr.bf16.mxu1 %v1132_v1  ;;  %v1002_v25 = vpack.c.bf16 %v396_v23, %v395_v22  ;;  %v412_v26 = vld [vmem:[%s1221_s21 + $0x128] sm:$0xff]  ;;  %v379_v27 = vld [vmem:[%s1221_s21 + $0x20] sm:$0xff]  ;;  %v397_v29 = vld [vmem:[%s1221_s21 + $0xb0] sm:$0xff] }
  0x28   : > { %999 = vmatprep.subr.bf16.mxu0 %v998_v16  ;;  %v380_v28 = vld [vmem:[%s1221_s21 + $0x28] sm:$0xff]  ;;  %v398_v30 = vld [vmem:[%s1221_s21 + $0xb8] sm:$0xff]  ;;  %v1033_v31 = vpack.c.bf16 %v412_v26, %v411_v24  ;;  %v413_v33 = vld [vmem:[%s1221_s21 + $0x130] sm:$0xff] }
  0x29   : > { %v1004_v32 = vpack.c.bf16 %v380_v28, %v379_v27  ;;  %v1006_v34 = vpack.c.bf16 %v398_v30, %v397_v29  ;;  %v414_v35 = vld [vmem:[%s1221_s21 + $0x138] sm:$0xff]  ;;  %v381_v36 = vld [vmem:[%s1221_s21 + $0x30] sm:$0xff]  ;;  %v399_v38 = vld [vmem:[%s1221_s21 + $0xc0] sm:$0xff] }
  0x2a   : > { %1031 = vmatpush1.bf16.msra.mxu1 %v1030_v20  ;;  %v382_v37 = vld [vmem:[%s1221_s21 + $0x38] sm:$0xff]  ;;  %v400_v39 = vld [vmem:[%s1221_s21 + $0xc8] sm:$0xff]  ;;  %v1036_v40 = vpack.c.bf16 %v414_v35, %v413_v33  ;;  %v415_v42 = vld [vmem:[%s1221_s21 + $0x140] sm:$0xff] }
  0x2b   : > { %1001 = vmatpush3.bf16.msra.mxu0 %v1000_v21  ;;  %1032 = vmatprep.subr.bf16.mxu1 %v1132_v1  ;;  %v1008_v41 = vpack.c.bf16 %v382_v37, %v381_v36  ;;  %v1010_v43 = vpack.c.bf16 %v400_v39, %v399_v38  ;;  %v416_v44 = vld [vmem:[%s1221_s21 + $0x148] sm:$0xff]  ;;  %v383_v45 = vld [vmem:[%s1221_s21 + $0x40] sm:$0xff]  ;;  %v401_v47 = vld [vmem:[%s1221_s21 + $0xd0] sm:$0xff] }
  0x2c   : > { %1003 = vmatprep.subr.bf16.mxu0 %v1002_v25  ;;  %v384_v46 = vld [vmem:[%s1221_s21 + $0x48] sm:$0xff]  ;;  %v402_v48 = vld [vmem:[%s1221_s21 + $0xd8] sm:$0xff]  ;;  %v1039_v49 = vpack.c.bf16 %v416_v44, %v415_v42  ;;  %v417_v51 = vld [vmem:[%s1221_s21 + $0x150] sm:$0xff]  ;;  %v1134_v44 = vmov 0.0  }
  0x2d   : > { %v1012_v50 = vpack.c.bf16 %v384_v46, %v383_v45  ;;  %v1014_v52 = vpack.c.bf16 %v402_v48, %v401_v47  ;;  %v418_v53 = vld [vmem:[%s1221_s21 + $0x158] sm:$0xff]  ;;  %v385_v54 = vld [vmem:[%s1221_s21 + $0x50] sm:$0xff]  ;;  %v403_v56 = vld [vmem:[%s1221_s21 + $0xe0] sm:$0xff] }
  0x2e   : > { %1034 = vmatpush1.bf16.msra.mxu1 %v1033_v31  ;;  %v386_v55 = vld [vmem:[%s1221_s21 + $0x58] sm:$0xff]  ;;  %v404_v57 = vld [vmem:[%s1221_s21 + $0xe8] sm:$0xff]  ;;  %v1042_v60 = vpack.c.bf16 %v418_v53, %v417_v51  ;;  %v419_v62 = vld [vmem:[%s1221_s21 + $0x160] sm:$0xff] }
  0x2f   : > { %1005 = vmatpush3.bf16.msra.mxu0 %v1004_v32  ;;  %1035 = vmatprep.subr.bf16.mxu1 %v1132_v1  ;;  %v1016_v61 = vpack.c.bf16 %v386_v55, %v385_v54  ;;  %v1018_v63 = vpack.c.bf16 %v404_v57, %v403_v56  ;;  %v420_v0 = vld [vmem:[%s1221_s21 + $0x168] sm:$0xff]  ;;  %v387_v3 = vld [vmem:[%s1221_s21 + $0x60] sm:$0xff]  ;;  %v405_v5 = vld [vmem:[%s1221_s21 + $0xf0] sm:$0xff] }
  0x30   : > { %1007 = vmatprep.subr.bf16.mxu0 %v1006_v34  ;;  %v388_v4 = vld [vmem:[%s1221_s21 + $0x68] sm:$0xff]  ;;  %v406_v6 = vld [vmem:[%s1221_s21 + $0xf8] sm:$0xff]  ;;  %v1045_v9 = vpack.c.bf16 %v420_v0, %v419_v62  ;;  %v421_v11 = vld [vmem:[%s1221_s21 + $0x170] sm:$0xff]  ;;  %v791_v62 = vlaneseq }
  0x31   : > { %v435_v7 = vld [vmem:[%s1417_s5 + $0x18] sm:$0xff]  ;;  %v433_v8 = vld [vmem:[%s1417_s5 + $0x8] sm:$0xff]  ;;  %v1020_v10 = vpack.c.bf16 %v388_v4, %v387_v3  ;;  %v1022_v12 = vpack.c.bf16 %v406_v6, %v405_v5  ;;  %v389_v14 = vld [vmem:[%s1221_s21 + $0x70] sm:$0xff]  ;;  %v788_v6 = vstv %s787_s26 }
  0x32   : > { %1037 = vmatpush1.bf16.msra.mxu1 %v1036_v40  ;;  %v422_v13 = vld [vmem:[%s1221_s21 + $0x178] sm:$0xff]  ;;  %453 = vperm.xlu1 %1092, %v435_v7   ;;  %v653_v16 = vld [vmem:[%s1418_s6 + $0x8] sm:$0xff]  ;;  %v652_v17 = vld [vmem:[%s1418_s6] sm:$0xff] }
  0x33   : > { %1009 = vmatpush3.bf16.msra.mxu0 %v1008_v41  ;;  %1038 = vmatprep.subr.bf16.mxu1 %v1132_v1  ;;  %v390_v15 = vld [vmem:[%s1221_s21 + $0x78] sm:$0xff]  ;;  %v1048_v18 = vpack.c.bf16 %v422_v13, %v421_v11  ;;  %v423_v20 = vld [vmem:[%s1221_s21 + $0x180] sm:$0xff]  ;;  %v424_v21 = vld [vmem:[%s1221_s21 + $0x188] sm:$0xff] }
  0x34   : > { %1011 = vmatprep.subr.bf16.mxu0 %v1010_v43  ;;  %443 = vperm.xlu0 %1091, %v433_v8   ;;  %v1024_v19 = vpack.c.bf16 %v390_v15, %v389_v14  ;;  %v651_v22 = vld [vmem:[%s347_s14] sm:$0xff]  ;;  %v655_v23 = vld [vmem:[%s1418_s6 + $0x18] sm:$0xff]  ;;  %v654_v24 = vld [vmem:[%s1418_s6 + $0x10] sm:$0xff]  ;;  %v1051_v26 = vpack.c.bf16 %v424_v21, %v423_v20  ;;  %v792_v8 = vshrl.u32 %v791_v62, 7 }
  0x35   : > { %v359_v25 = vld [vmem:[%s1415_s3] sm:$0xff]  ;;  %v364_v27 = vld [vmem:[%s1415_s3 + $0x28] sm:$0xff]  ;;  %v425_v28 = vld [vmem:[%s1221_s21 + $0x190] sm:$0xff] }
  0x36   : > { %1040 = vmatpush1.bf16.msra.mxu1 %v1039_v49  ;;  %663 = vperm.xlu1 %1092, %v653_v16   ;;  %v426_v29 = vld [vmem:[%s1221_s21 + $0x198] sm:$0xff]  ;;  %v363_v30 = vld [vmem:[%s1415_s3 + $0x20] sm:$0xff]  ;;  %v368_v32 = vld [vmem:[%s1415_s3 + $0x48] sm:$0xff] }
  0x37   : > { %1013 = vmatpush3.bf16.msra.mxu0 %v1012_v50  ;;  %1041 = vmatprep.subr.bf16.mxu1 %v1132_v1  ;;  %v1054_v31 = vpack.c.bf16 %v426_v29, %v425_v28  ;;  %v427_v33 = vld [vmem:[%s1221_s21 + $0x1a0] sm:$0xff]  ;;  %v428_v34 = vld [vmem:[%s1221_s21 + $0x1a8] sm:$0xff]  ;;  %v429_v38 = vld [vmem:[%s1221_s21 + $0x1b0] sm:$0xff] }
  0x38   : > { %1015 = vmatprep.subr.bf16.mxu0 %v1014_v52  ;;  %658 = vperm.xlu0 %1091, %v652_v17   ;;  %v367_v35 = vld [vmem:[%s1415_s3 + $0x40] sm:$0xff]  ;;  %v1057_v36 = vpack.c.bf16 %v428_v34, %v427_v33  ;;  %v372_v37 = vld [vmem:[%s1415_s3 + $0x68] sm:$0xff]  ;;  %v430_v39 = vld [vmem:[%s1221_s21 + $0x1b8] sm:$0xff] }
  0x39   : > { %v371_v40 = vld [vmem:[%s1415_s3 + $0x60] sm:$0xff]  ;;  %v1060_v41 = vpack.c.bf16 %v430_v39, %v429_v38  ;;  %v648_v43 = vld [vmem:[%s1416_s4 + $0x8] sm:$0xff]  ;;  %v361_v46 = vld [vmem:[%s1415_s3 + $0x10] sm:$0xff] }
  0x3a   : > { %1043 = vmatpush1.bf16.msra.mxu1 %v1042_v60  ;;  %673 = vperm.xlu1 %1092, %v655_v23   ;;  %v647_v42 = vld [vmem:[%s1416_s4] sm:$0xff]  ;;  %v366_v47 = vld [vmem:[%s1415_s3 + $0x38] sm:$0xff]  ;;  %v365_v49 = vld [vmem:[%s1415_s3 + $0x30] sm:$0xff] }
  0x3b   : > { %1017 = vmatpush3.bf16.msra.mxu0 %v1016_v61  ;;  %1044 = vmatprep.subr.bf16.mxu1 %v1132_v1  ;;  %v431_v45 = vld [vmem:[%s1221_s21 + $0x1c0] sm:$0xff]  ;;  %v650_v48 = vld [vmem:[%s1416_s4 + $0x18] sm:$0xff]  ;;  %v369_v51 = vld [vmem:[%s1415_s3 + $0x50] sm:$0xff] }
  0x3c   : > { %1019 = vmatprep.subr.bf16.mxu0 %v1018_v63  ;;  %668 = vperm.xlu0 %1091, %v654_v24   ;;  %v370_v50 = vld [vmem:[%s1415_s3 + $0x58] sm:$0xff]  ;;  %v373_v53 = vld [vmem:[%s1415_s3 + $0x70] sm:$0xff]  ;;  %v786_v5 = vld [vmem:[%s1419_s7] sm:$0x1] }
  0x3d   : > { %v374_v52 = vld [vmem:[%s1415_s3 + $0x78] sm:$0xff]  ;;  %vm789_vm2 = vcmp.ge.s32.totalorder %v786_v5, %v788_v6 }
  0x3e   : > { %1046 = vmatpush1.bf16.msra.mxu1 %v1045_v9  ;;  %v790_v15 = vsel %vm789_vm2, 1, %v1133_v2 }
  0x3f   : > { %1021 = vmatpush3.bf16.msra.mxu0 %v1020_v10  ;;  %1047 = vmatprep.subr.bf16.mxu1 %v1132_v1 }
  0x40   : > { %1023 = vmatprep.subr.bf16.mxu0 %v1022_v12  ;;  %v793_v12 = vsub.s32 0, %v792_v8 }
  0x42   : > { %1049 = vmatpush1.bf16.msra.mxu1 %v1048_v18  ;;  %v794_v24 = vrot.slane %v790_v15, %v793_v12 }
  0x43   : > { %1025 = vmatpush3.bf16.msra.mxu0 %v1024_v19  ;;  %1050 = vmatprep.subr.bf16.mxu1 %v1132_v1 }
  0x44   : > { %986 = vmatprep.subr.mxu0 %v651_v22  ;;  %vm795_vm3 = vcmp.eq.s32.totalorder %v794_v24, 1 }
  0x46   : > { %534 = vmatmul.mubr.f32.vlgmr.msra.gmra.mrb[0].mxu0 %v359_v25  ;;  %1052 = vmatpush1.bf16.msra.mxu1 %v1051_v26 }
  0x47   : > { %538 = vmatprep.mubr.f32.mxu0 %v364_v27  ;;  %1053 = vmatprep.subr.bf16.mxu1 %v1132_v1 }
  0x48   : > { %987 = vmatpush3.msra.mxu0 %v651_v22 }
  0x4a   : > { %539 = vmatmul.mubr.f32.gmra.mrb[2].mxu0 %v363_v30  ;;  %1055 = vmatpush1.bf16.msra.mxu1 %v1054_v31 }
  0x4b   : > { %543 = vmatprep.mubr.f32.mxu0 %v368_v32  ;;  %1056 = vmatprep.subr.bf16.mxu1 %v1132_v1 }
  0x4e   : > { %544 = vmatmul.mubr.f32.gmra.mrb[4].mxu0 %v367_v35  ;;  %1058 = vmatpush1.bf16.msra.mxu1 %v1057_v36 }
  0x4f   : > { %548 = vmatprep.mubr.f32.mxu0 %v372_v37  ;;  %1059 = vmatprep.subr.bf16.mxu1 %v1132_v1  ;;  %v649_v1 = vld [vmem:[%s1416_s4 + $0x10] sm:$0xff] }
  0x52   : > { %549 = vmatmul.mubr.f32.gmra.mrb[6].mxu0 %v371_v40  ;;  %1061 = vmatpush1.bf16.msra.mxu1 %v1060_v41 }
  0x53   : > { %988 = vmatprep.mubr.msk.f32.mxu0 %vm676_vm1, %v647_v42  ;;  %602 = vmatprep.subr.mxu1 %v1134_v44 }
  0x56   : > { %989 = vmatmul.mubr.msk.f32.vlgmr.msra.gmra.mrb[8].mxu0 %vm676_vm1, %v648_v43  ;;  %603 = vmatpush1.msra.mxu1 %v431_v45 }
  0x57   : > { %991 = vmatprep.mubr.msk.f32.mxu0 %vm676_vm1, %v649_v1  ;;  %619 = vmatmul.mubr.f32.vlgmr.msra.gmra.mrb[0].mxu1 %v361_v46 }
  0x58   : > { %927 = vmatprep.mubr.msk.f32.mxu1 %vm456_vm0, %v366_v47 }
  0x5a   : > { %992 = vmatmul.mubr.msk.f32.gmra.mrb[10].mxu0 %vm676_vm1, %v650_v48 }
  0x5b   : > { %624 = vmatmul.mubr.f32.gmra.mrb[2].mxu1 %v365_v49 }
  0x5c   : > { %928 = vmatprep.mubr.msk.f32.mxu1 %vm456_vm0, %v370_v50 }
  0x5f   : > { %629 = vmatmul.mubr.f32.gmra.mrb[4].mxu1 %v369_v51 }
  0x60   : > { %929 = vmatprep.mubr.msk.f32.mxu1 %vm456_vm0, %v374_v52 }
  0x63   : > { %634 = vmatmul.mubr.f32.gmra.mrb[6].mxu1 %v373_v53 }
  0x97   : > { %v449_v59 = vpop.permute.xlu1 %448 }
  0x98   : > { %v439_v57 = vpop.permute.xlu0 %438 }
  0xb1   : > { %v454_v7 = vpop.permute.xlu1 %453 }
  0xb3   : > { %v444_v3 = vpop.permute.xlu0 %443 }
  0xb5   : > { %v664_v16 = vpop.permute.xlu1 %663 }
  0xb7   : > { %v659_v13 = vpop.permute.xlu0 %658 }
  0xb9   : > { %v674_v37 = vpop.permute.xlu1 %673 }
  0xbb   : > { %v669_v31 = vpop.permute.xlu0 %668 }
 0x119   : > { %v969_v54 = vpop.f32.mrb[0].mxu0 }
 0x11a   : > { %v970_v55 = vpop.f32.mrb[1].mxu0 }
 0x11b   : > { %v971_v56 = vadd.f32 %v970_v55, %v969_v54 }
 0x11d   : > { %v972_v58 = vpop.f32.mrb[2].mxu0  ;;  %v536_v17 = vadd.f32 %v971_v56, %v439_v57 }
 0x11e   : > { %v973_v60 = vpop.f32.mrb[3].mxu0 }
 0x11f   : > { %v974_v61 = vadd.f32 %v973_v60, %v972_v58 }
 0x121   : > { %v975_v63 = vpop.f32.mrb[4].mxu0  ;;  %v541_v28 = vadd.f32 %v974_v61, %v444_v3 }
 0x122   : > { %v976_v0 = vpop.f32.mrb[5].mxu0 }
 0x123   : > { %v977_v4 = vadd.f32 %v976_v0, %v975_v63 }
 0x125   : > { %v978_v9 = vpop.f32.mrb[6].mxu0  ;;  %v546_v40 = vadd.f32 %v977_v4, %v449_v59 }
 0x126   : > { %v979_v10 = vpop.f32.mrb[7].mxu0 }
 0x127   : > { %v980_v11 = vadd.f32 %v979_v10, %v978_v9 }
 0x129   : > { %v990_v14 = vpop.f32.mrb[8].mxu0  ;;  %v551_v50 = vadd.f32 %v980_v11, %v454_v7 }
 0x12a   : > { %v755_v18 = vpop.f32.mrb[9].mxu0  ;;  %v761_v19 = vadd.f32 %v990_v14, %v664_v16  ;;  %v620_v20 = vpop.f32.mrb[0].mxu1 }
 0x12b   : > { %v756_v21 = vadd.f32 %v755_v18, %v659_v13  ;;  %v621_v22 = vadd.f32 %v620_v20, %v536_v17  ;;  %v622_v23 = vpop.f32.mrb[1].mxu1 }
 0x12c   : > { %v775_v30 = vmax.f32 %v761_v19, 0.0 }
 0x12d   : > { %v774_v25 = vmax.f32 %v756_v21, 0.0  ;;  %v993_v26 = vpop.f32.mrb[10].mxu0  ;;  %v639_v27 = vmax.f32 %v621_v22, 0.0 }
 0x12e   : > { %v765_v29 = vpop.f32.mrb[11].mxu0  ;;  %v625_v2 = vpop.f32.mrb[2].mxu1  ;;  %v779_v41 = vmin.f32 %v775_v30, 20.0  ;;  %v771_v42 = vadd.f32 %v993_v26, %v674_v37 }
 0x12f   : > { %v778_v32 = vmin.f32 %v774_v25, 20.0  ;;  %v643_v33 = vmin.f32 %v639_v27, 20.0  ;;  %v626_v34 = vadd.f32 %v625_v2, %v541_v28  ;;  %v766_v35 = vadd.f32 %v765_v29, %v669_v31  ;;  %v627_v36 = vpop.f32.mrb[3].mxu1 }
 0x130   : > { %v777_v51 = vmax.f32 %v771_v42, 0.0 }
 0x131   : > { %v782_v38 = vadd.f32 %v778_v32, %v643_v33  ;;  %v640_v39 = vmax.f32 %v626_v34, 0.0  ;;  %v776_v1 = vmax.f32 %v766_v35, 0.0 }
 0x132   : > { %v630_v43 = vpop.f32.mrb[4].mxu1  ;;  %v781_v60 = vmin.f32 %v777_v51, 20.0 }
 0x133   : > { %v796_v44 = vsel %vm795_vm3, 0.0, %v782_v38  ;;  %v644_v45 = vmin.f32 %v640_v39, 20.0  ;;  %v631_v46 = vadd.f32 %v630_v43, %v546_v40  ;;  %v632_v47 = vpop.f32.mrb[5].mxu1  ;;  %v780_v54 = vmin.f32 %v776_v1, 20.0 }
 0x134   : > { %801 = vst.msk [vmem:[%s1389_s9] sm:$0xff] %vm800_vm4, %v796_v44 }
 0x135   : > { %v783_v48 = vadd.f32 %v779_v41, %v644_v45  ;;  %v641_v49 = vmax.f32 %v631_v46, 0.0 }
 0x136   : > { %v635_v52 = vpop.f32.mrb[6].mxu1 }
 0x137   : > { %v797_v53 = vsel %vm795_vm3, 0.0, %v783_v48  ;;  %v645_v55 = vmin.f32 %v641_v49, 20.0  ;;  %v636_v56 = vadd.f32 %v635_v52, %v551_v50  ;;  %v637_v57 = vpop.f32.mrb[7].mxu1 }
 0x138   : > { %802 = vst.msk [vmem:[%s1389_s9 + $0x8] sm:$0xff] %vm800_vm4, %v797_v53 }
 0x139   : > { %v784_v58 = vadd.f32 %v780_v54, %v645_v55  ;;  %v642_v59 = vmax.f32 %v636_v56, 0.0 }
 0x13b   : > { %v798_v61 = vsel %vm795_vm3, 0.0, %v784_v58  ;;  %v646_v62 = vmin.f32 %v642_v59, 20.0 }
 0x13c   : > { %803 = vst.msk [vmem:[%s1389_s9 + $0x10] sm:$0xff] %vm800_vm4, %v798_v61 }
 0x13d   : > { %v785_v63 = vadd.f32 %v781_v60, %v646_v62 }
 0x13f   : > { %v799_v0 = vsel %vm795_vm3, 0.0, %v785_v63 }
 0x140   : > { %804 = vst.msk [vmem:[%s1389_s9 + $0x18] sm:$0xff] %vm800_vm4, %v799_v0 }
 0x141 PF: > { %s24_s12 = sadd.s32 1, %s1129_s12   ;;  %s1421_s10 = smov %s1125_s11 }
 0x142   : > { %p21_p10 = scmp.ge.s32.totalorder %s24_s12, 4   ;;  %s1422_s11 = smov %s1424_s0 }
 0x144   :  { %23 = sbr.rel (!%p21_p10) target bundleno = 17 (0x11), region = 84 }

// kernel: tile.19
= control target key start
LH: loop header
LB: loop body
LE: loop exit
PB: predicated region body
PF: predicated region fallthrough
CT: control target
= control target key end

     0   :  { %vm7_vm0 = vcmask 64512   ;;  %s37_s8 = smov 8   ;;  %s38_s9 = smov 16   ;;  %vm13_vm1 = vcmask 261312   ;;  %vm19_vm2 = vcmask 195712   ;;  %vm25_vm3 = vcmask 130112   ;;  %s55_s0 = inlined_call_operand.vmem [shape: s32[4,8], index: 0, kind: input, shape index: {}]   ;;  %s56_s1 = inlined_call_operand.vmem [shape: s32[1,32], index: 1, kind: output, shape index: {}]  }
   0x1   :  { %v4_v0 = vld [vmem:[%s55_s0] sm:$0xf]  ;;  %s36_s0 = smov 24  }
   0x2   :  { %5 = vst [vmem:[#allocation1] sm:$0xf] %v4_v0 }
   0x9   :  { %v10_v1 = vld [vmem:[#allocation1 + $0x3] sm:$0x1]   ;;  %v22_v2 = vld [vmem:[#allocation1 + $0x1] sm:$0x1]   ;;  %v6_v3 = vld [vmem:[#allocation1] sm:$0x1]  }
   0xa   :  { %11 = vrot.lane.b32.xlu0 %v10_v1, %s36_s0  ;;  %23 = vrot.lane.b32.xlu1 %v22_v2, %s37_s8  ;;  %v16_v4 = vld [vmem:[#allocation1 + $0x2] sm:$0x1]   ;;  %8 = vst.msk [vmem:[#allocation0] sm:$0x1] %vm7_vm0, %v6_v3  }
   0xe   :  { %17 = vrot.lane.b32.xlu0 %v16_v4, %s38_s9 }
  0x7c   :  { %v12_v5 = vpop.permute.xlu0 %11   ;;  %v24_v6 = vpop.permute.xlu1 %23  }
  0x7d   :  { %14 = vst.msk [vmem:[#allocation0] sm:$0x1] %vm13_vm1, %v12_v5  }
  0x80   :  { %v18_v7 = vpop.permute.xlu0 %17  }
  0x81   :  { %20 = vst.msk [vmem:[#allocation0] sm:$0x1] %vm19_vm2, %v18_v7  }
  0x82   :  { %26 = vst.msk [vmem:[#allocation0] sm:$0x1] %vm25_vm3, %v24_v6  }
  0x89   :  { %v30_v8 = vld [vmem:[#allocation0] sm:$0x1] }
  0x8a   :  { %32 = vst [vmem:[%s56_s1] sm:$0x1] %v30_v8 }

// kernel: a_call__.3
= control target key start
LH: loop header
LB: loop body
LE: loop exit
PB: predicated region body
PF: predicated region fallthrough
CT: control target
= control target key end

     0   :  { %s8570_s0 = inlined_call_operand.vmem [shape: s32[2], index: 0, kind: input, shape index: {}]   ;;  %s8571_s1 = inlined_call_operand.vmem [shape: f32[2,7392,32], index: 1, kind: input, shape index: {}]   ;;  %s8572_s2 = inlined_call_operand.vmem [shape: f32[2,32,32], index: 2, kind: input, shape index: {}]   ;;  %s8573_s3 = inlined_call_operand.vmem [shape: f32[32,7392], index: 3, kind: input, shape index: {}]   ;;  %s8574_s4 = inlined_call_operand.vmem [shape: f32[32,32], index: 4, kind: input, shape index: {}]   ;;  %s8575_s5 = inlined_call_operand.vmem [shape: f32[32,1], index: 5, kind: input, shape index: {}]   ;;  %s8576_s6 = inlined_call_operand.vmem [shape: f32[32,1], index: 6, kind: input, shape index: {}]   ;;  %s8577_s7 = inlined_call_operand.vmem [shape: s32[1,32], index: 7, kind: input, shape index: {}]   ;;  %s8578_s8 = inlined_call_operand.vmem [shape: f32[2,32,32], index: 8, kind: output, shape index: {}]  }
   0x1   :  { %s13_s29 = sshll.u32 %s8570_s0, 4  ;;  %s14_s29 = int_to_ptr.vmem [resolvable:$true] %s13_s29 }
   0x2   :  { %s6555_s30 = scalar_lea.vmem %s14_s29, 16  ;;  %p6560_p1 = scmp.lt.s32.totalorder %s14_s29, %s14_s29 }
   0x3   :  { %p6556_p0 = scmp.ne.s32.totalorder %s14_s29, %s6555_s30  ;;  %p6561_p2 = scmp.lt.s32.totalorder %s6555_s30, %s6555_s30 }
   0x5   :  { %p6562_p3 = por %p6561_p2, %p6560_p1 }
   0x7   :  { %p6563_p4 = pnand %p6562_p3, %p6556_p0 }
   0x9   :  { %6566 = shalt.err (!%p6563_p4)  }
   0xa   :  { %s6593_s9 = smov [#allocation3]  }
   0xb   :  { %16 = dma.vmem_to_smem %s14_s29, 16, %s6593_s9, [#allocation2] }
   0xc   :  { %6579 = dma.done.wait [#allocation2], 16 }
   0xd   :  { %6580 = vsyncadd [#allocation2], 4294967280 }
   0xe   :  { %18 = sfence }
   0xf   :  { %s6644_s10 = smov 0   ;;  %s6646_s11 = smov 0  }
  0x10   :  { %s6648_s12 = smov 0  }
  0x11 LB: > { %s36_s0 = sadd.s32 1, %s6587_s11  ;;  %p4307_p5 = scmp.ge.s32.totalorder %s6591_s12, 1  ;;  %s6591_s12 = sphi %s6648_s12, %s24_s12   ;;  %s6587_s11 = sphi %s6646_s11, %s8580_s11   ;;  %s6583_s10 = sphi %s6644_s10, %s8579_s10  }
  0x12   : > { %p38_p6 = scmp.ge.s32.totalorder %s36_s0, 2  ;;  %p286_p7 = scmp.lt.s32.totalorder %s6591_s12, 3 }
  0x14   : > { %s8582_s0 = smov (%p38_p6, %s36_s0), 0  ;;  %p287_p8 = pnand %p4307_p5, %p286_p7 }
  0x15   : > { %p335_p9 = scmp.lt.s32.totalorder (!%p287_p8), %s6583_s10, 1  ;;  %v363_v0 = vld [vmem:[%s8573_s3 + $0x8] sm:$0xff] (!%p287_p8)  ;;  %v6594_v2 = vmov (!%p287_p8), 0   ;;  %vm1542_vm0 = vcmask (!%p287_p8), 785408   ;;  %vm4060_vm1 = vcmask (!%p287_p8), 261120   ;;  %s4171_s15 = sld [smem:[#allocation3 + %s6583_s10]] (!%p287_p8) }
  0x16   : > { %290 = sbr.rel (%p287_p8) target bundleno = 758 (0x2f6), region = 48  ;;  %v367_v1 = vld [vmem:[%s8573_s3 + $0x28] sm:$0xff] (!%p287_p8)  ;;  %1619 = vmatprep.mubr.f32.mxu1 (!%p287_p8), %v363_v0  ;;  %6553 = vset.pattern.permute.xlu0 (!%p287_p8), %v6594_v2 }
  0x17   : > { %1789 = vmatprep.mubr.f32.mxu0 (!%p287_p8), %v367_v1  ;;  %6554 = vset.pattern.permute.xlu1 (!%p287_p8), %v6594_v2 }
  0x1d   : > { %s6672_s17 = scalar_select %p335_p9, %s6583_s10, 1 }
  0x1f   : > { %s6525_s18 = smul.u32 7392, %s6672_s17  ;;  %s4323_s26 = sshll.u32 %s6672_s17, 5 }
  0x20   : > { %s8445_s9 = scalar_lea.vmem %s8572_s2, %s4323_s26  ;;  %s361_s19 = scalar_lea.vmem %s8578_s8, %s4323_s26 }
  0x21   : > { %s6680_s21 = scalar_lea.vmem %s8571_s1, %s6525_s18 }
  0x22   : > { %v610_v3 = vld [vmem:[%s6680_s21 + $0x80] sm:$0xff]  ;;  %v611_v4 = vld [vmem:[%s6680_s21 + $0x88] sm:$0xff]  ;;  %v612_v14 = vld [vmem:[%s6680_s21 + $0x90] sm:$0xff] }
  0x23   : > { %v674_v5 = vld [vmem:[%s6680_s21 + $0x280] sm:$0xff]  ;;  %v5579_v6 = vpack.c.bf16 %v611_v4, %v610_v3  ;;  %v675_v7 = vld [vmem:[%s6680_s21 + $0x288] sm:$0xff]  ;;  %v613_v16 = vld [vmem:[%s6680_s21 + $0x98] sm:$0xff] }
  0x24   : > { %v594_v8 = vld [vmem:[%s6680_s21] sm:$0xff]  ;;  %v595_v9 = vld [vmem:[%s6680_s21 + $0x8] sm:$0xff]  ;;  %v5643_v10 = vpack.c.bf16 %v675_v7, %v674_v5  ;;  %v676_v17 = vld [vmem:[%s6680_s21 + $0x290] sm:$0xff]  ;;  %v5583_v19 = vpack.c.bf16 %v613_v16, %v612_v14 }
  0x25   : > { %v5581_v11 = vpack.c.bf16 %v595_v9, %v594_v8  ;;  %v658_v12 = vld [vmem:[%s6680_s21 + $0x200] sm:$0xff]  ;;  %v659_v13 = vld [vmem:[%s6680_s21 + $0x208] sm:$0xff]  ;;  %5580 = vmatprep.subr.bf16.mxu1 %v5579_v6  ;;  %v677_v18 = vld [vmem:[%s6680_s21 + $0x298] sm:$0xff] }
  0x26   : > { %v5645_v15 = vpack.c.bf16 %v659_v13, %v658_v12  ;;  %5644 = vmatprep.subr.bf16.mxu0 %v5643_v10  ;;  %v5647_v20 = vpack.c.bf16 %v677_v18, %v676_v17  ;;  %v596_v21 = vld [vmem:[%s6680_s21 + $0x10] sm:$0xff]  ;;  %v597_v22 = vld [vmem:[%s6680_s21 + $0x18] sm:$0xff]  ;;  %v614_v26 = vld [vmem:[%s6680_s21 + $0xa0] sm:$0xff] }
  0x27   : > { %5582 = vmatpush3.bf16.msra.mxu1 %v5581_v11  ;;  %v660_v23 = vld [vmem:[%s6680_s21 + $0x210] sm:$0xff]  ;;  %v5585_v24 = vpack.c.bf16 %v597_v22, %v596_v21  ;;  %v661_v25 = vld [vmem:[%s6680_s21 + $0x218] sm:$0xff]  ;;  %v615_v27 = vld [vmem:[%s6680_s21 + $0xa8] sm:$0xff] }
  0x28   : > { %5646 = vmatpush3.bf16.msra.mxu0 %v5645_v15  ;;  %5584 = vmatprep.subr.bf16.mxu1 %v5583_v19  ;;  %v5649_v28 = vpack.c.bf16 %v661_v25, %v660_v23  ;;  %v5587_v29 = vpack.c.bf16 %v615_v27, %v614_v26  ;;  %v678_v30 = vld [vmem:[%s6680_s21 + $0x2a0] sm:$0xff]  ;;  %v679_v31 = vld [vmem:[%s6680_s21 + $0x2a8] sm:$0xff]  ;;  %v616_v38 = vld [vmem:[%s6680_s21 + $0xb0] sm:$0xff] }
  0x29   : > { %5648 = vmatprep.subr.bf16.mxu0 %v5647_v20  ;;  %v598_v32 = vld [vmem:[%s6680_s21 + $0x20] sm:$0xff]  ;;  %v5651_v33 = vpack.c.bf16 %v679_v31, %v678_v30  ;;  %v599_v34 = vld [vmem:[%s6680_s21 + $0x28] sm:$0xff]  ;;  %v617_v39 = vld [vmem:[%s6680_s21 + $0xb8] sm:$0xff] }
  0x2a   : > { %v662_v35 = vld [vmem:[%s6680_s21 + $0x220] sm:$0xff]  ;;  %v663_v36 = vld [vmem:[%s6680_s21 + $0x228] sm:$0xff]  ;;  %v5589_v37 = vpack.c.bf16 %v599_v34, %v598_v32  ;;  %v680_v40 = vld [vmem:[%s6680_s21 + $0x2b0] sm:$0xff]  ;;  %v5591_v42 = vpack.c.bf16 %v617_v39, %v616_v38 }
  0x2b   : > { %5586 = vmatpush3.bf16.msra.mxu1 %v5585_v24  ;;  %v5653_v41 = vpack.c.bf16 %v663_v36, %v662_v35  ;;  %v681_v43 = vld [vmem:[%s6680_s21 + $0x2b8] sm:$0xff]  ;;  %v600_v44 = vld [vmem:[%s6680_s21 + $0x30] sm:$0xff]  ;;  %v618_v49 = vld [vmem:[%s6680_s21 + $0xc0] sm:$0xff] }
  0x2c   : > { %5650 = vmatpush3.bf16.msra.mxu0 %v5649_v28  ;;  %5588 = vmatprep.subr.bf16.mxu1 %v5587_v29  ;;  %v601_v45 = vld [vmem:[%s6680_s21 + $0x38] sm:$0xff]  ;;  %v5655_v46 = vpack.c.bf16 %v681_v43, %v680_v40  ;;  %v664_v47 = vld [vmem:[%s6680_s21 + $0x230] sm:$0xff]  ;;  %v619_v50 = vld [vmem:[%s6680_s21 + $0xc8] sm:$0xff] }
  0x2d   : > { %5652 = vmatprep.subr.bf16.mxu0 %v5651_v33  ;;  %v665_v48 = vld [vmem:[%s6680_s21 + $0x238] sm:$0xff]  ;;  %v682_v51 = vld [vmem:[%s6680_s21 + $0x2c0] sm:$0xff]  ;;  %v683_v52 = vld [vmem:[%s6680_s21 + $0x2c8] sm:$0xff]  ;;  %v5593_v53 = vpack.c.bf16 %v601_v45, %v600_v44  ;;  %v5595_v55 = vpack.c.bf16 %v619_v50, %v618_v49 }
  0x2e   : > { %v5657_v54 = vpack.c.bf16 %v665_v48, %v664_v47  ;;  %v602_v56 = vld [vmem:[%s6680_s21 + $0x40] sm:$0xff]  ;;  %v603_v57 = vld [vmem:[%s6680_s21 + $0x48] sm:$0xff]  ;;  %v5659_v59 = vpack.c.bf16 %v683_v52, %v682_v51  ;;  %v620_v61 = vld [vmem:[%s6680_s21 + $0xd0] sm:$0xff] }
  0x2f   : > { %5590 = vmatpush3.bf16.msra.mxu1 %v5589_v37  ;;  %v666_v58 = vld [vmem:[%s6680_s21 + $0x240] sm:$0xff]  ;;  %v667_v60 = vld [vmem:[%s6680_s21 + $0x248] sm:$0xff]  ;;  %v621_v62 = vld [vmem:[%s6680_s21 + $0xd8] sm:$0xff]  ;;  %v5597_v1 = vpack.c.bf16 %v603_v57, %v602_v56 }
  0x30   : > { %5654 = vmatpush3.bf16.msra.mxu0 %v5653_v41  ;;  %5592 = vmatprep.subr.bf16.mxu1 %v5591_v42  ;;  %v684_v63 = vld [vmem:[%s6680_s21 + $0x2d0] sm:$0xff]  ;;  %v685_v0 = vld [vmem:[%s6680_s21 + $0x2d8] sm:$0xff]  ;;  %v5661_v3 = vpack.c.bf16 %v667_v60, %v666_v58  ;;  %v5599_v4 = vpack.c.bf16 %v621_v62, %v620_v61  ;;  %v622_v10 = vld [vmem:[%s6680_s21 + $0xe0] sm:$0xff] }
  0x31   : > { %5656 = vmatprep.subr.bf16.mxu0 %v5655_v46  ;;  %v604_v5 = vld [vmem:[%s6680_s21 + $0x50] sm:$0xff]  ;;  %v605_v6 = vld [vmem:[%s6680_s21 + $0x58] sm:$0xff]  ;;  %v5663_v8 = vpack.c.bf16 %v685_v0, %v684_v63  ;;  %v623_v11 = vld [vmem:[%s6680_s21 + $0xe8] sm:$0xff] }
  0x32   : > { %v668_v7 = vld [vmem:[%s6680_s21 + $0x250] sm:$0xff]  ;;  %v669_v9 = vld [vmem:[%s6680_s21 + $0x258] sm:$0xff]  ;;  %v686_v12 = vld [vmem:[%s6680_s21 + $0x2e0] sm:$0xff]  ;;  %v5601_v14 = vpack.c.bf16 %v605_v6, %v604_v5  ;;  %v5603_v16 = vpack.c.bf16 %v623_v11, %v622_v10 }
  0x33   : > { %5594 = vmatpush3.bf16.msra.mxu1 %v5593_v53  ;;  %v687_v13 = vld [vmem:[%s6680_s21 + $0x2e8] sm:$0xff]  ;;  %v5665_v15 = vpack.c.bf16 %v669_v9, %v668_v7  ;;  %v606_v17 = vld [vmem:[%s6680_s21 + $0x60] sm:$0xff]  ;;  %v624_v22 = vld [vmem:[%s6680_s21 + $0xf0] sm:$0xff] }
  0x34   : > { %5658 = vmatpush3.bf16.msra.mxu0 %v5657_v54  ;;  %5596 = vmatprep.subr.bf16.mxu1 %v5595_v55  ;;  %v607_v18 = vld [vmem:[%s6680_s21 + $0x68] sm:$0xff]  ;;  %v670_v19 = vld [vmem:[%s6680_s21 + $0x260] sm:$0xff]  ;;  %v5667_v20 = vpack.c.bf16 %v687_v13, %v686_v12  ;;  %v625_v23 = vld [vmem:[%s6680_s21 + $0xf8] sm:$0xff] }
  0x35   : > { %5660 = vmatprep.subr.bf16.mxu0 %v5659_v59  ;;  %v671_v21 = vld [vmem:[%s6680_s21 + $0x268] sm:$0xff]  ;;  %v688_v24 = vld [vmem:[%s6680_s21 + $0x2f0] sm:$0xff]  ;;  %v689_v25 = vld [vmem:[%s6680_s21 + $0x2f8] sm:$0xff]  ;;  %v5605_v26 = vpack.c.bf16 %v607_v18, %v606_v17  ;;  %v5607_v28 = vpack.c.bf16 %v625_v23, %v624_v22 }
  0x36   : > { %v5669_v27 = vpack.c.bf16 %v671_v21, %v670_v19  ;;  %v608_v29 = vld [vmem:[%s6680_s21 + $0x70] sm:$0xff]  ;;  %v609_v30 = vld [vmem:[%s6680_s21 + $0x78] sm:$0xff]  ;;  %v5671_v32 = vpack.c.bf16 %v689_v25, %v688_v24  ;;  %v642_v34 = vld [vmem:[%s6680_s21 + $0x180] sm:$0xff] }
  0x37   : > { %5598 = vmatpush3.bf16.msra.mxu1 %v5597_v1  ;;  %v672_v31 = vld [vmem:[%s6680_s21 + $0x270] sm:$0xff]  ;;  %v673_v33 = vld [vmem:[%s6680_s21 + $0x278] sm:$0xff]  ;;  %v643_v35 = vld [vmem:[%s6680_s21 + $0x188] sm:$0xff]  ;;  %v5609_v38 = vpack.c.bf16 %v609_v30, %v608_v29 }
  0x38   : > { %5662 = vmatpush3.bf16.msra.mxu0 %v5661_v3  ;;  %5600 = vmatprep.subr.bf16.mxu1 %v5599_v4  ;;  %v738_v36 = vld [vmem:[%s6680_s21 + $0x480] sm:$0xff]  ;;  %v739_v37 = vld [vmem:[%s6680_s21 + $0x488] sm:$0xff]  ;;  %v5673_v39 = vpack.c.bf16 %v673_v33, %v672_v31  ;;  %v5611_v40 = vpack.c.bf16 %v643_v35, %v642_v34  ;;  %v644_v46 = vld [vmem:[%s6680_s21 + $0x190] sm:$0xff] }
  0x39   : > { %5664 = vmatprep.subr.bf16.mxu0 %v5663_v8  ;;  %v626_v41 = vld [vmem:[%s6680_s21 + $0x100] sm:$0xff]  ;;  %v627_v42 = vld [vmem:[%s6680_s21 + $0x108] sm:$0xff]  ;;  %v5707_v44 = vpack.c.bf16 %v739_v37, %v738_v36  ;;  %v645_v47 = vld [vmem:[%s6680_s21 + $0x198] sm:$0xff] }
  0x3a   : > { %v722_v43 = vld [vmem:[%s6680_s21 + $0x400] sm:$0xff]  ;;  %v723_v45 = vld [vmem:[%s6680_s21 + $0x408] sm:$0xff]  ;;  %v740_v48 = vld [vmem:[%s6680_s21 + $0x490] sm:$0xff]  ;;  %v5613_v51 = vpack.c.bf16 %v627_v42, %v626_v41  ;;  %v5615_v54 = vpack.c.bf16 %v645_v47, %v644_v46 }
  0x3b   : > { %5602 = vmatpush3.bf16.msra.mxu1 %v5601_v14  ;;  %v741_v49 = vld [vmem:[%s6680_s21 + $0x498] sm:$0xff]  ;;  %v362_v50 = vld [vmem:[%s8573_s3] sm:$0xff]  ;;  %v5709_v53 = vpack.c.bf16 %v723_v45, %v722_v43  ;;  %v628_v55 = vld [vmem:[%s6680_s21 + $0x110] sm:$0xff] }
  0x3c   : > { %5666 = vmatpush3.bf16.msra.mxu0 %v5665_v15  ;;  %5604 = vmatprep.subr.bf16.mxu1 %v5603_v16  ;;  %v366_v52 = vld [vmem:[%s8573_s3 + $0x20] sm:$0xff]  ;;  %v629_v56 = vld [vmem:[%s6680_s21 + $0x118] sm:$0xff]  ;;  %v724_v57 = vld [vmem:[%s6680_s21 + $0x410] sm:$0xff]  ;;  %v5711_v58 = vpack.c.bf16 %v741_v49, %v740_v48 }
  0x3d   : > { %5668 = vmatprep.subr.bf16.mxu0 %v5667_v20  ;;  %v725_v59 = vld [vmem:[%s6680_s21 + $0x418] sm:$0xff]  ;;  %v646_v60 = vld [vmem:[%s6680_s21 + $0x1a0] sm:$0xff]  ;;  %v647_v61 = vld [vmem:[%s6680_s21 + $0x1a8] sm:$0xff]  ;;  %v5617_v1 = vpack.c.bf16 %v629_v56, %v628_v55 }
  0x3e   : > { %v742_v62 = vld [vmem:[%s6680_s21 + $0x4a0] sm:$0xff]  ;;  %v743_v63 = vld [vmem:[%s6680_s21 + $0x4a8] sm:$0xff]  ;;  %v421_v0 = vld [vmem:[%s8573_s3 + $0x1d8] sm:$0xff]  ;;  %v5713_v6 = vpack.c.bf16 %v725_v59, %v724_v57  ;;  %v5619_v7 = vpack.c.bf16 %v647_v61, %v646_v60 }
  0x3f   : > { %5606 = vmatpush3.bf16.msra.mxu1 %v5605_v26  ;;  %v420_v3 = vld [vmem:[%s8573_s3 + $0x1d0] sm:$0xff]  ;;  %v425_v4 = vld [vmem:[%s8573_s3 + $0x1f8] sm:$0xff]  ;;  %v630_v8 = vld [vmem:[%s6680_s21 + $0x120] sm:$0xff]  ;;  %v5715_v11 = vpack.c.bf16 %v743_v63, %v742_v62 }
  0x40   : > { %5670 = vmatpush3.bf16.msra.mxu0 %v5669_v27  ;;  %5608 = vmatprep.subr.bf16.mxu1 %v5607_v28  ;;  %v424_v5 = vld [vmem:[%s8573_s3 + $0x1f0] sm:$0xff]  ;;  %v631_v9 = vld [vmem:[%s6680_s21 + $0x128] sm:$0xff]  ;;  %v726_v10 = vld [vmem:[%s6680_s21 + $0x420] sm:$0xff] }
  0x41   : > { %5672 = vmatprep.subr.bf16.mxu0 %v5671_v32  ;;  %v727_v12 = vld [vmem:[%s6680_s21 + $0x428] sm:$0xff]  ;;  %v648_v13 = vld [vmem:[%s6680_s21 + $0x1b0] sm:$0xff]  ;;  %v649_v14 = vld [vmem:[%s6680_s21 + $0x1b8] sm:$0xff]  ;;  %v5621_v18 = vpack.c.bf16 %v631_v9, %v630_v8 }
  0x42   : > { %v744_v15 = vld [vmem:[%s6680_s21 + $0x4b0] sm:$0xff]  ;;  %v745_v16 = vld [vmem:[%s6680_s21 + $0x4b8] sm:$0xff]  ;;  %v479_v17 = vld [vmem:[%s8573_s3 + $0x3a8] sm:$0xff]  ;;  %v5717_v22 = vpack.c.bf16 %v727_v12, %v726_v10  ;;  %v5623_v23 = vpack.c.bf16 %v649_v14, %v648_v13 }
  0x43   : > { %5610 = vmatpush3.bf16.msra.mxu1 %v5609_v38  ;;  %v478_v19 = vld [vmem:[%s8573_s3 + $0x3a0] sm:$0xff]  ;;  %v483_v20 = vld [vmem:[%s8573_s3 + $0x3c8] sm:$0xff]  ;;  %v632_v24 = vld [vmem:[%s6680_s21 + $0x130] sm:$0xff]  ;;  %v5719_v27 = vpack.c.bf16 %v745_v16, %v744_v15 }
  0x44   : > { %5674 = vmatpush3.bf16.msra.mxu0 %v5673_v39  ;;  %5612 = vmatprep.subr.bf16.mxu1 %v5611_v40  ;;  %v482_v21 = vld [vmem:[%s8573_s3 + $0x3c0] sm:$0xff]  ;;  %v633_v25 = vld [vmem:[%s6680_s21 + $0x138] sm:$0xff]  ;;  %v728_v26 = vld [vmem:[%s6680_s21 + $0x430] sm:$0xff] }
  0x45   : > { %5708 = vmatprep.subr.bf16.mxu0 %v5707_v44  ;;  %v729_v28 = vld [vmem:[%s6680_s21 + $0x438] sm:$0xff]  ;;  %v650_v29 = vld [vmem:[%s6680_s21 + $0x1c0] sm:$0xff]  ;;  %v651_v30 = vld [vmem:[%s6680_s21 + $0x1c8] sm:$0xff]  ;;  %v5625_v34 = vpack.c.bf16 %v633_v25, %v632_v24 }
  0x46   : > { %1620 = vmatmul.mubr.f32.vlgmr.msra.gmra.mrb[0].mxu1 %v362_v50  ;;  %v746_v31 = vld [vmem:[%s6680_s21 + $0x4c0] sm:$0xff]  ;;  %v747_v32 = vld [vmem:[%s6680_s21 + $0x4c8] sm:$0xff]  ;;  %v537_v33 = vld [vmem:[%s8573_s3 + $0x578] sm:$0xff]  ;;  %v5721_v38 = vpack.c.bf16 %v729_v28, %v728_v26  ;;  %v5627_v39 = vpack.c.bf16 %v651_v30, %v650_v29 }
  0x47   : > { %5614 = vmatpush3.bf16.msra.mxu1 %v5613_v51  ;;  %1790 = vmatmul.mubr.f32.vlgmr.msra.gmra.mrb[0].mxu0 %v366_v52  ;;  %v536_v35 = vld [vmem:[%s8573_s3 + $0x570] sm:$0xff]  ;;  %v541_v36 = vld [vmem:[%s8573_s3 + $0x598] sm:$0xff]  ;;  %v634_v40 = vld [vmem:[%s6680_s21 + $0x140] sm:$0xff]  ;;  %v5723_v43 = vpack.c.bf16 %v747_v32, %v746_v31 }
  0x48   : > { %5710 = vmatpush3.bf16.msra.mxu0 %v5709_v53  ;;  %5616 = vmatprep.subr.bf16.mxu1 %v5615_v54  ;;  %v540_v37 = vld [vmem:[%s8573_s3 + $0x590] sm:$0xff]  ;;  %v635_v41 = vld [vmem:[%s6680_s21 + $0x148] sm:$0xff]  ;;  %v730_v42 = vld [vmem:[%s6680_s21 + $0x440] sm:$0xff] }
  0x49   : > { %5712 = vmatprep.subr.bf16.mxu0 %v5711_v58  ;;  %1624 = vmatprep.mubr.f32.mxu1 %v421_v0  ;;  %v731_v44 = vld [vmem:[%s6680_s21 + $0x448] sm:$0xff]  ;;  %v652_v45 = vld [vmem:[%s6680_s21 + $0x1d0] sm:$0xff]  ;;  %v653_v46 = vld [vmem:[%s6680_s21 + $0x1d8] sm:$0xff]  ;;  %v5629_v50 = vpack.c.bf16 %v635_v41, %v634_v40 }
  0x4a   : > { %1625 = vmatmul.mubr.f32.gmra.mrb[2].mxu1 %v420_v3  ;;  %1794 = vmatprep.mubr.f32.mxu0 %v425_v4  ;;  %v748_v47 = vld [vmem:[%s6680_s21 + $0x4d0] sm:$0xff]  ;;  %v749_v48 = vld [vmem:[%s6680_s21 + $0x4d8] sm:$0xff]  ;;  %v371_v51 = vld [vmem:[%s8573_s3 + $0x48] sm:$0xff]  ;;  %v5725_v52 = vpack.c.bf16 %v731_v44, %v730_v42  ;;  %v5631_v53 = vpack.c.bf16 %v653_v46, %v652_v45 }
  0x4b   : > { %5618 = vmatpush3.bf16.msra.mxu1 %v5617_v1  ;;  %1795 = vmatmul.mubr.f32.gmra.mrb[2].mxu0 %v424_v5  ;;  %v365_v49 = vld [vmem:[%s8573_s3 + $0x18] sm:$0xff]  ;;  %v636_v54 = vld [vmem:[%s6680_s21 + $0x150] sm:$0xff]  ;;  %v5727_v57 = vpack.c.bf16 %v749_v48, %v748_v47  ;;  %v654_v59 = vld [vmem:[%s6680_s21 + $0x1e0] sm:$0xff] }
  0x4c   : > { %5714 = vmatpush3.bf16.msra.mxu0 %v5713_v6  ;;  %5620 = vmatprep.subr.bf16.mxu1 %v5619_v7  ;;  %v637_v55 = vld [vmem:[%s6680_s21 + $0x158] sm:$0xff]  ;;  %v732_v56 = vld [vmem:[%s6680_s21 + $0x450] sm:$0xff]  ;;  %v655_v60 = vld [vmem:[%s6680_s21 + $0x1e8] sm:$0xff] }
  0x4d   : > { %5716 = vmatprep.subr.bf16.mxu0 %v5715_v11  ;;  %1629 = vmatprep.mubr.f32.mxu1 %v479_v17  ;;  %v733_v58 = vld [vmem:[%s6680_s21 + $0x458] sm:$0xff]  ;;  %v750_v61 = vld [vmem:[%s6680_s21 + $0x4e0] sm:$0xff]  ;;  %v751_v62 = vld [vmem:[%s6680_s21 + $0x4e8] sm:$0xff]  ;;  %v5633_v63 = vpack.c.bf16 %v637_v55, %v636_v54  ;;  %v5635_v1 = vpack.c.bf16 %v655_v60, %v654_v59 }
  0x4e   : > { %1630 = vmatmul.mubr.f32.gmra.mrb[4].mxu1 %v478_v19  ;;  %1799 = vmatprep.mubr.f32.mxu0 %v483_v20  ;;  %v5729_v0 = vpack.c.bf16 %v733_v58, %v732_v56  ;;  %v638_v3 = vld [vmem:[%s6680_s21 + $0x160] sm:$0xff]  ;;  %v639_v4 = vld [vmem:[%s6680_s21 + $0x168] sm:$0xff]  ;;  %v5731_v6 = vpack.c.bf16 %v751_v62, %v750_v61  ;;  %v656_v8 = vld [vmem:[%s6680_s21 + $0x1f0] sm:$0xff] }
  0x4f   : > { %5622 = vmatpush3.bf16.msra.mxu1 %v5621_v18  ;;  %1800 = vmatmul.mubr.f32.gmra.mrb[4].mxu0 %v482_v21  ;;  %v734_v5 = vld [vmem:[%s6680_s21 + $0x460] sm:$0xff]  ;;  %v735_v7 = vld [vmem:[%s6680_s21 + $0x468] sm:$0xff]  ;;  %v657_v9 = vld [vmem:[%s6680_s21 + $0x1f8] sm:$0xff]  ;;  %v5637_v12 = vpack.c.bf16 %v639_v4, %v638_v3 }
  0x50   : > { %5718 = vmatpush3.bf16.msra.mxu0 %v5717_v22  ;;  %5624 = vmatprep.subr.bf16.mxu1 %v5623_v23  ;;  %v752_v10 = vld [vmem:[%s6680_s21 + $0x4f0] sm:$0xff]  ;;  %v753_v11 = vld [vmem:[%s6680_s21 + $0x4f8] sm:$0xff]  ;;  %v5733_v13 = vpack.c.bf16 %v735_v7, %v734_v5  ;;  %v5639_v14 = vpack.c.bf16 %v657_v9, %v656_v8  ;;  %v706_v20 = vld [vmem:[%s6680_s21 + $0x380] sm:$0xff] }
  0x51   : > { %5720 = vmatprep.subr.bf16.mxu0 %v5719_v27  ;;  %1634 = vmatprep.mubr.f32.mxu1 %v537_v33  ;;  %v640_v15 = vld [vmem:[%s6680_s21 + $0x170] sm:$0xff]  ;;  %v641_v16 = vld [vmem:[%s6680_s21 + $0x178] sm:$0xff]  ;;  %v5735_v18 = vpack.c.bf16 %v753_v11, %v752_v10  ;;  %v707_v21 = vld [vmem:[%s6680_s21 + $0x388] sm:$0xff] }
  0x52   : > { %1635 = vmatmul.mubr.f32.gmra.mrb[6].mxu1 %v536_v35  ;;  %1804 = vmatprep.mubr.f32.mxu0 %v541_v36  ;;  %v736_v17 = vld [vmem:[%s6680_s21 + $0x470] sm:$0xff]  ;;  %v737_v19 = vld [vmem:[%s6680_s21 + $0x478] sm:$0xff]  ;;  %v802_v22 = vld [vmem:[%s6680_s21 + $0x680] sm:$0xff]  ;;  %v5641_v24 = vpack.c.bf16 %v641_v16, %v640_v15  ;;  %v5675_v26 = vpack.c.bf16 %v707_v21, %v706_v20 }
  0x53   : > { %5626 = vmatpush3.bf16.msra.mxu1 %v5625_v34  ;;  %1805 = vmatmul.mubr.f32.gmra.mrb[6].mxu0 %v540_v37  ;;  %v803_v23 = vld [vmem:[%s6680_s21 + $0x688] sm:$0xff]  ;;  %v5737_v25 = vpack.c.bf16 %v737_v19, %v736_v17  ;;  %v690_v27 = vld [vmem:[%s6680_s21 + $0x300] sm:$0xff]  ;;  %v708_v32 = vld [vmem:[%s6680_s21 + $0x390] sm:$0xff] }
  0x54   : > { %5722 = vmatpush3.bf16.msra.mxu0 %v5721_v38  ;;  %5628 = vmatprep.subr.bf16.mxu1 %v5627_v39  ;;  %v691_v28 = vld [vmem:[%s6680_s21 + $0x308] sm:$0xff]  ;;  %v5771_v29 = vpack.c.bf16 %v803_v23, %v802_v22  ;;  %v786_v30 = vld [vmem:[%s6680_s21 + $0x600] sm:$0xff]  ;;  %v709_v33 = vld [vmem:[%s6680_s21 + $0x398] sm:$0xff] }
  0x55   : > { %5724 = vmatprep.subr.bf16.mxu0 %v5723_v43  ;;  %1704 = vmatprep.mubr.f32.mxu1 %v365_v49  ;;  %v787_v31 = vld [vmem:[%s6680_s21 + $0x608] sm:$0xff]  ;;  %v804_v34 = vld [vmem:[%s6680_s21 + $0x690] sm:$0xff]  ;;  %v805_v35 = vld [vmem:[%s6680_s21 + $0x698] sm:$0xff]  ;;  %v5677_v37 = vpack.c.bf16 %v691_v28, %v690_v27  ;;  %v5679_v44 = vpack.c.bf16 %v709_v33, %v708_v32 }
  0x56   : > { %1959 = vmatprep.mubr.f32.mxu0 %v371_v51  ;;  %v364_v36 = vld [vmem:[%s8573_s3 + $0x10] sm:$0xff]  ;;  %v370_v38 = vld [vmem:[%s8573_s3 + $0x40] sm:$0xff]  ;;  %v423_v39 = vld [vmem:[%s8573_s3 + $0x1e8] sm:$0xff]  ;;  %v5773_v40 = vpack.c.bf16 %v787_v31, %v786_v30  ;;  %v5775_v45 = vpack.c.bf16 %v805_v35, %v804_v34 }
  0x57   : > { %5630 = vmatpush3.bf16.msra.mxu1 %v5629_v50  ;;  %v692_v41 = vld [vmem:[%s6680_s21 + $0x310] sm:$0xff]  ;;  %v693_v42 = vld [vmem:[%s6680_s21 + $0x318] sm:$0xff]  ;;  %v710_v47 = vld [vmem:[%s6680_s21 + $0x3a0] sm:$0xff] }
  0x58   : > { %5726 = vmatpush3.bf16.msra.mxu0 %v5725_v52  ;;  %5632 = vmatprep.subr.bf16.mxu1 %v5631_v53  ;;  %v788_v43 = vld [vmem:[%s6680_s21 + $0x610] sm:$0xff]  ;;  %v789_v46 = vld [vmem:[%s6680_s21 + $0x618] sm:$0xff]  ;;  %v711_v48 = vld [vmem:[%s6680_s21 + $0x3a8] sm:$0xff]  ;;  %v5681_v52 = vpack.c.bf16 %v693_v42, %v692_v41 }
  0x59   : > { %5728 = vmatprep.subr.bf16.mxu0 %v5727_v57  ;;  %v806_v49 = vld [vmem:[%s6680_s21 + $0x6a0] sm:$0xff]  ;;  %v807_v50 = vld [vmem:[%s6680_s21 + $0x6a8] sm:$0xff]  ;;  %v481_v53 = vld [vmem:[%s8573_s3 + $0x3b8] sm:$0xff]  ;;  %v5777_v55 = vpack.c.bf16 %v789_v46, %v788_v43  ;;  %v5683_v56 = vpack.c.bf16 %v711_v48, %v710_v47 }
  0x5a   : > { %v422_v51 = vld [vmem:[%s8573_s3 + $0x1e0] sm:$0xff]  ;;  %v429_v54 = vld [vmem:[%s8573_s3 + $0x218] sm:$0xff]  ;;  %v695_v58 = vld [vmem:[%s6680_s21 + $0x328] sm:$0xff]  ;;  %v5779_v60 = vpack.c.bf16 %v807_v50, %v806_v49 }
  0x5b   : > { %5634 = vmatpush3.bf16.msra.mxu1 %v5633_v63  ;;  %v694_v57 = vld [vmem:[%s6680_s21 + $0x320] sm:$0xff]  ;;  %v791_v61 = vld [vmem:[%s6680_s21 + $0x628] sm:$0xff]  ;;  %v712_v62 = vld [vmem:[%s6680_s21 + $0x3b0] sm:$0xff] }
  0x5c   : > { %5730 = vmatpush3.bf16.msra.mxu0 %v5729_v0  ;;  %5636 = vmatprep.subr.bf16.mxu1 %v5635_v1  ;;  %v790_v59 = vld [vmem:[%s6680_s21 + $0x620] sm:$0xff]  ;;  %v713_v63 = vld [vmem:[%s6680_s21 + $0x3b8] sm:$0xff]  ;;  %v808_v0 = vld [vmem:[%s6680_s21 + $0x6b0] sm:$0xff]  ;;  %v5685_v5 = vpack.c.bf16 %v695_v58, %v694_v57 }
  0x5d   : > { %5732 = vmatprep.subr.bf16.mxu0 %v5731_v6  ;;  %v809_v1 = vld [vmem:[%s6680_s21 + $0x6b8] sm:$0xff]  ;;  %v428_v3 = vld [vmem:[%s8573_s3 + $0x210] sm:$0xff]  ;;  %v539_v6 = vld [vmem:[%s8573_s3 + $0x588] sm:$0xff]  ;;  %v5781_v8 = vpack.c.bf16 %v791_v61, %v790_v59  ;;  %v5687_v9 = vpack.c.bf16 %v713_v63, %v712_v62 }
  0x5e   : > { %v480_v4 = vld [vmem:[%s8573_s3 + $0x3b0] sm:$0xff]  ;;  %v487_v7 = vld [vmem:[%s8573_s3 + $0x3e8] sm:$0xff]  ;;  %v697_v11 = vld [vmem:[%s6680_s21 + $0x338] sm:$0xff] }
  0x5f   : > { %5638 = vmatpush3.bf16.msra.mxu1 %v5637_v12  ;;  %v696_v10 = vld [vmem:[%s6680_s21 + $0x330] sm:$0xff]  ;;  %v714_v15 = vld [vmem:[%s6680_s21 + $0x3c0] sm:$0xff]  ;;  %v715_v16 = vld [vmem:[%s6680_s21 + $0x3c8] sm:$0xff] }
  0x60   : > { %5734 = vmatpush3.bf16.msra.mxu0 %v5733_v13  ;;  %5640 = vmatprep.subr.bf16.mxu1 %v5639_v14  ;;  %v792_v12 = vld [vmem:[%s6680_s21 + $0x630] sm:$0xff]  ;;  %v5783_v13 = vpack.c.bf16 %v809_v1, %v808_v0  ;;  %v793_v14 = vld [vmem:[%s6680_s21 + $0x638] sm:$0xff]  ;;  %v810_v17 = vld [vmem:[%s6680_s21 + $0x6c0] sm:$0xff]  ;;  %v5689_v21 = vpack.c.bf16 %v697_v11, %v696_v10 }
  0x61   : > { %5736 = vmatprep.subr.bf16.mxu0 %v5735_v18  ;;  %v811_v18 = vld [vmem:[%s6680_s21 + $0x6c8] sm:$0xff]  ;;  %v486_v19 = vld [vmem:[%s8573_s3 + $0x3e0] sm:$0xff]  ;;  %v545_v23 = vld [vmem:[%s8573_s3 + $0x5b8] sm:$0xff] }
  0x62   : > { %v538_v20 = vld [vmem:[%s8573_s3 + $0x580] sm:$0xff]  ;;  %v369_v28 = vld [vmem:[%s8573_s3 + $0x38] sm:$0xff]  ;;  %v795_v30 = vld [vmem:[%s6680_s21 + $0x648] sm:$0xff] }
  0x63   : > { %5642 = vmatpush3.bf16.msra.mxu1 %v5641_v24  ;;  %v698_v22 = vld [vmem:[%s6680_s21 + $0x340] sm:$0xff]  ;;  %v5785_v24 = vpack.c.bf16 %v793_v14, %v792_v12  ;;  %v716_v31 = vld [vmem:[%s6680_s21 + $0x3d0] sm:$0xff]  ;;  %v717_v32 = vld [vmem:[%s6680_s21 + $0x3d8] sm:$0xff] }
  0x64   : > { %5738 = vmatpush3.bf16.msra.mxu0 %v5737_v25  ;;  %5676 = vmatprep.subr.bf16.mxu1 %v5675_v26  ;;  %v5691_v25 = vpack.c.bf16 %v715_v16, %v714_v15  ;;  %v699_v26 = vld [vmem:[%s6680_s21 + $0x348] sm:$0xff]  ;;  %v794_v27 = vld [vmem:[%s6680_s21 + $0x640] sm:$0xff]  ;;  %v812_v33 = vld [vmem:[%s6680_s21 + $0x6d0] sm:$0xff] }
  0x65   : > { %5772 = vmatprep.subr.bf16.mxu0 %v5771_v29  ;;  %v5787_v29 = vpack.c.bf16 %v811_v18, %v810_v17  ;;  %v813_v34 = vld [vmem:[%s6680_s21 + $0x6d8] sm:$0xff]  ;;  %v544_v35 = vld [vmem:[%s8573_s3 + $0x5b0] sm:$0xff]  ;;  %v719_v46 = vld [vmem:[%s6680_s21 + $0x3e8] sm:$0xff] }
  0x66   : > { %1705 = vmatmul.mubr.f32.vlgmr.msra.gmra.mrb[8].mxu1 %v364_v36  ;;  %v5693_v36 = vpack.c.bf16 %v699_v26, %v698_v22  ;;  %v701_v41 = vld [vmem:[%s6680_s21 + $0x358] sm:$0xff]  ;;  %v796_v42 = vld [vmem:[%s6680_s21 + $0x650] sm:$0xff]  ;;  %v5791_v43 = vpack.c.bf16 %v813_v34, %v812_v33  ;;  %v814_v47 = vld [vmem:[%s6680_s21 + $0x6e0] sm:$0xff] }
  0x67   : > { %5678 = vmatpush3.bf16.msra.mxu1 %v5677_v37  ;;  %1960 = vmatmul.mubr.f32.vlgmr.msra.gmra.mrb[8].mxu0 %v370_v38  ;;  %v375_v37 = vld [vmem:[%s8573_s3 + $0x68] sm:$0xff]  ;;  %v5789_v38 = vpack.c.bf16 %v795_v30, %v794_v27  ;;  %v720_v57 = vld [vmem:[%s6680_s21 + $0x3f0] sm:$0xff]  ;;  %v721_v58 = vld [vmem:[%s6680_s21 + $0x3f8] sm:$0xff] }
  0x68   : > { %5774 = vmatpush3.bf16.msra.mxu0 %v5773_v40  ;;  %1709 = vmatprep.mubr.f32.mxu1 %v423_v39  ;;  %v5695_v39 = vpack.c.bf16 %v717_v32, %v716_v31  ;;  %v700_v40 = vld [vmem:[%s6680_s21 + $0x350] sm:$0xff]  ;;  %v815_v48 = vld [vmem:[%s6680_s21 + $0x6e8] sm:$0xff]  ;;  %v1518_v62 = vld [vmem:[%s8575_s5] sm:$0xff]  ;;  %v5703_v0 = vpack.c.bf16 %v721_v58, %v720_v57 }
  0x69   : > { %5680 = vmatprep.subr.bf16.mxu1 %v5679_v44  ;;  %5776 = vmatprep.subr.bf16.mxu0 %v5775_v45  ;;  %v797_v44 = vld [vmem:[%s6680_s21 + $0x658] sm:$0xff]  ;;  %v718_v45 = vld [vmem:[%s6680_s21 + $0x3e0] sm:$0xff]  ;;  %v5697_v49 = vpack.c.bf16 %v701_v41, %v700_v40  ;;  %v816_v59 = vld [vmem:[%s6680_s21 + $0x6f0] sm:$0xff] }
  0x6a   : > { %1710 = vmatmul.mubr.f32.gmra.mrb[10].mxu1 %v422_v51  ;;  %1964 = vmatprep.mubr.f32.mxu0 %v429_v54  ;;  %v5793_v50 = vpack.c.bf16 %v797_v44, %v796_v42  ;;  %v5699_v51 = vpack.c.bf16 %v719_v46, %v718_v45  ;;  %v798_v54 = vld [vmem:[%s6680_s21 + $0x660] sm:$0xff]  ;;  %v704_v1 = vld [vmem:[%s6680_s21 + $0x370] sm:$0xff]  ;;  %v867_v10 = vld [vmem:[%s6680_s21 + $0x888] sm:$0xff] }
  0x6b   : > { %5682 = vmatpush3.bf16.msra.mxu1 %v5681_v52  ;;  %1714 = vmatprep.mubr.f32.mxu1 %v481_v53  ;;  %v702_v52 = vld [vmem:[%s6680_s21 + $0x360] sm:$0xff]  ;;  %v703_v53 = vld [vmem:[%s6680_s21 + $0x368] sm:$0xff]  ;;  %v869_v22 = vld [vmem:[%s6680_s21 + $0x898] sm:$0xff] }
  0x6c   : > { %5778 = vmatpush3.bf16.msra.mxu0 %v5777_v55  ;;  %5684 = vmatprep.subr.bf16.mxu1 %v5683_v56  ;;  %v5795_v55 = vpack.c.bf16 %v815_v48, %v814_v47  ;;  %v799_v56 = vld [vmem:[%s6680_s21 + $0x668] sm:$0xff]  ;;  %v5701_v61 = vpack.c.bf16 %v703_v53, %v702_v52  ;;  %v754_v14 = vld [vmem:[%s6680_s21 + $0x500] sm:$0xff]  ;;  %v852_v30 = vld [vmem:[%s6680_s21 + $0x810] sm:$0xff] }
  0x6d   : > { %5780 = vmatprep.subr.bf16.mxu0 %v5779_v60  ;;  %1965 = vmatmul.mubr.f32.gmra.mrb[10].mxu0 %v428_v3  ;;  %v817_v60 = vld [vmem:[%s6680_s21 + $0x6f8] sm:$0xff]  ;;  %v5797_v63 = vpack.c.bf16 %v799_v56, %v798_v54  ;;  %v755_v15 = vld [vmem:[%s6680_s21 + $0x508] sm:$0xff]  ;;  %v850_v17 = vld [vmem:[%s6680_s21 + $0x800] sm:$0xff] }
  0x6e   : > { %1715 = vmatmul.mubr.f32.gmra.mrb[12].mxu1 %v480_v4  ;;  %1969 = vmatprep.mubr.f32.mxu0 %v487_v7  ;;  %v705_v3 = vld [vmem:[%s6680_s21 + $0x378] sm:$0xff]  ;;  %v800_v4 = vld [vmem:[%s6680_s21 + $0x670] sm:$0xff]  ;;  %v770_v7 = vld [vmem:[%s6680_s21 + $0x580] sm:$0xff] }
  0x6f   : > { %5686 = vmatpush3.bf16.msra.mxu1 %v5685_v5  ;;  %1719 = vmatprep.mubr.f32.mxu1 %v539_v6  ;;  %v5799_v5 = vpack.c.bf16 %v817_v60, %v816_v59  ;;  %v801_v6 = vld [vmem:[%s6680_s21 + $0x678] sm:$0xff]  ;;  %v5705_v11 = vpack.c.bf16 %v705_v3, %v704_v1  ;;  %v851_v18 = vld [vmem:[%s6680_s21 + $0x808] sm:$0xff]  ;;  %v774_v34 = vld [vmem:[%s6680_s21 + $0x5a0] sm:$0xff] }
  0x70   : > { %5782 = vmatpush3.bf16.msra.mxu0 %v5781_v8  ;;  %5688 = vmatprep.subr.bf16.mxu1 %v5687_v9  ;;  %v771_v8 = vld [vmem:[%s6680_s21 + $0x588] sm:$0xff]  ;;  %v866_v9 = vld [vmem:[%s6680_s21 + $0x880] sm:$0xff]  ;;  %v5801_v12 = vpack.c.bf16 %v801_v6, %v800_v4  ;;  %v5837_v27 = vpack.c.bf16 %v851_v18, %v850_v17  ;;  %v853_v33 = vld [vmem:[%s6680_s21 + $0x818] sm:$0xff] }
  0x71   : > { %5784 = vmatprep.subr.bf16.mxu0 %v5783_v13  ;;  %1970 = vmatmul.mubr.f32.gmra.mrb[12].mxu0 %v486_v19  ;;  %v5739_v13 = vpack.c.bf16 %v771_v8, %v770_v7  ;;  %v5835_v16 = vpack.c.bf16 %v867_v10, %v866_v9  ;;  %v772_v19 = vld [vmem:[%s6680_s21 + $0x590] sm:$0xff]  ;;  %v427_v26 = vld [vmem:[%s8573_s3 + $0x208] sm:$0xff]  ;;  %v485_v40 = vld [vmem:[%s8573_s3 + $0x3d8] sm:$0xff]  ;;  %v5841_v42 = vpack.c.bf16 %v853_v33, %v852_v30 }
  0x72   : > { %1720 = vmatmul.mubr.f32.gmra.mrb[14].mxu1 %v538_v20  ;;  %1974 = vmatprep.mubr.f32.mxu0 %v545_v23  ;;  %v773_v20 = vld [vmem:[%s6680_s21 + $0x598] sm:$0xff]  ;;  %v368_v23 = vld [vmem:[%s8573_s3 + $0x30] sm:$0xff]  ;;  %v758_v44 = vld [vmem:[%s6680_s21 + $0x520] sm:$0xff] }
  0x73   : > { %5690 = vmatpush3.bf16.msra.mxu1 %v5689_v21  ;;  %1874 = vmatprep.mubr.f32.mxu1 %v369_v28  ;;  %v868_v21 = vld [vmem:[%s6680_s21 + $0x890] sm:$0xff]  ;;  %v5743_v31 = vpack.c.bf16 %v773_v20, %v772_v19  ;;  %v433_v41 = vld [vmem:[%s8573_s3 + $0x238] sm:$0xff]  ;;  %v759_v45 = vld [vmem:[%s6680_s21 + $0x528] sm:$0xff] }
  0x74   : > { %5786 = vmatpush3.bf16.msra.mxu0 %v5785_v24  ;;  %5692 = vmatprep.subr.bf16.mxu1 %v5691_v25  ;;  %v5741_v24 = vpack.c.bf16 %v755_v15, %v754_v14  ;;  %v374_v25 = vld [vmem:[%s8573_s3 + $0x60] sm:$0xff]  ;;  %v756_v28 = vld [vmem:[%s6680_s21 + $0x510] sm:$0xff]  ;;  %v5839_v32 = vpack.c.bf16 %v869_v22, %v868_v21  ;;  %v855_v48 = vld [vmem:[%s6680_s21 + $0x828] sm:$0xff] }
  0x75   : > { %5788 = vmatprep.subr.bf16.mxu0 %v5787_v29  ;;  %1975 = vmatmul.mubr.f32.gmra.mrb[14].mxu0 %v544_v35  ;;  %v757_v29 = vld [vmem:[%s6680_s21 + $0x518] sm:$0xff]  ;;  %v775_v35 = vld [vmem:[%s6680_s21 + $0x5a8] sm:$0xff]  ;;  %v854_v46 = vld [vmem:[%s6680_s21 + $0x820] sm:$0xff] }
  0x76   : > { %2129 = vmatprep.mubr.f32.mxu0 %v375_v37  ;;  %1524 = vperm.xlu0 %6553, %v1518_v62   ;;  %v871_v37 = vld [vmem:[%s6680_s21 + $0x8a8] sm:$0xff]  ;;  %v873_v52 = vld [vmem:[%s6680_s21 + $0x8b8] sm:$0xff]  ;;  %v432_v53 = vld [vmem:[%s8573_s3 + $0x230] sm:$0xff]  ;;  %v5845_v58 = vpack.c.bf16 %v855_v48, %v854_v46 }
  0x77   : > { %5694 = vmatpush3.bf16.msra.mxu1 %v5693_v36  ;;  %v870_v36 = vld [vmem:[%s6680_s21 + $0x8a0] sm:$0xff]  ;;  %v484_v54 = vld [vmem:[%s8573_s3 + $0x3d0] sm:$0xff]  ;;  %v543_v56 = vld [vmem:[%s8573_s3 + $0x5a8] sm:$0xff] }
  0x78   : > { %5790 = vmatpush3.bf16.msra.mxu0 %v5789_v38  ;;  %5696 = vmatprep.subr.bf16.mxu1 %v5695_v39  ;;  %v426_v38 = vld [vmem:[%s8573_s3 + $0x200] sm:$0xff]  ;;  %v5745_v39 = vpack.c.bf16 %v757_v29, %v756_v28  ;;  %v5843_v47 = vpack.c.bf16 %v871_v37, %v870_v36  ;;  %v491_v57 = vld [vmem:[%s8573_s3 + $0x408] sm:$0xff]  ;;  %v760_v60 = vld [vmem:[%s6680_s21 + $0x530] sm:$0xff] }
  0x79   : > { %5792 = vmatprep.subr.bf16.mxu0 %v5791_v43  ;;  %v5747_v43 = vpack.c.bf16 %v775_v35, %v774_v34  ;;  %v856_v62 = vld [vmem:[%s6680_s21 + $0x830] sm:$0xff]  ;;  %v778_v1 = vld [vmem:[%s6680_s21 + $0x5c0] sm:$0xff]  ;;  %v779_v3 = vld [vmem:[%s6680_s21 + $0x5c8] sm:$0xff] }
  0x7a   : > { %v874_v4 = vld [vmem:[%s6680_s21 + $0x8c0] sm:$0xff]  ;;  %v549_v10 = vld [vmem:[%s8573_s3 + $0x5d8] sm:$0xff]  ;;  %v859_v17 = vld [vmem:[%s6680_s21 + $0x848] sm:$0xff] }
  0x7b   : > { %5698 = vmatpush3.bf16.msra.mxu1 %v5697_v49  ;;  %v776_v49 = vld [vmem:[%s6680_s21 + $0x5b0] sm:$0xff]  ;;  %v490_v6 = vld [vmem:[%s8573_s3 + $0x400] sm:$0xff]  ;;  %v373_v15 = vld [vmem:[%s8573_s3 + $0x58] sm:$0xff] }
  0x7c   : > { %5794 = vmatpush3.bf16.msra.mxu0 %v5793_v50  ;;  %5700 = vmatprep.subr.bf16.mxu1 %v5699_v51  ;;  %v777_v50 = vld [vmem:[%s6680_s21 + $0x5b8] sm:$0xff]  ;;  %v872_v51 = vld [vmem:[%s6680_s21 + $0x8b0] sm:$0xff]  ;;  %v542_v7 = vld [vmem:[%s8573_s3 + $0x5a0] sm:$0xff] }
  0x7d   : > { %5796 = vmatprep.subr.bf16.mxu0 %v5795_v55  ;;  %v5749_v55 = vpack.c.bf16 %v759_v45, %v758_v44  ;;  %v5751_v59 = vpack.c.bf16 %v777_v50, %v776_v49  ;;  %v762_v9 = vld [vmem:[%s6680_s21 + $0x540] sm:$0xff]  ;;  %v780_v18 = vld [vmem:[%s6680_s21 + $0x5d0] sm:$0xff]  ;;  %v781_v19 = vld [vmem:[%s6680_s21 + $0x5d8] sm:$0xff] }
  0x7e   : > { %v858_v14 = vld [vmem:[%s6680_s21 + $0x840] sm:$0xff]  ;;  %v876_v20 = vld [vmem:[%s6680_s21 + $0x8d0] sm:$0xff]  ;;  %v877_v21 = vld [vmem:[%s6680_s21 + $0x8d8] sm:$0xff]  ;;  %v5759_v28 = vpack.c.bf16 %v781_v19, %v780_v18 }
  0x7f   : > { %5702 = vmatpush3.bf16.msra.mxu1 %v5701_v61  ;;  %v761_v61 = vld [vmem:[%s6680_s21 + $0x538] sm:$0xff]  ;;  %v548_v22 = vld [vmem:[%s8573_s3 + $0x5d0] sm:$0xff]  ;;  %v782_v34 = vld [vmem:[%s6680_s21 + $0x5e0] sm:$0xff] }
  0x80   : > { %5798 = vmatpush3.bf16.msra.mxu0 %v5797_v63  ;;  %5704 = vmatprep.subr.bf16.mxu1 %v5703_v0  ;;  %v5847_v63 = vpack.c.bf16 %v873_v52, %v872_v51  ;;  %v857_v0 = vld [vmem:[%s6680_s21 + $0x838] sm:$0xff]  ;;  %v5753_v8 = vpack.c.bf16 %v761_v61, %v760_v60  ;;  %v860_v30 = vld [vmem:[%s6680_s21 + $0x850] sm:$0xff]  ;;  %v783_v35 = vld [vmem:[%s6680_s21 + $0x5e8] sm:$0xff] }
  0x81   : > { %5800 = vmatprep.subr.bf16.mxu0 %v5799_v5  ;;  %v875_v5 = vld [vmem:[%s6680_s21 + $0x8c8] sm:$0xff]  ;;  %v765_v29 = vld [vmem:[%s6680_s21 + $0x558] sm:$0xff]  ;;  %v878_v36 = vld [vmem:[%s6680_s21 + $0x8e0] sm:$0xff] }
  0x82   : > { %v861_v33 = vld [vmem:[%s6680_s21 + $0x858] sm:$0xff]  ;;  %v879_v37 = vld [vmem:[%s6680_s21 + $0x8e8] sm:$0xff]  ;;  %v880_v49 = vld [vmem:[%s6680_s21 + $0x8f0] sm:$0xff] }
  0x83   : > { %5706 = vmatpush3.bf16.msra.mxu1 %v5705_v11  ;;  %v5849_v11 = vpack.c.bf16 %v857_v0, %v856_v62  ;;  %v1521_v44 = vld [vmem:[%s8575_s5 + $0x18] sm:$0xff]  ;;  %v5859_v45 = vpack.c.bf16 %v879_v37, %v878_v36  ;;  %v863_v46 = vld [vmem:[%s6680_s21 + $0x868] sm:$0xff]  ;;  %v930_v61 = vld [vmem:[%s6680_s21 + $0xa80] sm:$0xff] }
  0x84   : > { %5802 = vmatpush3.bf16.msra.mxu0 %v5801_v12  ;;  %5740 = vmatprep.subr.bf16.mxu1 %v5739_v13  ;;  %v5755_v12 = vpack.c.bf16 %v779_v3, %v778_v1  ;;  %v763_v13 = vld [vmem:[%s6680_s21 + $0x548] sm:$0xff]  ;;  %v785_v48 = vld [vmem:[%s6680_s21 + $0x5f8] sm:$0xff]  ;;  %v818_v3 = vld [vmem:[%s6680_s21 + $0x700] sm:$0xff] }
  0x85   : > { %5836 = vmatprep.subr.bf16.mxu0 %v5835_v16  ;;  %v5851_v16 = vpack.c.bf16 %v875_v5, %v874_v4  ;;  %v881_v50 = vld [vmem:[%s6680_s21 + $0x8f8] sm:$0xff]  ;;  %v835_v60 = vld [vmem:[%s6680_s21 + $0x788] sm:$0xff]  ;;  %v916_v19 = vld [vmem:[%s6680_s21 + $0xa10] sm:$0xff] }
  0x86   : > { %1875 = vmatmul.mubr.f32.vlgmr.msra.gmra.mrb[16].mxu1 %v368_v23  ;;  %v5757_v23 = vpack.c.bf16 %v763_v13, %v762_v9  ;;  %v931_v62 = vld [vmem:[%s6680_s21 + $0xa88] sm:$0xff]  ;;  %v837_v9 = vld [vmem:[%s6680_s21 + $0x798] sm:$0xff] }
  0x87   : > { %5742 = vmatpush3.bf16.msra.mxu1 %v5741_v24  ;;  %2130 = vmatmul.mubr.f32.vlgmr.msra.gmra.mrb[16].mxu0 %v374_v25  ;;  %v764_v24 = vld [vmem:[%s6680_s21 + $0x550] sm:$0xff]  ;;  %v379_v25 = vld [vmem:[%s8573_s3 + $0x88] sm:$0xff]  ;;  %v5899_v5 = vpack.c.bf16 %v931_v62, %v930_v61  ;;  %v821_v18 = vld [vmem:[%s6680_s21 + $0x718] sm:$0xff] }
  0x88   : > { %5838 = vmatpush3.bf16.msra.mxu0 %v5837_v27  ;;  %1879 = vmatprep.mubr.f32.mxu1 %v427_v26  ;;  %v1519_v26 = vld [vmem:[%s8575_s5 + $0x8] sm:$0xff]  ;;  %v5853_v27 = vpack.c.bf16 %v859_v17, %v858_v14  ;;  %v378_v14 = vld [vmem:[%s8573_s3 + $0x80] sm:$0xff]  ;;  %v820_v17 = vld [vmem:[%s6680_s21 + $0x710] sm:$0xff] }
  0x89   : > { %5744 = vmatprep.subr.bf16.mxu1 %v5743_v31  ;;  %5840 = vmatprep.subr.bf16.mxu0 %v5839_v32  ;;  %v1520_v31 = vld [vmem:[%s8575_s5 + $0x10] sm:$0xff]  ;;  %v5855_v32 = vpack.c.bf16 %v877_v21, %v876_v20  ;;  %v819_v4 = vld [vmem:[%s6680_s21 + $0x708] sm:$0xff]  ;;  %v826_v61 = vld [vmem:[%s6680_s21 + $0x740] sm:$0xff] }
  0x8a   : > { %1880 = vmatmul.mubr.f32.gmra.mrb[18].mxu1 %v426_v38  ;;  %2134 = vmatprep.mubr.f32.mxu0 %v433_v41  ;;  %v5761_v38 = vpack.c.bf16 %v765_v29, %v764_v24  ;;  %v5763_v41 = vpack.c.bf16 %v783_v35, %v782_v34  ;;  %v5805_v13 = vpack.c.bf16 %v819_v4, %v818_v3  ;;  %v839_v24 = vld [vmem:[%s6680_s21 + $0x7a8] sm:$0xff]  ;;  %v489_v29 = vld [vmem:[%s8573_s3 + $0x3f8] sm:$0xff]  ;;  %v918_v35 = vld [vmem:[%s6680_s21 + $0xa20] sm:$0xff] }
  0x8b   : > { %5746 = vmatpush3.bf16.msra.mxu1 %v5745_v39  ;;  %1884 = vmatprep.mubr.f32.mxu1 %v485_v40  ;;  %v766_v39 = vld [vmem:[%s6680_s21 + $0x560] sm:$0xff]  ;;  %v5857_v40 = vpack.c.bf16 %v861_v33, %v860_v30  ;;  %v437_v30 = vld [vmem:[%s8573_s3 + $0x258] sm:$0xff]  ;;  %v823_v34 = vld [vmem:[%s6680_s21 + $0x728] sm:$0xff] }
  0x8c   : > { %5842 = vmatpush3.bf16.msra.mxu0 %v5841_v42  ;;  %5748 = vmatprep.subr.bf16.mxu1 %v5747_v43  ;;  %v767_v42 = vld [vmem:[%s6680_s21 + $0x568] sm:$0xff]  ;;  %v862_v43 = vld [vmem:[%s6680_s21 + $0x860] sm:$0xff]  ;;  %v553_v62 = vld [vmem:[%s8573_s3 + $0x5f8] sm:$0xff] }
  0x8d   : > { %5844 = vmatprep.subr.bf16.mxu0 %v5843_v47  ;;  %2135 = vmatmul.mubr.f32.gmra.mrb[18].mxu0 %v432_v53  ;;  %v784_v47 = vld [vmem:[%s6680_s21 + $0x5f0] sm:$0xff]  ;;  %v5765_v51 = vpack.c.bf16 %v767_v42, %v766_v39  ;;  %v5861_v52 = vpack.c.bf16 %v863_v46, %v862_v43  ;;  %v822_v33 = vld [vmem:[%s6680_s21 + $0x720] sm:$0xff]  ;;  %v919_v37 = vld [vmem:[%s6680_s21 + $0xa28] sm:$0xff] }
  0x8e   : > { %1885 = vmatmul.mubr.f32.gmra.mrb[20].mxu1 %v484_v54  ;;  %2139 = vmatprep.mubr.f32.mxu0 %v491_v57  ;;  %v5767_v53 = vpack.c.bf16 %v785_v48, %v784_v47  ;;  %v768_v54 = vld [vmem:[%s6680_s21 + $0x570] sm:$0xff]  ;;  %v5863_v57 = vpack.c.bf16 %v881_v50, %v880_v49  ;;  %v841_v39 = vld [vmem:[%s6680_s21 + $0x7b8] sm:$0xff]  ;;  %v495_v46 = vld [vmem:[%s8573_s3 + $0x428] sm:$0xff]  ;;  %v5909_v47 = vpack.c.bf16 %v919_v37, %v918_v35 }
  0x8f   : > { %5750 = vmatpush3.bf16.msra.mxu1 %v5749_v55  ;;  %1889 = vmatprep.mubr.f32.mxu1 %v543_v56  ;;  %v769_v55 = vld [vmem:[%s6680_s21 + $0x578] sm:$0xff]  ;;  %v864_v56 = vld [vmem:[%s6680_s21 + $0x870] sm:$0xff]  ;;  %v922_v3 = vld [vmem:[%s6680_s21 + $0xa40] sm:$0xff] }
  0x90   : > { %5846 = vmatpush3.bf16.msra.mxu0 %v5845_v58  ;;  %5752 = vmatprep.subr.bf16.mxu1 %v5751_v59  ;;  %v865_v58 = vld [vmem:[%s6680_s21 + $0x878] sm:$0xff]  ;;  %v834_v59 = vld [vmem:[%s6680_s21 + $0x780] sm:$0xff]  ;;  %v436_v42 = vld [vmem:[%s8573_s3 + $0x250] sm:$0xff] }
  0x91   : > { %5848 = vmatprep.subr.bf16.mxu0 %v5847_v63  ;;  %2140 = vmatmul.mubr.f32.gmra.mrb[20].mxu0 %v490_v6  ;;  %v5769_v63 = vpack.c.bf16 %v769_v55, %v768_v54  ;;  %v5865_v0 = vpack.c.bf16 %v865_v58, %v864_v56  ;;  %v5803_v1 = vpack.c.bf16 %v835_v60, %v834_v59  ;;  %v914_v6 = vld [vmem:[%s6680_s21 + $0xa00] sm:$0xff]  ;;  %v488_v43 = vld [vmem:[%s8573_s3 + $0x3f0] sm:$0xff]  ;;  %v825_v50 = vld [vmem:[%s6680_s21 + $0x738] sm:$0xff] }
  0x92   : > { %1890 = vmatmul.mubr.f32.gmra.mrb[22].mxu1 %v542_v7  ;;  %2144 = vmatprep.mubr.f32.mxu0 %v549_v10  ;;  %v915_v7 = vld [vmem:[%s6680_s21 + $0xa08] sm:$0xff]  ;;  %v932_v10 = vld [vmem:[%s6680_s21 + $0xa90] sm:$0xff]  ;;  %v842_v54 = vld [vmem:[%s6680_s21 + $0x7c0] sm:$0xff] }
  0x93   : > { %5754 = vmatpush3.bf16.msra.mxu1 %v5753_v8  ;;  %2044 = vmatprep.mubr.f32.mxu1 %v373_v15  ;;  %v836_v8 = vld [vmem:[%s6680_s21 + $0x790] sm:$0xff]  ;;  %v431_v15 = vld [vmem:[%s8573_s3 + $0x228] sm:$0xff]  ;;  %v938_v56 = vld [vmem:[%s6680_s21 + $0xac0] sm:$0xff] }
  0x94   : > { %5850 = vmatpush3.bf16.msra.mxu0 %v5849_v11  ;;  %5756 = vmatprep.subr.bf16.mxu1 %v5755_v12  ;;  %v933_v11 = vld [vmem:[%s6680_s21 + $0xa98] sm:$0xff]  ;;  %v372_v12 = vld [vmem:[%s8573_s3 + $0x50] sm:$0xff]  ;;  %v5807_v20 = vpack.c.bf16 %v837_v9, %v836_v8  ;;  %v843_v55 = vld [vmem:[%s6680_s21 + $0x7c8] sm:$0xff] }
  0x95   : > { %5852 = vmatprep.subr.bf16.mxu0 %v5851_v16  ;;  %2145 = vmatmul.mubr.f32.gmra.mrb[22].mxu0 %v548_v22  ;;  %v5901_v16 = vpack.c.bf16 %v915_v7, %v914_v6  ;;  %v5903_v21 = vpack.c.bf16 %v933_v11, %v932_v10  ;;  %v917_v22 = vld [vmem:[%s6680_s21 + $0xa18] sm:$0xff]  ;;  %v824_v49 = vld [vmem:[%s6680_s21 + $0x730] sm:$0xff]  ;;  %v494_v58 = vld [vmem:[%s8573_s3 + $0x420] sm:$0xff] }
  0x96   : > { %2299 = vmatprep.mubr.f32.mxu0 %v379_v25  ;;  %1529 = vperm.xlu0 %6553, %v1519_v26   ;;  %v934_v25 = vld [vmem:[%s6680_s21 + $0xaa0] sm:$0xff]  ;;  %v935_v26 = vld [vmem:[%s6680_s21 + $0xaa8] sm:$0xff]  ;;  %v5817_v60 = vpack.c.bf16 %v825_v50, %v824_v49  ;;  %v377_v4 = vld [vmem:[%s8573_s3 + $0x78] sm:$0xff] }
  0x97   : > { %5758 = vmatpush3.bf16.msra.mxu1 %v5757_v23  ;;  %1534 = vperm.xlu1 %6554, %v1520_v31   ;;  %v838_v23 = vld [vmem:[%s6680_s21 + $0x7a0] sm:$0xff]  ;;  %v5905_v31 = vpack.c.bf16 %v917_v22, %v916_v19  ;;  %v5907_v36 = vpack.c.bf16 %v935_v26, %v934_v25  ;;  %v923_v6 = vld [vmem:[%s6680_s21 + $0xa48] sm:$0xff]  ;;  %v844_v7 = vld [vmem:[%s6680_s21 + $0x7d0] sm:$0xff] }
  0x98   : > { %5854 = vmatpush3.bf16.msra.mxu0 %v5853_v27  ;;  %5760 = vmatprep.subr.bf16.mxu1 %v5759_v28  ;;  %v430_v27 = vld [vmem:[%s8573_s3 + $0x220] sm:$0xff]  ;;  %v5809_v28 = vpack.c.bf16 %v821_v18, %v820_v17  ;;  %v845_v8 = vld [vmem:[%s6680_s21 + $0x7d8] sm:$0xff]  ;;  %v940_v9 = vld [vmem:[%s6680_s21 + $0xad0] sm:$0xff] }
  0x99   : > { %5856 = vmatprep.subr.bf16.mxu0 %v5855_v32  ;;  %v5811_v32 = vpack.c.bf16 %v839_v24, %v838_v23  ;;  %v546_v59 = vld [vmem:[%s8573_s3 + $0x5c0] sm:$0xff]  ;;  %v941_v10 = vld [vmem:[%s6680_s21 + $0xad8] sm:$0xff]  ;;  %v552_v11 = vld [vmem:[%s8573_s3 + $0x5f0] sm:$0xff] }
  0x9a   : > { %v829_v17 = vld [vmem:[%s6680_s21 + $0x758] sm:$0xff]  ;;  %v924_v18 = vld [vmem:[%s6680_s21 + $0xa50] sm:$0xff]  ;;  %v5919_v19 = vpack.c.bf16 %v941_v10, %v940_v9  ;;  %v847_v22 = vld [vmem:[%s6680_s21 + $0x7e8] sm:$0xff] }
  0x9b   : > { %5762 = vmatpush3.bf16.msra.mxu1 %v5761_v38  ;;  %1539 = vperm.xlu1 %6554, %v1521_v44   ;;  %v840_v38 = vld [vmem:[%s6680_s21 + $0x7b0] sm:$0xff]  ;;  %v5813_v44 = vpack.c.bf16 %v823_v34, %v822_v33  ;;  %v942_v23 = vld [vmem:[%s6680_s21 + $0xae0] sm:$0xff]  ;;  %v943_v24 = vld [vmem:[%s6680_s21 + $0xae8] sm:$0xff] }
  0x9c   : > { %5858 = vmatpush3.bf16.msra.mxu0 %v5857_v40  ;;  %5764 = vmatprep.subr.bf16.mxu1 %v5763_v41  ;;  %v936_v40 = vld [vmem:[%s6680_s21 + $0xab0] sm:$0xff]  ;;  %v937_v41 = vld [vmem:[%s6680_s21 + $0xab8] sm:$0xff]  ;;  %v5815_v48 = vpack.c.bf16 %v841_v39, %v840_v38  ;;  %v902_v9 = vld [vmem:[%s6680_s21 + $0x9a0] sm:$0xff] }
  0x9d   : > { %5860 = vmatprep.subr.bf16.mxu0 %v5859_v45  ;;  %v547_v45 = vld [vmem:[%s8573_s3 + $0x5c8] sm:$0xff]  ;;  %v848_v33 = vld [vmem:[%s6680_s21 + $0x7f0] sm:$0xff]  ;;  %v849_v34 = vld [vmem:[%s6680_s21 + $0x7f8] sm:$0xff] }
  0x9e   : > { %v944_v35 = vld [vmem:[%s6680_s21 + $0xaf0] sm:$0xff]  ;;  %v5831_v39 = vpack.c.bf16 %v849_v34, %v848_v33  ;;  %v903_v10 = vld [vmem:[%s6680_s21 + $0x9a8] sm:$0xff] }
  0x9f   : > { %5766 = vmatpush3.bf16.msra.mxu1 %v5765_v51  ;;  %v920_v51 = vld [vmem:[%s6680_s21 + $0xa30] sm:$0xff] }
  0xa0   : > { %5862 = vmatpush3.bf16.msra.mxu0 %v5861_v52  ;;  %5768 = vmatprep.subr.bf16.mxu1 %v5767_v53  ;;  %v5911_v52 = vpack.c.bf16 %v937_v41, %v936_v40  ;;  %v921_v53 = vld [vmem:[%s6680_s21 + $0xa38] sm:$0xff]  ;;  %v832_v40 = vld [vmem:[%s6680_s21 + $0x770] sm:$0xff] }
  0xa1   : > { %5864 = vmatprep.subr.bf16.mxu0 %v5863_v57  ;;  %v939_v57 = vld [vmem:[%s6680_s21 + $0xac8] sm:$0xff]  ;;  %v833_v41 = vld [vmem:[%s6680_s21 + $0x778] sm:$0xff] }
  0xa2   : > { %v5833_v49 = vpack.c.bf16 %v833_v41, %v832_v40  ;;  %v906_v40 = vld [vmem:[%s6680_s21 + $0x9c0] sm:$0xff]  ;;  %v907_v41 = vld [vmem:[%s6680_s21 + $0x9c8] sm:$0xff] }
  0xa3   : > { %5770 = vmatpush3.bf16.msra.mxu1 %v5769_v63  ;;  %v5913_v63 = vpack.c.bf16 %v921_v53, %v920_v51  ;;  %v883_v53 = vld [vmem:[%s6680_s21 + $0x908] sm:$0xff] }
  0xa4   : > { %5866 = vmatpush3.bf16.msra.mxu0 %v5865_v0  ;;  %5804 = vmatprep.subr.bf16.mxu1 %v5803_v1  ;;  %v5819_v0 = vpack.c.bf16 %v843_v55, %v842_v54  ;;  %v827_v1 = vld [vmem:[%s6680_s21 + $0x748] sm:$0xff]  ;;  %v978_v55 = vld [vmem:[%s6680_s21 + $0xc00] sm:$0xff] }
  0xa5   : > { %5900 = vmatprep.subr.bf16.mxu0 %v5899_v5  ;;  %v5915_v5 = vpack.c.bf16 %v939_v57, %v938_v56  ;;  %v979_v56 = vld [vmem:[%s6680_s21 + $0xc08] sm:$0xff]  ;;  %v900_v57 = vld [vmem:[%s6680_s21 + $0x990] sm:$0xff] }
  0xa6   : > { %2045 = vmatmul.mubr.f32.vlgmr.msra.gmra.mrb[24].mxu1 %v372_v12  ;;  %v5821_v12 = vpack.c.bf16 %v827_v1, %v826_v61  ;;  %v376_v61 = vld [vmem:[%s8573_s3 + $0x70] sm:$0xff]  ;;  %v5965_v1 = vpack.c.bf16 %v979_v56, %v978_v55  ;;  %v987_v55 = vld [vmem:[%s6680_s21 + $0xc48] sm:$0xff] }
  0xa7   : > { %5806 = vmatpush3.bf16.msra.mxu1 %v5805_v13  ;;  %2300 = vmatmul.mubr.f32.vlgmr.msra.gmra.mrb[24].mxu0 %v378_v14  ;;  %v383_v13 = vld [vmem:[%s8573_s3 + $0xa8] sm:$0xff]  ;;  %v5917_v14 = vpack.c.bf16 %v923_v6, %v922_v3  ;;  %v884_v3 = vld [vmem:[%s6680_s21 + $0x910] sm:$0xff] }
  0xa8   : > { %5902 = vmatpush3.bf16.msra.mxu0 %v5901_v16  ;;  %2049 = vmatprep.mubr.f32.mxu1 %v431_v15  ;;  %v5823_v15 = vpack.c.bf16 %v845_v8, %v844_v7  ;;  %v828_v16 = vld [vmem:[%s6680_s21 + $0x750] sm:$0xff]  ;;  %v981_v8 = vld [vmem:[%s6680_s21 + $0xc18] sm:$0xff] }
  0xa9   : > { %5808 = vmatprep.subr.bf16.mxu1 %v5807_v20  ;;  %5904 = vmatprep.subr.bf16.mxu0 %v5903_v21  ;;  %v925_v20 = vld [vmem:[%s6680_s21 + $0xa58] sm:$0xff]  ;;  %v846_v21 = vld [vmem:[%s6680_s21 + $0x7e0] sm:$0xff]  ;;  %v5825_v25 = vpack.c.bf16 %v829_v17, %v828_v16  ;;  %v908_v56 = vld [vmem:[%s6680_s21 + $0x9d0] sm:$0xff] }
  0xaa   : > { %2050 = vmatmul.mubr.f32.gmra.mrb[26].mxu1 %v430_v27  ;;  %2304 = vmatprep.mubr.f32.mxu0 %v437_v30  ;;  %v5921_v26 = vpack.c.bf16 %v925_v20, %v924_v18  ;;  %v5827_v27 = vpack.c.bf16 %v847_v22, %v846_v21  ;;  %v926_v30 = vld [vmem:[%s6680_s21 + $0xa60] sm:$0xff]  ;;  %v441_v16 = vld [vmem:[%s8573_s3 + $0x278] sm:$0xff]  ;;  %v5875_v18 = vpack.c.bf16 %v903_v10, %v902_v9  ;;  %v887_v20 = vld [vmem:[%s6680_s21 + $0x928] sm:$0xff] }
  0xab   : > { %5810 = vmatpush3.bf16.msra.mxu1 %v5809_v28  ;;  %2054 = vmatprep.mubr.f32.mxu1 %v489_v29  ;;  %v830_v28 = vld [vmem:[%s6680_s21 + $0x760] sm:$0xff]  ;;  %v831_v29 = vld [vmem:[%s6680_s21 + $0x768] sm:$0xff] }
  0xac   : > { %5906 = vmatpush3.bf16.msra.mxu0 %v5905_v31  ;;  %5812 = vmatprep.subr.bf16.mxu1 %v5811_v32  ;;  %v5923_v31 = vpack.c.bf16 %v943_v24, %v942_v23  ;;  %v927_v32 = vld [vmem:[%s6680_s21 + $0xa68] sm:$0xff]  ;;  %v5829_v37 = vpack.c.bf16 %v831_v29, %v830_v28  ;;  %v982_v21 = vld [vmem:[%s6680_s21 + $0xc20] sm:$0xff]  ;;  %v904_v24 = vld [vmem:[%s6680_s21 + $0x9b0] sm:$0xff] }
  0xad   : > { %5908 = vmatprep.subr.bf16.mxu0 %v5907_v36  ;;  %2305 = vmatmul.mubr.f32.gmra.mrb[26].mxu0 %v436_v42  ;;  %v945_v36 = vld [vmem:[%s6680_s21 + $0xaf8] sm:$0xff]  ;;  %v5925_v38 = vpack.c.bf16 %v927_v32, %v926_v30  ;;  %v928_v42 = vld [vmem:[%s6680_s21 + $0xa70] sm:$0xff]  ;;  %v983_v23 = vld [vmem:[%s6680_s21 + $0xc28] sm:$0xff] }
  0xae   : > { %2055 = vmatmul.mubr.f32.gmra.mrb[28].mxu1 %v488_v43  ;;  %2309 = vmatprep.mubr.f32.mxu0 %v495_v46  ;;  %v5927_v43 = vpack.c.bf16 %v945_v36, %v944_v35  ;;  %v899_v46 = vld [vmem:[%s6680_s21 + $0x988] sm:$0xff]  ;;  %v440_v28 = vld [vmem:[%s8573_s3 + $0x270] sm:$0xff]  ;;  %v5973_v33 = vpack.c.bf16 %v983_v23, %v982_v21  ;;  %v889_v36 = vld [vmem:[%s6680_s21 + $0x938] sm:$0xff] }
  0xaf   : > { %5814 = vmatpush3.bf16.msra.mxu1 %v5813_v44  ;;  %2059 = vmatprep.mubr.f32.mxu1 %v547_v45  ;;  %v929_v44 = vld [vmem:[%s6680_s21 + $0xa78] sm:$0xff]  ;;  %v898_v45 = vld [vmem:[%s6680_s21 + $0x980] sm:$0xff]  ;;  %v492_v29 = vld [vmem:[%s8573_s3 + $0x410] sm:$0xff] }
  0xb0   : > { %5910 = vmatpush3.bf16.msra.mxu0 %v5909_v47  ;;  %5816 = vmatprep.subr.bf16.mxu1 %v5815_v48  ;;  %v994_v47 = vld [vmem:[%s6680_s21 + $0xc80] sm:$0xff]  ;;  %v995_v48 = vld [vmem:[%s6680_s21 + $0xc88] sm:$0xff]  ;;  %v5929_v50 = vpack.c.bf16 %v929_v44, %v928_v42  ;;  %v5867_v51 = vpack.c.bf16 %v899_v46, %v898_v45  ;;  %v888_v35 = vld [vmem:[%s6680_s21 + $0x930] sm:$0xff] }
  0xb1   : > { %5912 = vmatprep.subr.bf16.mxu0 %v5911_v52  ;;  %2310 = vmatmul.mubr.f32.gmra.mrb[28].mxu0 %v494_v58  ;;  %v882_v52 = vld [vmem:[%s6680_s21 + $0x900] sm:$0xff]  ;;  %v5963_v54 = vpack.c.bf16 %v995_v48, %v994_v47  ;;  %v901_v58 = vld [vmem:[%s6680_s21 + $0x998] sm:$0xff]  ;;  %v499_v32 = vld [vmem:[%s8573_s3 + $0x448] sm:$0xff]  ;;  %v5881_v46 = vpack.c.bf16 %v889_v36, %v888_v35 }
  0xb2   : > { %2060 = vmatmul.mubr.f32.gmra.mrb[30].mxu1 %v546_v59  ;;  %2314 = vmatprep.mubr.f32.mxu0 %v553_v62  ;;  %v996_v59 = vld [vmem:[%s6680_s21 + $0xc90] sm:$0xff]  ;;  %v5869_v62 = vpack.c.bf16 %v883_v53, %v882_v52  ;;  %v5871_v6 = vpack.c.bf16 %v901_v58, %v900_v57  ;;  %v1002_v42 = vld [vmem:[%s6680_s21 + $0xcc0] sm:$0xff]  ;;  %v557_v48 = vld [vmem:[%s8573_s3 + $0x618] sm:$0xff] }
  0xb3   : > { %5818 = vmatpush3.bf16.msra.mxu1 %v5817_v60  ;;  %2214 = vmatprep.mubr.f32.mxu1 %v377_v4  ;;  %v997_v60 = vld [vmem:[%s6680_s21 + $0xc98] sm:$0xff]  ;;  %v498_v44 = vld [vmem:[%s8573_s3 + $0x440] sm:$0xff]  ;;  %v1004_v58 = vld [vmem:[%s6680_s21 + $0xcd0] sm:$0xff] }
  0xb4   : > { %5914 = vmatpush3.bf16.msra.mxu0 %v5913_v63  ;;  %5820 = vmatprep.subr.bf16.mxu1 %v5819_v0  ;;  %v382_v63 = vld [vmem:[%s8573_s3 + $0xa0] sm:$0xff]  ;;  %v435_v0 = vld [vmem:[%s8573_s3 + $0x248] sm:$0xff]  ;;  %v885_v4 = vld [vmem:[%s6680_s21 + $0x918] sm:$0xff]  ;;  %v5967_v7 = vpack.c.bf16 %v997_v60, %v996_v59 }
  0xb5   : > { %5916 = vmatprep.subr.bf16.mxu0 %v5915_v5  ;;  %2315 = vmatmul.mubr.f32.gmra.mrb[30].mxu0 %v552_v11  ;;  %v980_v5 = vld [vmem:[%s6680_s21 + $0xc10] sm:$0xff]  ;;  %v998_v11 = vld [vmem:[%s6680_s21 + $0xca0] sm:$0xff]  ;;  %v381_v53 = vld [vmem:[%s8573_s3 + $0x98] sm:$0xff] }
  0xb6   : > { %2469 = vmatprep.mubr.f32.mxu0 %v383_v13  ;;  %v434_v13 = vld [vmem:[%s8573_s3 + $0x240] sm:$0xff]  ;;  %v5969_v17 = vpack.c.bf16 %v981_v8, %v980_v5  ;;  %v909_v57 = vld [vmem:[%s6680_s21 + $0x9d8] sm:$0xff]  ;;  %v556_v60 = vld [vmem:[%s8573_s3 + $0x610] sm:$0xff] }
  0xb7   : > { %5822 = vmatpush3.bf16.msra.mxu1 %v5821_v12  ;;  %v999_v12 = vld [vmem:[%s6680_s21 + $0xca8] sm:$0xff]  ;;  %v550_v45 = vld [vmem:[%s8573_s3 + $0x5e0] sm:$0xff]  ;;  %v1005_v59 = vld [vmem:[%s6680_s21 + $0xcd8] sm:$0xff] }
  0xb8   : > { %5918 = vmatpush3.bf16.msra.mxu0 %v5917_v14  ;;  %5824 = vmatprep.subr.bf16.mxu1 %v5823_v15  ;;  %v5873_v14 = vpack.c.bf16 %v885_v4, %v884_v3  ;;  %v493_v15 = vld [vmem:[%s8573_s3 + $0x418] sm:$0xff]  ;;  %v5971_v22 = vpack.c.bf16 %v999_v12, %v998_v11  ;;  %v890_v47 = vld [vmem:[%s6680_s21 + $0x940] sm:$0xff]  ;;  %v988_v4 = vld [vmem:[%s6680_s21 + $0xc50] sm:$0xff]  ;;  %v5983_v5 = vpack.c.bf16 %v1005_v59, %v1004_v58 }
  0xb9   : > { %5920 = vmatprep.subr.bf16.mxu0 %v5919_v19  ;;  %v886_v19 = vld [vmem:[%s6680_s21 + $0x920] sm:$0xff]  ;;  %v893_v3 = vld [vmem:[%s6680_s21 + $0x958] sm:$0xff]  ;;  %v911_v8 = vld [vmem:[%s6680_s21 + $0x9e8] sm:$0xff] }
  0xba   : > { %v5877_v30 = vpack.c.bf16 %v887_v20, %v886_v19  ;;  %v986_v52 = vld [vmem:[%s6680_s21 + $0xc40] sm:$0xff]  ;;  %v1007_v10 = vld [vmem:[%s6680_s21 + $0xce8] sm:$0xff]  ;;  %v912_v19 = vld [vmem:[%s6680_s21 + $0x9f0] sm:$0xff] }
  0xbb   : > { %5826 = vmatpush3.bf16.msra.mxu1 %v5825_v25  ;;  %v905_v25 = vld [vmem:[%s6680_s21 + $0x9b8] sm:$0xff]  ;;  %v1006_v9 = vld [vmem:[%s6680_s21 + $0xce0] sm:$0xff]  ;;  %v1008_v21 = vld [vmem:[%s6680_s21 + $0xcf0] sm:$0xff] }
  0xbc   : > { %5922 = vmatpush3.bf16.msra.mxu0 %v5921_v26  ;;  %5828 = vmatprep.subr.bf16.mxu1 %v5827_v27  ;;  %v1000_v26 = vld [vmem:[%s6680_s21 + $0xcb0] sm:$0xff]  ;;  %v1001_v27 = vld [vmem:[%s6680_s21 + $0xcb8] sm:$0xff]  ;;  %v5879_v34 = vpack.c.bf16 %v905_v25, %v904_v24  ;;  %v966_v58 = vld [vmem:[%s6680_s21 + $0xba0] sm:$0xff] }
  0xbd   : > { %5924 = vmatprep.subr.bf16.mxu0 %v5923_v31  ;;  %v551_v31 = vld [vmem:[%s8573_s3 + $0x5e8] sm:$0xff]  ;;  %v913_v20 = vld [vmem:[%s6680_s21 + $0x9f8] sm:$0xff] }
  0xbe   : > { %v5895_v25 = vpack.c.bf16 %v913_v20, %v912_v19  ;;  %v967_v59 = vld [vmem:[%s6680_s21 + $0xba8] sm:$0xff] }
  0xbf   : > { %5830 = vmatpush3.bf16.msra.mxu1 %v5829_v37  ;;  %v984_v37 = vld [vmem:[%s6680_s21 + $0xc30] sm:$0xff] }
  0xc0   : > { %5926 = vmatpush3.bf16.msra.mxu0 %v5925_v38  ;;  %5832 = vmatprep.subr.bf16.mxu1 %v5831_v39  ;;  %v5975_v38 = vpack.c.bf16 %v1001_v27, %v1000_v26  ;;  %v985_v39 = vld [vmem:[%s6680_s21 + $0xc38] sm:$0xff]  ;;  %v896_v26 = vld [vmem:[%s6680_s21 + $0x970] sm:$0xff] }
  0xc1   : > { %5928 = vmatprep.subr.bf16.mxu0 %v5927_v43  ;;  %v1003_v43 = vld [vmem:[%s6680_s21 + $0xcc8] sm:$0xff]  ;;  %v897_v27 = vld [vmem:[%s6680_s21 + $0x978] sm:$0xff] }
  0xc2   : > { %v5897_v35 = vpack.c.bf16 %v897_v27, %v896_v26  ;;  %v970_v26 = vld [vmem:[%s6680_s21 + $0xbc0] sm:$0xff]  ;;  %v971_v27 = vld [vmem:[%s6680_s21 + $0xbc8] sm:$0xff] }
  0xc3   : > { %5834 = vmatpush3.bf16.msra.mxu1 %v5833_v49  ;;  %v5977_v49 = vpack.c.bf16 %v985_v39, %v984_v37  ;;  %v947_v39 = vld [vmem:[%s6680_s21 + $0xb08] sm:$0xff] }
  0xc4   : > { %5930 = vmatpush3.bf16.msra.mxu0 %v5929_v50  ;;  %5868 = vmatprep.subr.bf16.mxu1 %v5867_v51  ;;  %v5883_v50 = vpack.c.bf16 %v907_v41, %v906_v40  ;;  %v891_v51 = vld [vmem:[%s6680_s21 + $0x948] sm:$0xff]  ;;  %v1042_v41 = vld [vmem:[%s6680_s21 + $0xe00] sm:$0xff] }
  0xc5   : > { %5964 = vmatprep.subr.bf16.mxu0 %v5963_v54  ;;  %v5979_v54 = vpack.c.bf16 %v1003_v43, %v1002_v42  ;;  %v1043_v42 = vld [vmem:[%s6680_s21 + $0xe08] sm:$0xff]  ;;  %v964_v43 = vld [vmem:[%s6680_s21 + $0xb90] sm:$0xff] }
  0xc6   : > { %2215 = vmatmul.mubr.f32.vlgmr.msra.gmra.mrb[32].mxu1 %v376_v61  ;;  %v5885_v61 = vpack.c.bf16 %v891_v51, %v890_v47  ;;  %v380_v47 = vld [vmem:[%s8573_s3 + $0x90] sm:$0xff]  ;;  %v6029_v51 = vpack.c.bf16 %v1043_v42, %v1042_v41  ;;  %v1051_v41 = vld [vmem:[%s6680_s21 + $0xe48] sm:$0xff] }
  0xc7   : > { %5870 = vmatpush3.bf16.msra.mxu1 %v5869_v62  ;;  %2470 = vmatmul.mubr.f32.vlgmr.msra.gmra.mrb[32].mxu0 %v382_v63  ;;  %v387_v62 = vld [vmem:[%s8573_s3 + $0xc8] sm:$0xff]  ;;  %v5981_v63 = vpack.c.bf16 %v987_v55, %v986_v52  ;;  %v948_v52 = vld [vmem:[%s6680_s21 + $0xb10] sm:$0xff] }
  0xc8   : > { %5966 = vmatpush3.bf16.msra.mxu0 %v5965_v1  ;;  %2219 = vmatprep.mubr.f32.mxu1 %v435_v0  ;;  %v5887_v0 = vpack.c.bf16 %v909_v57, %v908_v56  ;;  %v892_v1 = vld [vmem:[%s6680_s21 + $0x950] sm:$0xff]  ;;  %v1045_v57 = vld [vmem:[%s6680_s21 + $0xe18] sm:$0xff] }
  0xc9   : > { %5872 = vmatprep.subr.bf16.mxu1 %v5871_v6  ;;  %5968 = vmatprep.subr.bf16.mxu0 %v5967_v7  ;;  %v989_v6 = vld [vmem:[%s6680_s21 + $0xc58] sm:$0xff]  ;;  %v910_v7 = vld [vmem:[%s6680_s21 + $0x9e0] sm:$0xff]  ;;  %v5889_v11 = vpack.c.bf16 %v893_v3, %v892_v1  ;;  %v972_v42 = vld [vmem:[%s6680_s21 + $0xbd0] sm:$0xff] }
  0xca   : > { %2220 = vmatmul.mubr.f32.gmra.mrb[34].mxu1 %v434_v13  ;;  %2474 = vmatprep.mubr.f32.mxu0 %v441_v16  ;;  %v5985_v12 = vpack.c.bf16 %v989_v6, %v988_v4  ;;  %v5891_v13 = vpack.c.bf16 %v911_v8, %v910_v7  ;;  %v990_v16 = vld [vmem:[%s6680_s21 + $0xc60] sm:$0xff]  ;;  %v445_v1 = vld [vmem:[%s8573_s3 + $0x298] sm:$0xff]  ;;  %v5939_v4 = vpack.c.bf16 %v967_v59, %v966_v58  ;;  %v951_v6 = vld [vmem:[%s6680_s21 + $0xb28] sm:$0xff] }
  0xcb   : > { %5874 = vmatpush3.bf16.msra.mxu1 %v5873_v14  ;;  %2224 = vmatprep.mubr.f32.mxu1 %v493_v15  ;;  %v894_v14 = vld [vmem:[%s6680_s21 + $0x960] sm:$0xff]  ;;  %v895_v15 = vld [vmem:[%s6680_s21 + $0x968] sm:$0xff] }
  0xcc   : > { %5970 = vmatpush3.bf16.msra.mxu0 %v5969_v17  ;;  %5876 = vmatprep.subr.bf16.mxu1 %v5875_v18  ;;  %v5987_v17 = vpack.c.bf16 %v1007_v10, %v1006_v9  ;;  %v991_v18 = vld [vmem:[%s6680_s21 + $0xc68] sm:$0xff]  ;;  %v5893_v23 = vpack.c.bf16 %v895_v15, %v894_v14  ;;  %v1046_v7 = vld [vmem:[%s6680_s21 + $0xe20] sm:$0xff]  ;;  %v968_v10 = vld [vmem:[%s6680_s21 + $0xbb0] sm:$0xff] }
  0xcd   : > { %5972 = vmatprep.subr.bf16.mxu0 %v5971_v22  ;;  %2475 = vmatmul.mubr.f32.gmra.mrb[34].mxu0 %v440_v28  ;;  %v1009_v22 = vld [vmem:[%s6680_s21 + $0xcf8] sm:$0xff]  ;;  %v5989_v24 = vpack.c.bf16 %v991_v18, %v990_v16  ;;  %v992_v28 = vld [vmem:[%s6680_s21 + $0xc70] sm:$0xff]  ;;  %v1047_v9 = vld [vmem:[%s6680_s21 + $0xe28] sm:$0xff] }
  0xce   : > { %2225 = vmatmul.mubr.f32.gmra.mrb[36].mxu1 %v492_v29  ;;  %2479 = vmatprep.mubr.f32.mxu0 %v499_v32  ;;  %v5991_v29 = vpack.c.bf16 %v1009_v22, %v1008_v21  ;;  %v963_v32 = vld [vmem:[%s6680_s21 + $0xb88] sm:$0xff]  ;;  %v444_v14 = vld [vmem:[%s8573_s3 + $0x290] sm:$0xff]  ;;  %v6037_v19 = vpack.c.bf16 %v1047_v9, %v1046_v7  ;;  %v953_v22 = vld [vmem:[%s6680_s21 + $0xb38] sm:$0xff] }
  0xcf   : > { %5878 = vmatpush3.bf16.msra.mxu1 %v5877_v30  ;;  %2229 = vmatprep.mubr.f32.mxu1 %v551_v31  ;;  %v993_v30 = vld [vmem:[%s6680_s21 + $0xc78] sm:$0xff]  ;;  %v962_v31 = vld [vmem:[%s6680_s21 + $0xb80] sm:$0xff]  ;;  %v496_v15 = vld [vmem:[%s8573_s3 + $0x430] sm:$0xff] }
  0xd0   : > { %5974 = vmatpush3.bf16.msra.mxu0 %v5973_v33  ;;  %5880 = vmatprep.subr.bf16.mxu1 %v5879_v34  ;;  %v1058_v33 = vld [vmem:[%s6680_s21 + $0xe80] sm:$0xff]  ;;  %v1059_v34 = vld [vmem:[%s6680_s21 + $0xe88] sm:$0xff]  ;;  %v5993_v36 = vpack.c.bf16 %v993_v30, %v992_v28  ;;  %v5931_v37 = vpack.c.bf16 %v963_v32, %v962_v31  ;;  %v952_v21 = vld [vmem:[%s6680_s21 + $0xb30] sm:$0xff] }
  0xd1   : > { %5976 = vmatprep.subr.bf16.mxu0 %v5975_v38  ;;  %2480 = vmatmul.mubr.f32.gmra.mrb[36].mxu0 %v498_v44  ;;  %v946_v38 = vld [vmem:[%s6680_s21 + $0xb00] sm:$0xff]  ;;  %v6027_v40 = vpack.c.bf16 %v1059_v34, %v1058_v33  ;;  %v965_v44 = vld [vmem:[%s6680_s21 + $0xb98] sm:$0xff]  ;;  %v503_v18 = vld [vmem:[%s8573_s3 + $0x468] sm:$0xff]  ;;  %v5945_v32 = vpack.c.bf16 %v953_v22, %v952_v21 }
  0xd2   : > { %2230 = vmatmul.mubr.f32.gmra.mrb[38].mxu1 %v550_v45  ;;  %2484 = vmatprep.mubr.f32.mxu0 %v557_v48  ;;  %v1060_v45 = vld [vmem:[%s6680_s21 + $0xe90] sm:$0xff]  ;;  %v5933_v48 = vpack.c.bf16 %v947_v39, %v946_v38  ;;  %v5935_v55 = vpack.c.bf16 %v965_v44, %v964_v43  ;;  %v1066_v28 = vld [vmem:[%s6680_s21 + $0xec0] sm:$0xff]  ;;  %v561_v34 = vld [vmem:[%s8573_s3 + $0x638] sm:$0xff] }
  0xd3   : > { %5882 = vmatpush3.bf16.msra.mxu1 %v5881_v46  ;;  %2384 = vmatprep.mubr.f32.mxu1 %v381_v53  ;;  %v1061_v46 = vld [vmem:[%s6680_s21 + $0xe98] sm:$0xff]  ;;  %v502_v30 = vld [vmem:[%s8573_s3 + $0x460] sm:$0xff]  ;;  %v1068_v44 = vld [vmem:[%s6680_s21 + $0xed0] sm:$0xff] }
  0xd4   : > { %5978 = vmatpush3.bf16.msra.mxu0 %v5977_v49  ;;  %5884 = vmatprep.subr.bf16.mxu1 %v5883_v50  ;;  %v386_v49 = vld [vmem:[%s8573_s3 + $0xc0] sm:$0xff]  ;;  %v439_v50 = vld [vmem:[%s8573_s3 + $0x268] sm:$0xff]  ;;  %v949_v53 = vld [vmem:[%s6680_s21 + $0xb18] sm:$0xff]  ;;  %v6031_v56 = vpack.c.bf16 %v1061_v46, %v1060_v45 }
  0xd5   : > { %5980 = vmatprep.subr.bf16.mxu0 %v5979_v54  ;;  %2485 = vmatmul.mubr.f32.gmra.mrb[38].mxu0 %v556_v60  ;;  %v1044_v54 = vld [vmem:[%s6680_s21 + $0xe10] sm:$0xff]  ;;  %v1062_v60 = vld [vmem:[%s6680_s21 + $0xea0] sm:$0xff]  ;;  %v385_v39 = vld [vmem:[%s8573_s3 + $0xb8] sm:$0xff] }
  0xd6   : > { %2639 = vmatprep.mubr.f32.mxu0 %v387_v62  ;;  %v438_v62 = vld [vmem:[%s8573_s3 + $0x260] sm:$0xff]  ;;  %v6033_v3 = vpack.c.bf16 %v1045_v57, %v1044_v54  ;;  %v973_v43 = vld [vmem:[%s6680_s21 + $0xbd8] sm:$0xff]  ;;  %v560_v46 = vld [vmem:[%s8573_s3 + $0x630] sm:$0xff] }
  0xd7   : > { %5886 = vmatpush3.bf16.msra.mxu1 %v5885_v61  ;;  %v1063_v61 = vld [vmem:[%s6680_s21 + $0xea8] sm:$0xff]  ;;  %v554_v31 = vld [vmem:[%s8573_s3 + $0x600] sm:$0xff]  ;;  %v1069_v45 = vld [vmem:[%s6680_s21 + $0xed8] sm:$0xff] }
  0xd8   : > { %5982 = vmatpush3.bf16.msra.mxu0 %v5981_v63  ;;  %5888 = vmatprep.subr.bf16.mxu1 %v5887_v0  ;;  %v5937_v63 = vpack.c.bf16 %v949_v53, %v948_v52  ;;  %v497_v0 = vld [vmem:[%s8573_s3 + $0x438] sm:$0xff]  ;;  %v6035_v8 = vpack.c.bf16 %v1063_v61, %v1062_v60  ;;  %v954_v33 = vld [vmem:[%s6680_s21 + $0xb40] sm:$0xff]  ;;  %v1052_v53 = vld [vmem:[%s6680_s21 + $0xe50] sm:$0xff]  ;;  %v6047_v54 = vpack.c.bf16 %v1069_v45, %v1068_v44 }
  0xd9   : > { %5984 = vmatprep.subr.bf16.mxu0 %v5983_v5  ;;  %v950_v5 = vld [vmem:[%s6680_s21 + $0xb20] sm:$0xff]  ;;  %v957_v52 = vld [vmem:[%s6680_s21 + $0xb58] sm:$0xff]  ;;  %v975_v57 = vld [vmem:[%s6680_s21 + $0xbe8] sm:$0xff] }
  0xda   : > { %v5941_v16 = vpack.c.bf16 %v951_v6, %v950_v5  ;;  %v1050_v38 = vld [vmem:[%s6680_s21 + $0xe40] sm:$0xff]  ;;  %v1071_v59 = vld [vmem:[%s6680_s21 + $0xee8] sm:$0xff]  ;;  %v976_v5 = vld [vmem:[%s6680_s21 + $0xbf0] sm:$0xff] }
  0xdb   : > { %5890 = vmatpush3.bf16.msra.mxu1 %v5889_v11  ;;  %v969_v11 = vld [vmem:[%s6680_s21 + $0xbb8] sm:$0xff]  ;;  %v1070_v58 = vld [vmem:[%s6680_s21 + $0xee0] sm:$0xff]  ;;  %v1072_v7 = vld [vmem:[%s6680_s21 + $0xef0] sm:$0xff] }
  0xdc   : > { %5986 = vmatpush3.bf16.msra.mxu0 %v5985_v12  ;;  %5892 = vmatprep.subr.bf16.mxu1 %v5891_v13  ;;  %v1064_v12 = vld [vmem:[%s6680_s21 + $0xeb0] sm:$0xff]  ;;  %v1065_v13 = vld [vmem:[%s6680_s21 + $0xeb8] sm:$0xff]  ;;  %v5943_v20 = vpack.c.bf16 %v969_v11, %v968_v10  ;;  %v1030_v44 = vld [vmem:[%s6680_s21 + $0xda0] sm:$0xff] }
  0xdd   : > { %5988 = vmatprep.subr.bf16.mxu0 %v5987_v17  ;;  %v555_v17 = vld [vmem:[%s8573_s3 + $0x608] sm:$0xff]  ;;  %v977_v6 = vld [vmem:[%s6680_s21 + $0xbf8] sm:$0xff] }
  0xde   : > { %v5959_v11 = vpack.c.bf16 %v977_v6, %v976_v5  ;;  %v1031_v45 = vld [vmem:[%s6680_s21 + $0xda8] sm:$0xff] }
  0xdf   : > { %5894 = vmatpush3.bf16.msra.mxu1 %v5893_v23  ;;  %v1048_v23 = vld [vmem:[%s6680_s21 + $0xe30] sm:$0xff] }
  0xe0   : > { %5990 = vmatpush3.bf16.msra.mxu0 %v5989_v24  ;;  %5896 = vmatprep.subr.bf16.mxu1 %v5895_v25  ;;  %v6039_v24 = vpack.c.bf16 %v1065_v13, %v1064_v12  ;;  %v1049_v25 = vld [vmem:[%s6680_s21 + $0xe38] sm:$0xff]  ;;  %v960_v12 = vld [vmem:[%s6680_s21 + $0xb70] sm:$0xff] }
  0xe1   : > { %5992 = vmatprep.subr.bf16.mxu0 %v5991_v29  ;;  %v1067_v29 = vld [vmem:[%s6680_s21 + $0xec8] sm:$0xff]  ;;  %v961_v13 = vld [vmem:[%s6680_s21 + $0xb78] sm:$0xff] }
  0xe2   : > { %v5961_v21 = vpack.c.bf16 %v961_v13, %v960_v12  ;;  %v1034_v12 = vld [vmem:[%s6680_s21 + $0xdc0] sm:$0xff]  ;;  %v1035_v13 = vld [vmem:[%s6680_s21 + $0xdc8] sm:$0xff] }
  0xe3   : > { %5898 = vmatpush3.bf16.msra.mxu1 %v5897_v35  ;;  %v6041_v35 = vpack.c.bf16 %v1049_v25, %v1048_v23  ;;  %v1011_v25 = vld [vmem:[%s6680_s21 + $0xd08] sm:$0xff] }
  0xe4   : > { %5994 = vmatpush3.bf16.msra.mxu0 %v5993_v36  ;;  %5932 = vmatprep.subr.bf16.mxu1 %v5931_v37  ;;  %v5947_v36 = vpack.c.bf16 %v971_v27, %v970_v26  ;;  %v955_v37 = vld [vmem:[%s6680_s21 + $0xb48] sm:$0xff]  ;;  %v1106_v27 = vld [vmem:[%s6680_s21 + $0x1000] sm:$0xff] }
  0xe5   : > { %6028 = vmatprep.subr.bf16.mxu0 %v6027_v40  ;;  %v6043_v40 = vpack.c.bf16 %v1067_v29, %v1066_v28  ;;  %v1107_v28 = vld [vmem:[%s6680_s21 + $0x1008] sm:$0xff]  ;;  %v1028_v29 = vld [vmem:[%s6680_s21 + $0xd90] sm:$0xff] }
  0xe6   : > { %2385 = vmatmul.mubr.f32.vlgmr.msra.gmra.mrb[40].mxu1 %v380_v47  ;;  %v5949_v47 = vpack.c.bf16 %v955_v37, %v954_v33  ;;  %v384_v33 = vld [vmem:[%s8573_s3 + $0xb0] sm:$0xff]  ;;  %v6093_v37 = vpack.c.bf16 %v1107_v28, %v1106_v27  ;;  %v1115_v27 = vld [vmem:[%s6680_s21 + $0x1048] sm:$0xff] }
  0xe7   : > { %5934 = vmatpush3.bf16.msra.mxu1 %v5933_v48  ;;  %2640 = vmatmul.mubr.f32.vlgmr.msra.gmra.mrb[40].mxu0 %v386_v49  ;;  %v391_v48 = vld [vmem:[%s8573_s3 + $0xe8] sm:$0xff]  ;;  %v6045_v49 = vpack.c.bf16 %v1051_v41, %v1050_v38  ;;  %v1012_v38 = vld [vmem:[%s6680_s21 + $0xd10] sm:$0xff] }
  0xe8   : > { %6030 = vmatpush3.bf16.msra.mxu0 %v6029_v51  ;;  %2389 = vmatprep.mubr.f32.mxu1 %v439_v50  ;;  %v5951_v50 = vpack.c.bf16 %v973_v43, %v972_v42  ;;  %v956_v51 = vld [vmem:[%s6680_s21 + $0xb50] sm:$0xff]  ;;  %v1109_v43 = vld [vmem:[%s6680_s21 + $0x1018] sm:$0xff] }
  0xe9   : > { %5936 = vmatprep.subr.bf16.mxu1 %v5935_v55  ;;  %6032 = vmatprep.subr.bf16.mxu0 %v6031_v56  ;;  %v1053_v55 = vld [vmem:[%s6680_s21 + $0xe58] sm:$0xff]  ;;  %v974_v56 = vld [vmem:[%s6680_s21 + $0xbe0] sm:$0xff]  ;;  %v5953_v60 = vpack.c.bf16 %v957_v52, %v956_v51  ;;  %v1036_v28 = vld [vmem:[%s6680_s21 + $0xdd0] sm:$0xff] }
  0xea   : > { %2390 = vmatmul.mubr.f32.gmra.mrb[42].mxu1 %v438_v62  ;;  %2644 = vmatprep.mubr.f32.mxu0 %v445_v1  ;;  %v6049_v61 = vpack.c.bf16 %v1053_v55, %v1052_v53  ;;  %v5955_v62 = vpack.c.bf16 %v975_v57, %v974_v56  ;;  %v1054_v1 = vld [vmem:[%s6680_s21 + $0xe60] sm:$0xff]  ;;  %v449_v51 = vld [vmem:[%s8573_s3 + $0x2b8] sm:$0xff]  ;;  %v6003_v53 = vpack.c.bf16 %v1031_v45, %v1030_v44  ;;  %v1015_v55 = vld [vmem:[%s6680_s21 + $0xd28] sm:$0xff] }
  0xeb   : > { %5938 = vmatpush3.bf16.msra.mxu1 %v5937_v63  ;;  %2394 = vmatprep.mubr.f32.mxu1 %v497_v0  ;;  %v958_v63 = vld [vmem:[%s6680_s21 + $0xb60] sm:$0xff]  ;;  %v959_v0 = vld [vmem:[%s6680_s21 + $0xb68] sm:$0xff] }
  0xec   : > { %6034 = vmatpush3.bf16.msra.mxu0 %v6033_v3  ;;  %5940 = vmatprep.subr.bf16.mxu1 %v5939_v4  ;;  %v6051_v3 = vpack.c.bf16 %v1071_v59, %v1070_v58  ;;  %v1055_v4 = vld [vmem:[%s6680_s21 + $0xe68] sm:$0xff]  ;;  %v5957_v9 = vpack.c.bf16 %v959_v0, %v958_v63  ;;  %v1110_v56 = vld [vmem:[%s6680_s21 + $0x1020] sm:$0xff]  ;;  %v1032_v59 = vld [vmem:[%s6680_s21 + $0xdb0] sm:$0xff] }
  0xed   : > { %6036 = vmatprep.subr.bf16.mxu0 %v6035_v8  ;;  %2645 = vmatmul.mubr.f32.gmra.mrb[42].mxu0 %v444_v14  ;;  %v1073_v8 = vld [vmem:[%s6680_s21 + $0xef8] sm:$0xff]  ;;  %v6053_v10 = vpack.c.bf16 %v1055_v4, %v1054_v1  ;;  %v1056_v14 = vld [vmem:[%s6680_s21 + $0xe70] sm:$0xff]  ;;  %v1111_v58 = vld [vmem:[%s6680_s21 + $0x1028] sm:$0xff] }
  0xee   : > { %2395 = vmatmul.mubr.f32.gmra.mrb[44].mxu1 %v496_v15  ;;  %2649 = vmatprep.mubr.f32.mxu0 %v503_v18  ;;  %v6055_v15 = vpack.c.bf16 %v1073_v8, %v1072_v7  ;;  %v1027_v18 = vld [vmem:[%s6680_s21 + $0xd88] sm:$0xff]  ;;  %v448_v63 = vld [vmem:[%s8573_s3 + $0x2b0] sm:$0xff]  ;;  %v6101_v5 = vpack.c.bf16 %v1111_v58, %v1110_v56  ;;  %v1017_v8 = vld [vmem:[%s6680_s21 + $0xd38] sm:$0xff] }
  0xef   : > { %5942 = vmatpush3.bf16.msra.mxu1 %v5941_v16  ;;  %2399 = vmatprep.mubr.f32.mxu1 %v555_v17  ;;  %v1057_v16 = vld [vmem:[%s6680_s21 + $0xe78] sm:$0xff]  ;;  %v1026_v17 = vld [vmem:[%s6680_s21 + $0xd80] sm:$0xff]  ;;  %v500_v0 = vld [vmem:[%s8573_s3 + $0x450] sm:$0xff] }
  0xf0   : > { %6038 = vmatpush3.bf16.msra.mxu0 %v6037_v19  ;;  %5944 = vmatprep.subr.bf16.mxu1 %v5943_v20  ;;  %v1122_v19 = vld [vmem:[%s6680_s21 + $0x1080] sm:$0xff]  ;;  %v1123_v20 = vld [vmem:[%s6680_s21 + $0x1088] sm:$0xff]  ;;  %v6057_v22 = vpack.c.bf16 %v1057_v16, %v1056_v14  ;;  %v5995_v23 = vpack.c.bf16 %v1027_v18, %v1026_v17  ;;  %v1016_v7 = vld [vmem:[%s6680_s21 + $0xd30] sm:$0xff] }
  0xf1   : > { %6040 = vmatprep.subr.bf16.mxu0 %v6039_v24  ;;  %2650 = vmatmul.mubr.f32.gmra.mrb[44].mxu0 %v502_v30  ;;  %v1010_v24 = vld [vmem:[%s6680_s21 + $0xd00] sm:$0xff]  ;;  %v6091_v26 = vpack.c.bf16 %v1123_v20, %v1122_v19  ;;  %v1029_v30 = vld [vmem:[%s6680_s21 + $0xd98] sm:$0xff]  ;;  %v507_v4 = vld [vmem:[%s8573_s3 + $0x488] sm:$0xff]  ;;  %v6009_v18 = vpack.c.bf16 %v1017_v8, %v1016_v7 }
  0xf2   : > { %2400 = vmatmul.mubr.f32.gmra.mrb[46].mxu1 %v554_v31  ;;  %2654 = vmatprep.mubr.f32.mxu0 %v561_v34  ;;  %v1124_v31 = vld [vmem:[%s6680_s21 + $0x1090] sm:$0xff]  ;;  %v5997_v34 = vpack.c.bf16 %v1011_v25, %v1010_v24  ;;  %v5999_v41 = vpack.c.bf16 %v1029_v30, %v1028_v29  ;;  %v1130_v14 = vld [vmem:[%s6680_s21 + $0x10c0] sm:$0xff]  ;;  %v565_v20 = vld [vmem:[%s8573_s3 + $0x658] sm:$0xff] }
  0xf3   : > { %5946 = vmatpush3.bf16.msra.mxu1 %v5945_v32  ;;  %2554 = vmatprep.mubr.f32.mxu1 %v385_v39  ;;  %v1125_v32 = vld [vmem:[%s6680_s21 + $0x1098] sm:$0xff]  ;;  %v506_v16 = vld [vmem:[%s8573_s3 + $0x480] sm:$0xff]  ;;  %v1132_v30 = vld [vmem:[%s6680_s21 + $0x10d0] sm:$0xff] }
  0xf4   : > { %6042 = vmatpush3.bf16.msra.mxu0 %v6041_v35  ;;  %5948 = vmatprep.subr.bf16.mxu1 %v5947_v36  ;;  %v390_v35 = vld [vmem:[%s8573_s3 + $0xe0] sm:$0xff]  ;;  %v443_v36 = vld [vmem:[%s8573_s3 + $0x288] sm:$0xff]  ;;  %v1013_v39 = vld [vmem:[%s6680_s21 + $0xd18] sm:$0xff]  ;;  %v6095_v42 = vpack.c.bf16 %v1125_v32, %v1124_v31 }
  0xf5   : > { %6044 = vmatprep.subr.bf16.mxu0 %v6043_v40  ;;  %2655 = vmatmul.mubr.f32.gmra.mrb[46].mxu0 %v560_v46  ;;  %v1108_v40 = vld [vmem:[%s6680_s21 + $0x1010] sm:$0xff]  ;;  %v1126_v46 = vld [vmem:[%s6680_s21 + $0x10a0] sm:$0xff]  ;;  %v389_v25 = vld [vmem:[%s8573_s3 + $0xd8] sm:$0xff] }
  0xf6   : > { %2809 = vmatprep.mubr.f32.mxu0 %v391_v48  ;;  %v442_v48 = vld [vmem:[%s8573_s3 + $0x280] sm:$0xff]  ;;  %v6097_v52 = vpack.c.bf16 %v1109_v43, %v1108_v40  ;;  %v1037_v29 = vld [vmem:[%s6680_s21 + $0xdd8] sm:$0xff]  ;;  %v564_v32 = vld [vmem:[%s8573_s3 + $0x650] sm:$0xff] }
  0xf7   : > { %5950 = vmatpush3.bf16.msra.mxu1 %v5949_v47  ;;  %v1127_v47 = vld [vmem:[%s6680_s21 + $0x10a8] sm:$0xff]  ;;  %v558_v17 = vld [vmem:[%s8573_s3 + $0x620] sm:$0xff]  ;;  %v1133_v31 = vld [vmem:[%s6680_s21 + $0x10d8] sm:$0xff] }
  0xf8   : > { %6046 = vmatpush3.bf16.msra.mxu0 %v6045_v49  ;;  %5952 = vmatprep.subr.bf16.mxu1 %v5951_v50  ;;  %v6001_v49 = vpack.c.bf16 %v1013_v39, %v1012_v38  ;;  %v501_v50 = vld [vmem:[%s8573_s3 + $0x458] sm:$0xff]  ;;  %v6099_v57 = vpack.c.bf16 %v1127_v47, %v1126_v46  ;;  %v1018_v19 = vld [vmem:[%s6680_s21 + $0xd40] sm:$0xff]  ;;  %v1116_v39 = vld [vmem:[%s6680_s21 + $0x1050] sm:$0xff]  ;;  %v6111_v40 = vpack.c.bf16 %v1133_v31, %v1132_v30 }
  0xf9   : > { %6048 = vmatprep.subr.bf16.mxu0 %v6047_v54  ;;  %v1014_v54 = vld [vmem:[%s6680_s21 + $0xd20] sm:$0xff]  ;;  %v1021_v38 = vld [vmem:[%s6680_s21 + $0xd58] sm:$0xff]  ;;  %v1039_v43 = vld [vmem:[%s6680_s21 + $0xde8] sm:$0xff] }
  0xfa   : > { %v6005_v1 = vpack.c.bf16 %v1015_v55, %v1014_v54  ;;  %v1114_v24 = vld [vmem:[%s6680_s21 + $0x1040] sm:$0xff]  ;;  %v1135_v45 = vld [vmem:[%s6680_s21 + $0x10e8] sm:$0xff]  ;;  %v1040_v55 = vld [vmem:[%s6680_s21 + $0xdf0] sm:$0xff] }
  0xfb   : > { %5954 = vmatpush3.bf16.msra.mxu1 %v5953_v60  ;;  %v1033_v60 = vld [vmem:[%s6680_s21 + $0xdb8] sm:$0xff]  ;;  %v1134_v44 = vld [vmem:[%s6680_s21 + $0x10e0] sm:$0xff]  ;;  %v1119_v54 = vld [vmem:[%s6680_s21 + $0x1068] sm:$0xff] }
  0xfc   : > { %6050 = vmatpush3.bf16.msra.mxu0 %v6049_v61  ;;  %5956 = vmatprep.subr.bf16.mxu1 %v5955_v62  ;;  %v1128_v61 = vld [vmem:[%s6680_s21 + $0x10b0] sm:$0xff]  ;;  %v1129_v62 = vld [vmem:[%s6680_s21 + $0x10b8] sm:$0xff]  ;;  %v6007_v6 = vpack.c.bf16 %v1033_v60, %v1032_v59 }
  0xfd   : > { %6052 = vmatprep.subr.bf16.mxu0 %v6051_v3  ;;  %v559_v3 = vld [vmem:[%s8573_s3 + $0x628] sm:$0xff]  ;;  %v1041_v56 = vld [vmem:[%s6680_s21 + $0xdf8] sm:$0xff]  ;;  %v1136_v59 = vld [vmem:[%s6680_s21 + $0x10f0] sm:$0xff] }
  0xfe   : > { %v1137_v60 = vld [vmem:[%s6680_s21 + $0x10f8] sm:$0xff]  ;;  %v1188_v30 = vld [vmem:[%s6680_s21 + $0x1290] sm:$0xff] }
  0xff   : > { %5958 = vmatpush3.bf16.msra.mxu1 %v5957_v9  ;;  %v1112_v9 = vld [vmem:[%s6680_s21 + $0x1030] sm:$0xff]  ;;  %v6119_v7 = vpack.c.bf16 %v1137_v60, %v1136_v59  ;;  %v1121_v8 = vld [vmem:[%s6680_s21 + $0x1078] sm:$0xff] }
 0x100   : > { %6054 = vmatpush3.bf16.msra.mxu0 %v6053_v10  ;;  %5960 = vmatprep.subr.bf16.mxu1 %v5959_v11  ;;  %v6103_v10 = vpack.c.bf16 %v1129_v62, %v1128_v61  ;;  %v1113_v11 = vld [vmem:[%s6680_s21 + $0x1038] sm:$0xff] }
 0x101   : > { %6056 = vmatprep.subr.bf16.mxu0 %v6055_v15  ;;  %v1131_v15 = vld [vmem:[%s6680_s21 + $0x10c8] sm:$0xff]  ;;  %v1189_v31 = vld [vmem:[%s6680_s21 + $0x1298] sm:$0xff] }
 0x102   : > { %v453_v60 = vld [vmem:[%s8573_s3 + $0x2d8] sm:$0xff] }
 0x103   : > { %5962 = vmatpush3.bf16.msra.mxu1 %v5961_v21  ;;  %v6105_v21 = vpack.c.bf16 %v1113_v11, %v1112_v9  ;;  %v1090_v9 = vld [vmem:[%s6680_s21 + $0xf80] sm:$0xff] }
 0x104   : > { %6058 = vmatpush3.bf16.msra.mxu0 %v6057_v22  ;;  %5996 = vmatprep.subr.bf16.mxu1 %v5995_v23  ;;  %v6011_v22 = vpack.c.bf16 %v1035_v13, %v1034_v12  ;;  %v1019_v23 = vld [vmem:[%s6680_s21 + $0xd48] sm:$0xff]  ;;  %v1186_v12 = vld [vmem:[%s6680_s21 + $0x1280] sm:$0xff] }
 0x105   : > { %6092 = vmatprep.subr.bf16.mxu0 %v6091_v26  ;;  %v6107_v26 = vpack.c.bf16 %v1131_v15, %v1130_v14  ;;  %v1187_v13 = vld [vmem:[%s6680_s21 + $0x1288] sm:$0xff] }
 0x106   : > { %2555 = vmatmul.mubr.f32.vlgmr.msra.gmra.mrb[48].mxu1 %v384_v33  ;;  %v6013_v33 = vpack.c.bf16 %v1019_v23, %v1018_v19 }
 0x107   : > { %5998 = vmatpush3.bf16.msra.mxu1 %v5997_v34  ;;  %2810 = vmatmul.mubr.f32.vlgmr.msra.gmra.mrb[48].mxu0 %v390_v35  ;;  %v395_v34 = vld [vmem:[%s8573_s3 + $0x108] sm:$0xff]  ;;  %v6109_v35 = vpack.c.bf16 %v1115_v27, %v1114_v24  ;;  %v6155_v24 = vpack.c.bf16 %v1187_v13, %v1186_v12  ;;  %v1092_v27 = vld [vmem:[%s6680_s21 + $0xf90] sm:$0xff] }
 0x108   : > { %6094 = vmatpush3.bf16.msra.mxu0 %v6093_v37  ;;  %2559 = vmatprep.mubr.f32.mxu1 %v443_v36  ;;  %v6015_v36 = vpack.c.bf16 %v1037_v29, %v1036_v28  ;;  %v1020_v37 = vld [vmem:[%s6680_s21 + $0xd50] sm:$0xff]  ;;  %v1093_v29 = vld [vmem:[%s6680_s21 + $0xf98] sm:$0xff] }
 0x109   : > { %6000 = vmatprep.subr.bf16.mxu1 %v5999_v41  ;;  %6096 = vmatprep.subr.bf16.mxu0 %v6095_v42  ;;  %v1117_v41 = vld [vmem:[%s6680_s21 + $0x1058] sm:$0xff]  ;;  %v1038_v42 = vld [vmem:[%s6680_s21 + $0xde0] sm:$0xff]  ;;  %v6017_v46 = vpack.c.bf16 %v1021_v38, %v1020_v37  ;;  %v447_v37 = vld [vmem:[%s8573_s3 + $0x2a8] sm:$0xff] }
 0x10a   : > { %2560 = vmatmul.mubr.f32.gmra.mrb[50].mxu1 %v442_v48  ;;  %2814 = vmatprep.mubr.f32.mxu0 %v449_v51  ;;  %v6113_v47 = vpack.c.bf16 %v1117_v41, %v1116_v39  ;;  %v6019_v48 = vpack.c.bf16 %v1039_v43, %v1038_v42  ;;  %v1118_v51 = vld [vmem:[%s6680_s21 + $0x1060] sm:$0xff]  ;;  %v1076_v41 = vld [vmem:[%s6680_s21 + $0xf10] sm:$0xff]  ;;  %v1077_v42 = vld [vmem:[%s6680_s21 + $0xf18] sm:$0xff] }
 0x10b   : > { %6002 = vmatpush3.bf16.msra.mxu1 %v6001_v49  ;;  %2564 = vmatprep.mubr.f32.mxu1 %v501_v50  ;;  %v1022_v49 = vld [vmem:[%s6680_s21 + $0xd60] sm:$0xff]  ;;  %v1023_v50 = vld [vmem:[%s6680_s21 + $0xd68] sm:$0xff]  ;;  %v1172_v43 = vld [vmem:[%s6680_s21 + $0x1210] sm:$0xff] }
 0x10c   : > { %6098 = vmatpush3.bf16.msra.mxu0 %v6097_v52  ;;  %6004 = vmatprep.subr.bf16.mxu1 %v6003_v53  ;;  %v6115_v53 = vpack.c.bf16 %v1135_v45, %v1134_v44  ;;  %v6063_v45 = vpack.c.bf16 %v1093_v29, %v1092_v27  ;;  %v452_v12 = vld [vmem:[%s8573_s3 + $0x2d0] sm:$0xff]  ;;  %v1099_v27 = vld [vmem:[%s6680_s21 + $0xfc8] sm:$0xff] }
 0x10d   : > { %6100 = vmatprep.subr.bf16.mxu0 %v6099_v57  ;;  %2815 = vmatmul.mubr.f32.gmra.mrb[50].mxu0 %v448_v63  ;;  %v6021_v63 = vpack.c.bf16 %v1023_v50, %v1022_v49  ;;  %v1095_v49 = vld [vmem:[%s6680_s21 + $0xfa8] sm:$0xff]  ;;  %v504_v13 = vld [vmem:[%s8573_s3 + $0x470] sm:$0xff] }
 0x10e   : > { %2565 = vmatmul.mubr.f32.gmra.mrb[52].mxu1 %v500_v0  ;;  %2819 = vmatprep.mubr.f32.mxu0 %v507_v4  ;;  %v1024_v4 = vld [vmem:[%s6680_s21 + $0xd70] sm:$0xff]  ;;  %v1195_v29 = vld [vmem:[%s6680_s21 + $0x12c8] sm:$0xff] }
 0x10f   : > { %6006 = vmatpush3.bf16.msra.mxu1 %v6005_v1  ;;  %2569 = vmatprep.mubr.f32.mxu1 %v559_v3  ;;  %v6117_v1 = vpack.c.bf16 %v1119_v54, %v1118_v51  ;;  %v6023_v3 = vpack.c.bf16 %v1041_v56, %v1040_v55  ;;  %v1190_v51 = vld [vmem:[%s6680_s21 + $0x12a0] sm:$0xff]  ;;  %v6065_v56 = vpack.c.bf16 %v1077_v42, %v1076_v41  ;;  %v1179_v42 = vld [vmem:[%s6680_s21 + $0x1248] sm:$0xff] }
 0x110   : > { %6102 = vmatpush3.bf16.msra.mxu0 %v6101_v5  ;;  %6008 = vmatprep.subr.bf16.mxu1 %v6007_v6  ;;  %v1025_v5 = vld [vmem:[%s6680_s21 + $0xd78] sm:$0xff]  ;;  %v1120_v6 = vld [vmem:[%s6680_s21 + $0x1070] sm:$0xff]  ;;  %v446_v55 = vld [vmem:[%s8573_s3 + $0x2a0] sm:$0xff] }
 0x111   : > { %6104 = vmatprep.subr.bf16.mxu0 %v6103_v10  ;;  %2820 = vmatmul.mubr.f32.gmra.mrb[52].mxu0 %v506_v16  ;;  %v1091_v10 = vld [vmem:[%s6680_s21 + $0xf88] sm:$0xff]  ;;  %v6025_v16 = vpack.c.bf16 %v1025_v5, %v1024_v4  ;;  %v6121_v19 = vpack.c.bf16 %v1121_v8, %v1120_v6  ;;  %v1174_v4 = vld [vmem:[%s6680_s21 + $0x1220] sm:$0xff]  ;;  %v1096_v8 = vld [vmem:[%s6680_s21 + $0xfb0] sm:$0xff] }
 0x112   : > { %2570 = vmatmul.mubr.f32.gmra.mrb[54].mxu1 %v558_v17  ;;  %2824 = vmatprep.mubr.f32.mxu0 %v565_v20  ;;  %v6059_v20 = vpack.c.bf16 %v1091_v10, %v1090_v9  ;;  %v1097_v9 = vld [vmem:[%s6680_s21 + $0xfb8] sm:$0xff]  ;;  %v1192_v10 = vld [vmem:[%s6680_s21 + $0x12b0] sm:$0xff] }
 0x113   : > { %6010 = vmatpush3.bf16.msra.mxu1 %v6009_v18  ;;  %2724 = vmatprep.mubr.f32.mxu1 %v389_v25  ;;  %v1170_v25 = vld [vmem:[%s6680_s21 + $0x1200] sm:$0xff] }
 0x114   : > { %6106 = vmatpush3.bf16.msra.mxu0 %v6105_v21  ;;  %6012 = vmatprep.subr.bf16.mxu1 %v6011_v22  ;;  %v1074_v21 = vld [vmem:[%s6680_s21 + $0xf00] sm:$0xff]  ;;  %v1075_v22 = vld [vmem:[%s6680_s21 + $0xf08] sm:$0xff] }
 0x115   : > { %6108 = vmatprep.subr.bf16.mxu0 %v6107_v26  ;;  %2825 = vmatmul.mubr.f32.gmra.mrb[54].mxu0 %v564_v32  ;;  %v1171_v26 = vld [vmem:[%s6680_s21 + $0x1208] sm:$0xff] }
 0x116   : > { %2979 = vmatprep.mubr.f32.mxu0 %v395_v34  ;;  %v388_v34 = vld [vmem:[%s8573_s3 + $0xd0] sm:$0xff] }
 0x117   : > { %6014 = vmatpush3.bf16.msra.mxu1 %v6013_v33 }
 0x118   : > { %6110 = vmatpush3.bf16.msra.mxu0 %v6109_v35  ;;  %6016 = vmatprep.subr.bf16.mxu1 %v6015_v36  ;;  %v6061_v35 = vpack.c.bf16 %v1075_v22, %v1074_v21  ;;  %v394_v36 = vld [vmem:[%s8573_s3 + $0x100] sm:$0xff]  ;;  %v1081_v21 = vld [vmem:[%s6680_s21 + $0xf38] sm:$0xff]  ;;  %v1176_v22 = vld [vmem:[%s6680_s21 + $0x1230] sm:$0xff] }
 0x119   : > { %v4357_v52 = vpop.f32.mrb[0].mxu1  ;;  %6112 = vmatprep.subr.bf16.mxu0 %v6111_v40  ;;  %v6157_v40 = vpack.c.bf16 %v1171_v26, %v1170_v25  ;;  %v1177_v25 = vld [vmem:[%s6680_s21 + $0x1238] sm:$0xff]  ;;  %v1098_v26 = vld [vmem:[%s6680_s21 + $0xfc0] sm:$0xff] }
 0x11a   : > { %v4358_v57 = vpop.f32.mrb[1].mxu1  ;;  %v4445_v58 = vpop.f32.mrb[0].mxu0 }
 0x11b   : > { %v7538_v61 = vadd.f32 %v4358_v57, %v4357_v52  ;;  %6018 = vmatpush3.bf16.msra.mxu1 %v6017_v46  ;;  %v4446_v62 = vpop.f32.mrb[1].mxu0  ;;  %v6159_v46 = vpack.c.bf16 %v1189_v31, %v1188_v30  ;;  %v1191_v52 = vld [vmem:[%s6680_s21 + $0x12a8] sm:$0xff]  ;;  %v505_v57 = vld [vmem:[%s8573_s3 + $0x478] sm:$0xff]  ;;  %v510_v30 = vld [vmem:[%s8573_s3 + $0x4a0] sm:$0xff] }
 0x11c   : > { %6114 = vmatpush3.bf16.msra.mxu0 %v6113_v47  ;;  %v7540_v0 = vadd.f32 %v4446_v62, %v4445_v58  ;;  %6020 = vmatprep.subr.bf16.mxu1 %v6019_v48  ;;  %v1173_v47 = vld [vmem:[%s6680_s21 + $0x1218] sm:$0xff]  ;;  %v1094_v48 = vld [vmem:[%s6680_s21 + $0xfa0] sm:$0xff]  ;;  %v6163_v6 = vpack.c.bf16 %v1191_v52, %v1190_v51 }
 0x11d   : > { %6116 = vmatprep.subr.bf16.mxu0 %v6115_v53  ;;  %v4360_v11 = vpop.f32.mrb[2].mxu1  ;;  %v6161_v62 = vpack.c.bf16 %v1173_v47, %v1172_v43  ;;  %v562_v31 = vld [vmem:[%s8573_s3 + $0x640] sm:$0xff]  ;;  %v1100_v43 = vld [vmem:[%s6680_s21 + $0xfd0] sm:$0xff]  ;;  %v1197_v47 = vld [vmem:[%s6680_s21 + $0x12d8] sm:$0xff] }
 0x11e   : > { %v4361_v14 = vpop.f32.mrb[3].mxu1  ;;  %v4448_v15 = vpop.f32.mrb[2].mxu0 }
 0x11f   : > { %6022 = vmatpush3.bf16.msra.mxu1 %v6021_v63  ;;  %v7550_v17 = vadd.f32 %v4361_v14, %v4360_v11  ;;  %v4449_v18 = vpop.f32.mrb[3].mxu0  ;;  %v6067_v63 = vpack.c.bf16 %v1095_v49, %v1094_v48  ;;  %v1193_v11 = vld [vmem:[%s6680_s21 + $0x12b8] sm:$0xff]  ;;  %v568_v48 = vld [vmem:[%s8573_s3 + $0x670] sm:$0xff] }
 0x120   : > { %6118 = vmatpush3.bf16.msra.mxu0 %v6117_v1  ;;  %6024 = vmatprep.subr.bf16.mxu1 %v6023_v3  ;;  %v7554_v23 = vadd.f32 %v4449_v18, %v4448_v15  ;;  %v1078_v1 = vld [vmem:[%s6680_s21 + $0xf20] sm:$0xff]  ;;  %v1079_v3 = vld [vmem:[%s6680_s21 + $0xf28] sm:$0xff] }
 0x121   : > { %6120 = vmatprep.subr.bf16.mxu0 %v6119_v7  ;;  %v4363_v28 = vpop.f32.mrb[4].mxu1  ;;  %v1175_v7 = vld [vmem:[%s6680_s21 + $0x1228] sm:$0xff]  ;;  %v6069_v14 = vpack.c.bf16 %v1079_v3, %v1078_v1  ;;  %v1525_v3 = vpop.permute.xlu0 %1524 }
 0x122   : > { %v4364_v32 = vpop.f32.mrb[5].mxu1  ;;  %v4451_v33 = vpop.f32.mrb[4].mxu0  ;;  %v563_v15 = vld [vmem:[%s8573_s3 + $0x648] sm:$0xff]  ;;  %v6165_v18 = vpack.c.bf16 %v1175_v7, %v1174_v4  ;;  %v1086_v7 = vld [vmem:[%s6680_s21 + $0xf60] sm:$0xff] }
 0x123   : > { %6026 = vmatpush3.bf16.msra.mxu1 %v6025_v16  ;;  %v7571_v38 = vadd.f32 %v4364_v32, %v4363_v28  ;;  %v4452_v39 = vpop.f32.mrb[5].mxu0  ;;  %v511_v16 = vld [vmem:[%s8573_s3 + $0x4a8] sm:$0xff]  ;;  %v1194_v28 = vld [vmem:[%s6680_s21 + $0x12c0] sm:$0xff] }
 0x124   : > { %6122 = vmatpush3.bf16.msra.mxu0 %v6121_v19  ;;  %6060 = vmatprep.subr.bf16.mxu1 %v6059_v20  ;;  %v7576_v44 = vadd.f32 %v4452_v39, %v4451_v33  ;;  %v6071_v19 = vpack.c.bf16 %v1097_v9, %v1096_v8  ;;  %v1080_v20 = vld [vmem:[%s6680_s21 + $0xf30] sm:$0xff]  ;;  %v1082_v33 = vld [vmem:[%s6680_s21 + $0xf40] sm:$0xff]  ;;  %v6171_v41 = vpack.c.bf16 %v1195_v29, %v1194_v28  ;;  %v1087_v8 = vld [vmem:[%s6680_s21 + $0xf68] sm:$0xff] }
 0x125   : > { %6156 = vmatprep.subr.bf16.mxu0 %v6155_v24  ;;  %v4366_v50 = vpop.f32.mrb[6].mxu1  ;;  %v6167_v24 = vpack.c.bf16 %v1193_v11, %v1192_v10  ;;  %v6073_v32 = vpack.c.bf16 %v1081_v21, %v1080_v20  ;;  %v1178_v39 = vld [vmem:[%s6680_s21 + $0x1240] sm:$0xff]  ;;  %v1622_v20 = vadd.f32 %v7538_v61, %v1525_v3  ;;  %v1088_v29 = vld [vmem:[%s6680_s21 + $0xf70] sm:$0xff] }
 0x126   : > { %2725 = vmatmul.mubr.f32.vlgmr.msra.gmra.mrb[56].mxu1 %v388_v34  ;;  %v4367_v53 = vpop.f32.mrb[7].mxu1  ;;  %v4454_v54 = vpop.f32.mrb[6].mxu0  ;;  %v569_v34 = vld [vmem:[%s8573_s3 + $0x678] sm:$0xff]  ;;  %v6173_v51 = vpack.c.bf16 %v1179_v42, %v1178_v39  ;;  %v1182_v9 = vld [vmem:[%s6680_s21 + $0x1260] sm:$0xff] }
 0x127   : > { %6062 = vmatpush3.bf16.msra.mxu1 %v6061_v35  ;;  %2980 = vmatmul.mubr.f32.vlgmr.msra.gmra.mrb[56].mxu0 %v394_v36  ;;  %v7589_v58 = vadd.f32 %v4367_v53, %v4366_v50  ;;  %v4455_v59 = vpop.f32.mrb[7].mxu0  ;;  %v6169_v35 = vpack.c.bf16 %v1177_v25, %v1176_v22  ;;  %v6075_v36 = vpack.c.bf16 %v1099_v27, %v1098_v26  ;;  %v399_v50 = vld [vmem:[%s8573_s3 + $0x128] sm:$0xff]  ;;  %v1084_v53 = vld [vmem:[%s6680_s21 + $0xf50] sm:$0xff]  ;;  %v1530_v25 = vpop.permute.xlu0 %1529 }
 0x128   : > { %6158 = vmatpush3.bf16.msra.mxu0 %v6157_v40  ;;  %2729 = vmatprep.mubr.f32.mxu1 %v447_v37  ;;  %v7597_v5 = vadd.f32 %v4455_v59, %v4454_v54  ;;  %v1083_v37 = vld [vmem:[%s6680_s21 + $0xf48] sm:$0xff]  ;;  %v393_v40 = vld [vmem:[%s8573_s3 + $0xf8] sm:$0xff]  ;;  %v1102_v59 = vld [vmem:[%s6680_s21 + $0xfe0] sm:$0xff]  ;;  %v1627_v42 = vadd.f32 %v7550_v17, %v1530_v25 }
 0x129   : > { %6064 = vmatprep.subr.bf16.mxu1 %v6063_v45  ;;  %6160 = vmatprep.subr.bf16.mxu0 %v6159_v46  ;;  %v1101_v45 = vld [vmem:[%s6680_s21 + $0xfd8] sm:$0xff]  ;;  %v1196_v46 = vld [vmem:[%s6680_s21 + $0x12d0] sm:$0xff]  ;;  %v6077_v49 = vpack.c.bf16 %v1083_v37, %v1082_v33  ;;  %v1535_v37 = vpop.permute.xlu1 %1534 }
 0x12a   : > { %2730 = vmatmul.mubr.f32.gmra.mrb[58].mxu1 %v446_v55  ;;  %2984 = vmatprep.mubr.f32.mxu0 %v453_v60  ;;  %v6079_v52 = vpack.c.bf16 %v1101_v45, %v1100_v43  ;;  %v1085_v54 = vld [vmem:[%s6680_s21 + $0xf58] sm:$0xff]  ;;  %v1180_v55 = vld [vmem:[%s6680_s21 + $0x1250] sm:$0xff]  ;;  %v1103_v60 = vld [vmem:[%s6680_s21 + $0xfe8] sm:$0xff] }
 0x12b   : > { %6066 = vmatpush3.bf16.msra.mxu1 %v6065_v56  ;;  %2734 = vmatprep.mubr.f32.mxu1 %v505_v57  ;;  %v6175_v56 = vpack.c.bf16 %v1197_v47, %v1196_v46  ;;  %v1181_v57 = vld [vmem:[%s6680_s21 + $0x1258] sm:$0xff]  ;;  %v6081_v1 = vpack.c.bf16 %v1085_v54, %v1084_v53  ;;  %v1234_v54 = vld [vmem:[%s6680_s21 + $0x1400] sm:$0xff] }
 0x12c   : > { %6162 = vmatpush3.bf16.msra.mxu0 %v6161_v62  ;;  %6068 = vmatprep.subr.bf16.mxu1 %v6067_v63  ;;  %v1198_v62 = vld [vmem:[%s6680_s21 + $0x12e0] sm:$0xff]  ;;  %v1199_v63 = vld [vmem:[%s6680_s21 + $0x12e8] sm:$0xff]  ;;  %v6177_v4 = vpack.c.bf16 %v1181_v57, %v1180_v55 }
 0x12d   : > { %6164 = vmatprep.subr.bf16.mxu0 %v6163_v6  ;;  %2985 = vmatmul.mubr.f32.gmra.mrb[58].mxu0 %v452_v12  ;;  %v6083_v6 = vpack.c.bf16 %v1103_v60, %v1102_v59  ;;  %v6179_v11 = vpack.c.bf16 %v1199_v63, %v1198_v62  ;;  %v1183_v12 = vld [vmem:[%s6680_s21 + $0x1268] sm:$0xff]  ;;  %v1157_v59 = vld [vmem:[%s6680_s21 + $0x1198] sm:$0xff]  ;;  %v1252_v60 = vld [vmem:[%s6680_s21 + $0x1490] sm:$0xff] }
 0x12e   : > { %2735 = vmatmul.mubr.f32.gmra.mrb[60].mxu1 %v504_v13  ;;  %2989 = vmatprep.mubr.f32.mxu0 %v511_v16  ;;  %v1104_v13 = vld [vmem:[%s6680_s21 + $0xff0] sm:$0xff]  ;;  %v6181_v27 = vpack.c.bf16 %v1183_v12, %v1182_v9  ;;  %v1235_v55 = vld [vmem:[%s6680_s21 + $0x1408] sm:$0xff]  ;;  %v1253_v62 = vld [vmem:[%s6680_s21 + $0x1498] sm:$0xff] }
 0x12f   : > { %6070 = vmatpush3.bf16.msra.mxu1 %v6069_v14  ;;  %2739 = vmatprep.mubr.f32.mxu1 %v563_v15  ;;  %v1105_v14 = vld [vmem:[%s6680_s21 + $0xff8] sm:$0xff]  ;;  %v451_v12 = vld [vmem:[%s8573_s3 + $0x2c8] sm:$0xff] }
 0x130   : > { %6166 = vmatpush3.bf16.msra.mxu0 %v6165_v18  ;;  %6072 = vmatprep.subr.bf16.mxu1 %v6071_v19  ;;  %v1200_v18 = vld [vmem:[%s6680_s21 + $0x12f0] sm:$0xff]  ;;  %v1201_v19 = vld [vmem:[%s6680_s21 + $0x12f8] sm:$0xff]  ;;  %v6087_v28 = vpack.c.bf16 %v1105_v14, %v1104_v13 }
 0x131   : > { %6168 = vmatprep.subr.bf16.mxu0 %v6167_v24  ;;  %2990 = vmatmul.mubr.f32.gmra.mrb[60].mxu0 %v510_v30  ;;  %v6085_v24 = vpack.c.bf16 %v1087_v8, %v1086_v7  ;;  %v1089_v30 = vld [vmem:[%s6680_s21 + $0xf78] sm:$0xff]  ;;  %v6183_v33 = vpack.c.bf16 %v1201_v19, %v1200_v18  ;;  %v1140_v7 = vld [vmem:[%s6680_s21 + $0x1110] sm:$0xff]  ;;  %v6223_v18 = vpack.c.bf16 %v1253_v62, %v1252_v60 }
 0x132   : > { %2740 = vmatmul.mubr.f32.gmra.mrb[62].mxu1 %v562_v31  ;;  %2994 = vmatprep.mubr.f32.mxu0 %v569_v34  ;;  %v1184_v31 = vld [vmem:[%s6680_s21 + $0x1270] sm:$0xff]  ;;  %v1185_v34 = vld [vmem:[%s6680_s21 + $0x1278] sm:$0xff]  ;;  %v6089_v45 = vpack.c.bf16 %v1089_v30, %v1088_v29 }
 0x133   : > { %6074 = vmatpush3.bf16.msra.mxu1 %v6073_v32  ;;  %2894 = vmatprep.mubr.f32.mxu1 %v393_v40  ;;  %v1250_v40 = vld [vmem:[%s6680_s21 + $0x1480] sm:$0xff]  ;;  %v6185_v47 = vpack.c.bf16 %v1185_v34, %v1184_v31  ;;  %v1141_v8 = vld [vmem:[%s6680_s21 + $0x1118] sm:$0xff]  ;;  %v1236_v13 = vld [vmem:[%s6680_s21 + $0x1410] sm:$0xff] }
 0x134   : > { %6170 = vmatpush3.bf16.msra.mxu0 %v6169_v35  ;;  %6076 = vmatprep.subr.bf16.mxu1 %v6075_v36  ;;  %v1154_v35 = vld [vmem:[%s6680_s21 + $0x1180] sm:$0xff]  ;;  %v1155_v36 = vld [vmem:[%s6680_s21 + $0x1188] sm:$0xff]  ;;  %v1237_v19 = vld [vmem:[%s6680_s21 + $0x1418] sm:$0xff]  ;;  %v6129_v25 = vpack.c.bf16 %v1141_v8, %v1140_v7 }
 0x135   : > { %6172 = vmatprep.subr.bf16.mxu0 %v6171_v41  ;;  %2995 = vmatmul.mubr.f32.gmra.mrb[62].mxu0 %v568_v48  ;;  %v1251_v41 = vld [vmem:[%s6680_s21 + $0x1488] sm:$0xff]  ;;  %v6123_v48 = vpack.c.bf16 %v1155_v36, %v1154_v35  ;;  %v6225_v34 = vpack.c.bf16 %v1237_v19, %v1236_v13  ;;  %v1142_v36 = vld [vmem:[%s6680_s21 + $0x1120] sm:$0xff]  ;;  %v1240_v60 = vld [vmem:[%s6680_s21 + $0x1430] sm:$0xff] }
 0x136   : > { %3149 = vmatprep.mubr.f32.mxu0 %v399_v50  ;;  %v1139_v50 = vld [vmem:[%s6680_s21 + $0x1108] sm:$0xff]  ;;  %v6219_v53 = vpack.c.bf16 %v1251_v41, %v1250_v40  ;;  %v514_v7 = vld [vmem:[%s8573_s3 + $0x4c0] sm:$0xff]  ;;  %v1164_v19 = vld [vmem:[%s6680_s21 + $0x11d0] sm:$0xff] }
 0x137   : > { %6078 = vmatpush3.bf16.msra.mxu1 %v6077_v49  ;;  %v1138_v49 = vld [vmem:[%s6680_s21 + $0x1100] sm:$0xff] }
 0x138   : > { %6174 = vmatpush3.bf16.msra.mxu0 %v6173_v51  ;;  %6080 = vmatprep.subr.bf16.mxu1 %v6079_v52  ;;  %v566_v8 = vld [vmem:[%s8573_s3 + $0x660] sm:$0xff] }
 0x139   : > { %v4401_v10 = vpop.f32.mrb[8].mxu1  ;;  %6176 = vmatprep.subr.bf16.mxu0 %v6175_v56 }
 0x13a   : > { %v4402_v15 = vpop.f32.mrb[9].mxu1  ;;  %v4533_v16 = vpop.f32.mrb[8].mxu0 }
 0x13b   : > { %v4403_v21 = vadd.f32 %v4402_v15, %v4401_v10  ;;  %6082 = vmatpush3.bf16.msra.mxu1 %v6081_v1  ;;  %v4534_v22 = vpop.f32.mrb[9].mxu0  ;;  %v1632_v1 = vadd.f32 %v7571_v38, %v1535_v37  ;;  %v1540_v10 = vpop.permute.xlu1 %1539  ;;  %v398_v38 = vld [vmem:[%s8573_s3 + $0x120] sm:$0xff]  ;;  %v1143_v37 = vld [vmem:[%s6680_s21 + $0x1128] sm:$0xff] }
 0x13c   : > { %6178 = vmatpush3.bf16.msra.mxu0 %v6177_v4  ;;  %v7667_v26 = vadd.f32 %v4534_v22, %v4533_v16  ;;  %6084 = vmatprep.subr.bf16.mxu1 %v6083_v6  ;;  %v392_v4 = vld [vmem:[%s8573_s3 + $0xf0] sm:$0xff]  ;;  %v6125_v6 = vpack.c.bf16 %v1139_v50, %v1138_v49  ;;  %v1637_v30 = vadd.f32 %v7589_v58, %v1540_v10  ;;  %v1257_v49 = vld [vmem:[%s6680_s21 + $0x14b8] sm:$0xff] }
 0x13d   : > { %v1707_v61 = vadd.f32 %v4403_v21, %v1622_v20  ;;  %v4404_v32 = vpop.f32.mrb[10].mxu1  ;;  %6180 = vmatprep.subr.bf16.mxu0 %v6179_v11  ;;  %v6221_v11 = vpack.c.bf16 %v1235_v55, %v1234_v54  ;;  %v1158_v20 = vld [vmem:[%s6680_s21 + $0x11a0] sm:$0xff]  ;;  %v1159_v21 = vld [vmem:[%s6680_s21 + $0x11a8] sm:$0xff] }
 0x13e   : > { %v4405_v39 = vpop.f32.mrb[11].mxu1  ;;  %v6131_v35 = vpack.c.bf16 %v1159_v21, %v1158_v20  ;;  %v515_v54 = vld [vmem:[%s8573_s3 + $0x4c8] sm:$0xff]  ;;  %v1165_v20 = vld [vmem:[%s6680_s21 + $0x11d8] sm:$0xff]  ;;  %v1260_v21 = vld [vmem:[%s6680_s21 + $0x14d0] sm:$0xff] }
 0x13f   : > { %v4406_v43 = vadd.f32 %v4405_v39, %v4404_v32  ;;  %6086 = vmatpush3.bf16.msra.mxu1 %v6085_v24  ;;  %v7679_v46 = vadd.f32 %v7540_v0, %v1707_v61  ;;  %v1156_v0 = vld [vmem:[%s6680_s21 + $0x1190] sm:$0xff]  ;;  %v450_v61 = vld [vmem:[%s8573_s3 + $0x2c0] sm:$0xff]  ;;  %v509_v32 = vld [vmem:[%s8573_s3 + $0x498] sm:$0xff] }
 0x140   : > { %6182 = vmatpush3.bf16.msra.mxu0 %v6181_v27  ;;  %6088 = vmatprep.subr.bf16.mxu1 %v6087_v28  ;;  %v4536_v51 = vpop.f32.mrb[10].mxu0  ;;  %v6127_v16 = vpack.c.bf16 %v1157_v59, %v1156_v0  ;;  %v1254_v27 = vld [vmem:[%s6680_s21 + $0x14a0] sm:$0xff]  ;;  %v1255_v28 = vld [vmem:[%s6680_s21 + $0x14a8] sm:$0xff]  ;;  %v1145_v59 = vld [vmem:[%s6680_s21 + $0x1138] sm:$0xff] }
 0x141   : > { %v1712_v17 = vadd.f32 %v4406_v43, %v1627_v42  ;;  %v4407_v52 = vpop.f32.mrb[12].mxu1  ;;  %6184 = vmatprep.subr.bf16.mxu0 %v6183_v33  ;;  %v4537_v56 = vpop.f32.mrb[11].mxu0  ;;  %v457_v33 = vld [vmem:[%s8573_s3 + $0x2f8] sm:$0xff]  ;;  %v1238_v39 = vld [vmem:[%s6680_s21 + $0x1420] sm:$0xff]  ;;  %v6227_v42 = vpack.c.bf16 %v1255_v28, %v1254_v27  ;;  %v1239_v43 = vld [vmem:[%s6680_s21 + $0x1428] sm:$0xff] }
 0x142   : > { %v4408_v57 = vpop.f32.mrb[13].mxu1  ;;  %v7689_v63 = vadd.f32 %v4537_v56, %v4536_v51  ;;  %v456_v51 = vld [vmem:[%s8573_s3 + $0x2f0] sm:$0xff]  ;;  %v6229_v0 = vpack.c.bf16 %v1239_v43, %v1238_v39  ;;  %v403_v27 = vld [vmem:[%s8573_s3 + $0x148] sm:$0xff]  ;;  %v1150_v43 = vld [vmem:[%s6680_s21 + $0x1160] sm:$0xff] }
 0x143   : > { %v4409_v3 = vadd.f32 %v4408_v57, %v4407_v52  ;;  %6090 = vmatpush3.bf16.msra.mxu1 %v6089_v45  ;;  %v7698_v9 = vadd.f32 %v7554_v23, %v1712_v17  ;;  %v1160_v45 = vld [vmem:[%s6680_s21 + $0x11b0] sm:$0xff]  ;;  %v6133_v52 = vpack.c.bf16 %v1143_v37, %v1142_v36  ;;  %v1167_v36 = vld [vmem:[%s6680_s21 + $0x11e8] sm:$0xff]  ;;  %v1262_v37 = vld [vmem:[%s6680_s21 + $0x14e0] sm:$0xff] }
 0x144   : > { %6186 = vmatpush3.bf16.msra.mxu0 %v6185_v47  ;;  %6124 = vmatprep.subr.bf16.mxu1 %v6123_v48  ;;  %v4539_v14 = vpop.f32.mrb[12].mxu0  ;;  %v1161_v47 = vld [vmem:[%s6680_s21 + $0x11b8] sm:$0xff]  ;;  %v508_v17 = vld [vmem:[%s8573_s3 + $0x490] sm:$0xff]  ;;  %v1263_v39 = vld [vmem:[%s6680_s21 + $0x14e8] sm:$0xff] }
 0x145   : > { %v1717_v15 = vadd.f32 %v4409_v3, %v1632_v1  ;;  %v4410_v23 = vpop.f32.mrb[14].mxu1  ;;  %6220 = vmatprep.subr.bf16.mxu0 %v6219_v53  ;;  %v4540_v22 = vpop.f32.mrb[13].mxu0  ;;  %v567_v53 = vld [vmem:[%s8573_s3 + $0x668] sm:$0xff]  ;;  %v6135_v56 = vpack.c.bf16 %v1161_v47, %v1160_v45  ;;  %v1144_v57 = vld [vmem:[%s6680_s21 + $0x1130] sm:$0xff]  ;;  %v1241_v1 = vld [vmem:[%s6680_s21 + $0x1438] sm:$0xff] }
 0x146   : > { %v4411_v24 = vpop.f32.mrb[15].mxu1  ;;  %2895 = vmatmul.mubr.f32.vlgmr.msra.gmra.mrb[64].mxu1 %v392_v4  ;;  %v7712_v29 = vadd.f32 %v4540_v22, %v4539_v14  ;;  %v1162_v3 = vld [vmem:[%s6680_s21 + $0x11c0] sm:$0xff]  ;;  %v1163_v4 = vld [vmem:[%s6680_s21 + $0x11c8] sm:$0xff]  ;;  %v6137_v10 = vpack.c.bf16 %v1145_v59, %v1144_v57  ;;  %v1261_v22 = vld [vmem:[%s6680_s21 + $0x14d8] sm:$0xff] }
 0x147   : > { %v4412_v31 = vadd.f32 %v4411_v24, %v4410_v23  ;;  %6126 = vmatpush3.bf16.msra.mxu1 %v6125_v6  ;;  %3150 = vmatmul.mubr.f32.vlgmr.msra.gmra.mrb[64].mxu0 %v398_v38  ;;  %v7725_v58 = vadd.f32 %v7576_v44, %v1717_v15  ;;  %v1256_v44 = vld [vmem:[%s6680_s21 + $0x14b0] sm:$0xff]  ;;  %v1259_v6 = vld [vmem:[%s6680_s21 + $0x14c8] sm:$0xff]  ;;  %v1146_v38 = vld [vmem:[%s6680_s21 + $0x1140] sm:$0xff]  ;;  %v6139_v13 = vpack.c.bf16 %v1163_v4, %v1162_v3 }
 0x148   : > { %6222 = vmatpush3.bf16.msra.mxu0 %v6221_v11  ;;  %2899 = vmatprep.mubr.f32.mxu1 %v451_v12  ;;  %v4542_v40 = vpop.f32.mrb[14].mxu0  ;;  %v6231_v62 = vpack.c.bf16 %v1257_v49, %v1256_v44  ;;  %v573_v11 = vld [vmem:[%s8573_s3 + $0x698] sm:$0xff]  ;;  %v6233_v12 = vpack.c.bf16 %v1241_v1, %v1240_v60  ;;  %v1147_v14 = vld [vmem:[%s6680_s21 + $0x1148] sm:$0xff]  ;;  %v1242_v15 = vld [vmem:[%s6680_s21 + $0x1440] sm:$0xff]  ;;  %v6243_v44 = vpack.c.bf16 %v1263_v39, %v1262_v37 }
 0x149   : > { %v1722_v41 = vadd.f32 %v4412_v31, %v1637_v30  ;;  %6128 = vmatprep.subr.bf16.mxu1 %v6127_v16  ;;  %6224 = vmatprep.subr.bf16.mxu0 %v6223_v18  ;;  %v4543_v48 = vpop.f32.mrb[15].mxu0  ;;  %v397_v23 = vld [vmem:[%s8573_s3 + $0x118] sm:$0xff]  ;;  %v1243_v18 = vld [vmem:[%s6680_s21 + $0x1448] sm:$0xff]  ;;  %v572_v24 = vld [vmem:[%s8573_s3 + $0x690] sm:$0xff]  ;;  %v6143_v30 = vpack.c.bf16 %v1165_v20, %v1164_v19 }
 0x14a   : > { %2900 = vmatmul.mubr.f32.gmra.mrb[66].mxu1 %v450_v61  ;;  %v7735_v50 = vadd.f32 %v4543_v48, %v4542_v40  ;;  %3154 = vmatprep.mubr.f32.mxu0 %v457_v33  ;;  %v6237_v28 = vpack.c.bf16 %v1243_v18, %v1242_v15  ;;  %v1148_v31 = vld [vmem:[%s6680_s21 + $0x1150] sm:$0xff]  ;;  %v1149_v61 = vld [vmem:[%s6680_s21 + $0x1158] sm:$0xff]  ;;  %v6239_v33 = vpack.c.bf16 %v1261_v22, %v1260_v21  ;;  %v1151_v45 = vld [vmem:[%s6680_s21 + $0x1168] sm:$0xff] }
 0x14b   : > { %6130 = vmatpush3.bf16.msra.mxu1 %v6129_v25  ;;  %2904 = vmatprep.mubr.f32.mxu1 %v509_v32  ;;  %v7750_v55 = vadd.f32 %v7597_v5, %v1722_v41  ;;  %v1258_v5 = vld [vmem:[%s6680_s21 + $0x14c0] sm:$0xff]  ;;  %v6141_v25 = vpack.c.bf16 %v1147_v14, %v1146_v38  ;;  %v1244_v32 = vld [vmem:[%s6680_s21 + $0x1450] sm:$0xff]  ;;  %v6145_v40 = vpack.c.bf16 %v1149_v61, %v1148_v31  ;;  %v1247_v49 = vld [vmem:[%s6680_s21 + $0x1468] sm:$0xff] }
 0x14c   : > { %6226 = vmatpush3.bf16.msra.mxu0 %v6225_v34  ;;  %6132 = vmatprep.subr.bf16.mxu1 %v6131_v35  ;;  %v6235_v16 = vpack.c.bf16 %v1259_v6, %v1258_v5  ;;  %v1245_v34 = vld [vmem:[%s6680_s21 + $0x1458] sm:$0xff]  ;;  %v1166_v35 = vld [vmem:[%s6680_s21 + $0x11e0] sm:$0xff]  ;;  %v6149_v59 = vpack.c.bf16 %v1151_v45, %v1150_v43  ;;  %v1152_v3 = vld [vmem:[%s6680_s21 + $0x1170] sm:$0xff] }
 0x14d   : > { %6228 = vmatprep.subr.bf16.mxu0 %v6227_v42  ;;  %3155 = vmatmul.mubr.f32.gmra.mrb[66].mxu0 %v456_v51  ;;  %v6241_v41 = vpack.c.bf16 %v1245_v34, %v1244_v32  ;;  %v6147_v42 = vpack.c.bf16 %v1167_v36, %v1166_v35  ;;  %v1246_v47 = vld [vmem:[%s6680_s21 + $0x1460] sm:$0xff]  ;;  %v1168_v51 = vld [vmem:[%s6680_s21 + $0x11f0] sm:$0xff]  ;;  %v1153_v4 = vld [vmem:[%s6680_s21 + $0x1178] sm:$0xff] }
 0x14e   : > { %2905 = vmatmul.mubr.f32.gmra.mrb[68].mxu1 %v508_v17  ;;  %3159 = vmatprep.mubr.f32.mxu0 %v515_v54  ;;  %v1169_v17 = vld [vmem:[%s6680_s21 + $0x11f8] sm:$0xff]  ;;  %v1264_v54 = vld [vmem:[%s6680_s21 + $0x14f0] sm:$0xff]  ;;  %v1218_v38 = vld [vmem:[%s6680_s21 + $0x1380] sm:$0xff] }
 0x14f   : > { %6134 = vmatpush3.bf16.msra.mxu1 %v6133_v52  ;;  %2909 = vmatprep.mubr.f32.mxu1 %v567_v53  ;;  %v6151_v1 = vpack.c.bf16 %v1169_v17, %v1168_v51  ;;  %v1248_v5 = vld [vmem:[%s6680_s21 + $0x1470] sm:$0xff]  ;;  %v1315_v14 = vld [vmem:[%s6680_s21 + $0x1688] sm:$0xff]  ;;  %v1202_v19 = vld [vmem:[%s6680_s21 + $0x1300] sm:$0xff] }
 0x150   : > { %6230 = vmatpush3.bf16.msra.mxu0 %v6229_v0  ;;  %6136 = vmatprep.subr.bf16.mxu1 %v6135_v56  ;;  %v1265_v0 = vld [vmem:[%s6680_s21 + $0x14f8] sm:$0xff]  ;;  %v1203_v20 = vld [vmem:[%s6680_s21 + $0x1308] sm:$0xff]  ;;  %v1316_v32 = vld [vmem:[%s6680_s21 + $0x1690] sm:$0xff] }
 0x151   : > { %6232 = vmatprep.subr.bf16.mxu0 %v6231_v62  ;;  %3160 = vmatmul.mubr.f32.gmra.mrb[68].mxu0 %v514_v7  ;;  %v6245_v62 = vpack.c.bf16 %v1247_v49, %v1246_v47  ;;  %v1221_v61 = vld [vmem:[%s6680_s21 + $0x1398] sm:$0xff]  ;;  %v6189_v36 = vpack.c.bf16 %v1203_v20, %v1202_v19  ;;  %v402_v37 = vld [vmem:[%s8573_s3 + $0x140] sm:$0xff]  ;;  %v455_v39 = vld [vmem:[%s8573_s3 + $0x2e8] sm:$0xff] }
 0x152   : > { %2910 = vmatmul.mubr.f32.gmra.mrb[70].mxu1 %v566_v8  ;;  %3164 = vmatprep.mubr.f32.mxu0 %v573_v11  ;;  %v6247_v8 = vpack.c.bf16 %v1265_v0, %v1264_v54  ;;  %v1219_v11 = vld [vmem:[%s6680_s21 + $0x1388] sm:$0xff]  ;;  %v1205_v43 = vld [vmem:[%s6680_s21 + $0x1318] sm:$0xff]  ;;  %v1300_v45 = vld [vmem:[%s6680_s21 + $0x1610] sm:$0xff] }
 0x153   : > { %6138 = vmatpush3.bf16.msra.mxu1 %v6137_v10  ;;  %3064 = vmatprep.mubr.f32.mxu1 %v397_v23  ;;  %v1249_v10 = vld [vmem:[%s6680_s21 + $0x1478] sm:$0xff]  ;;  %v6153_v23 = vpack.c.bf16 %v1153_v4, %v1152_v3  ;;  %v6187_v18 = vpack.c.bf16 %v1219_v11, %v1218_v38  ;;  %v1318_v0 = vld [vmem:[%s6680_s21 + $0x16a0] sm:$0xff]  ;;  %v512_v19 = vld [vmem:[%s8573_s3 + $0x4b0] sm:$0xff] }
 0x154   : > { %6234 = vmatpush3.bf16.msra.mxu0 %v6233_v12  ;;  %6140 = vmatprep.subr.bf16.mxu1 %v6139_v13  ;;  %v1314_v13 = vld [vmem:[%s6680_s21 + $0x1680] sm:$0xff]  ;;  %v1301_v17 = vld [vmem:[%s6680_s21 + $0x1618] sm:$0xff] }
 0x155   : > { %6236 = vmatprep.subr.bf16.mxu0 %v6235_v16  ;;  %3165 = vmatmul.mubr.f32.gmra.mrb[70].mxu0 %v572_v24  ;;  %v461_v3 = vld [vmem:[%s8573_s3 + $0x318] sm:$0xff] }
 0x156   : > { %3319 = vmatprep.mubr.f32.mxu0 %v403_v27  ;;  %v1298_v27 = vld [vmem:[%s6680_s21 + $0x1600] sm:$0xff] }
 0x157   : > { %6142 = vmatpush3.bf16.msra.mxu1 %v6141_v25  ;;  %v6283_v25 = vpack.c.bf16 %v1315_v14, %v1314_v13  ;;  %v1303_v13 = vld [vmem:[%s6680_s21 + $0x1628] sm:$0xff]  ;;  %v1224_v14 = vld [vmem:[%s6680_s21 + $0x13b0] sm:$0xff] }
 0x158   : > { %6238 = vmatpush3.bf16.msra.mxu0 %v6237_v28  ;;  %6144 = vmatprep.subr.bf16.mxu1 %v6143_v30  ;;  %v1299_v28 = vld [vmem:[%s6680_s21 + $0x1608] sm:$0xff]  ;;  %v1220_v30 = vld [vmem:[%s6680_s21 + $0x1390] sm:$0xff] }
 0x159   : > { %v4489_v48 = vpop.f32.mrb[16].mxu1  ;;  %6240 = vmatprep.subr.bf16.mxu0 %v6239_v33  ;;  %v1317_v33 = vld [vmem:[%s6680_s21 + $0x1698] sm:$0xff]  ;;  %v6191_v49 = vpack.c.bf16 %v1221_v61, %v1220_v30 }
 0x15a   : > { %v4490_v52 = vpop.f32.mrb[17].mxu1  ;;  %v4621_v53 = vpop.f32.mrb[16].mxu0  ;;  %v6287_v51 = vpack.c.bf16 %v1317_v33, %v1316_v32  ;;  %v1209_v30 = vld [vmem:[%s6680_s21 + $0x1338] sm:$0xff]  ;;  %v1226_v32 = vld [vmem:[%s6680_s21 + $0x13c0] sm:$0xff]  ;;  %v1227_v33 = vld [vmem:[%s6680_s21 + $0x13c8] sm:$0xff] }
 0x15b   : > { %v4491_v56 = vadd.f32 %v4490_v52, %v4489_v48  ;;  %6146 = vmatpush3.bf16.msra.mxu1 %v6145_v40  ;;  %v4622_v57 = vpop.f32.mrb[17].mxu0  ;;  %v1222_v52 = vld [vmem:[%s6680_s21 + $0x13a0] sm:$0xff]  ;;  %v1305_v61 = vld [vmem:[%s6680_s21 + $0x1638] sm:$0xff] }
 0x15c   : > { %6242 = vmatpush3.bf16.msra.mxu0 %v6241_v41  ;;  %v7802_v60 = vadd.f32 %v4622_v57, %v4621_v53  ;;  %6148 = vmatprep.subr.bf16.mxu1 %v6147_v42  ;;  %v6285_v41 = vpack.c.bf16 %v1299_v28, %v1298_v27  ;;  %v1204_v42 = vld [vmem:[%s6680_s21 + $0x1310] sm:$0xff]  ;;  %v1223_v53 = vld [vmem:[%s6680_s21 + $0x13a8] sm:$0xff] }
 0x15d   : > { %v1877_v6 = vadd.f32 %v4491_v56, %v7679_v46  ;;  %v4492_v7 = vpop.f32.mrb[18].mxu1  ;;  %6244 = vmatprep.subr.bf16.mxu0 %v6243_v44  ;;  %v6249_v46 = vpack.c.bf16 %v1249_v10, %v1248_v5  ;;  %v1319_v56 = vld [vmem:[%s6680_s21 + $0x16a8] sm:$0xff]  ;;  %v6289_v5 = vpack.c.bf16 %v1301_v17, %v1300_v45  ;;  %v1302_v10 = vld [vmem:[%s6680_s21 + $0x1620] sm:$0xff]  ;;  %v1208_v28 = vld [vmem:[%s6680_s21 + $0x1330] sm:$0xff] }
 0x15e   : > { %v4493_v12 = vpop.f32.mrb[19].mxu1  ;;  %v1211_v45 = vld [vmem:[%s6680_s21 + $0x1348] sm:$0xff]  ;;  %v1229_v17 = vld [vmem:[%s6680_s21 + $0x13d8] sm:$0xff] }
 0x15f   : > { %v4494_v15 = vadd.f32 %v4493_v12, %v4492_v7  ;;  %6150 = vmatpush3.bf16.msra.mxu1 %v6149_v59  ;;  %v7814_v16 = vadd.f32 %v7667_v26, %v1877_v6  ;;  %v6195_v6 = vpack.c.bf16 %v1223_v53, %v1222_v52  ;;  %v1206_v7 = vld [vmem:[%s6680_s21 + $0x1320] sm:$0xff]  ;;  %v6291_v12 = vpack.c.bf16 %v1319_v56, %v1318_v0  ;;  %v1324_v52 = vld [vmem:[%s6680_s21 + $0x16d0] sm:$0xff]  ;;  %v1325_v53 = vld [vmem:[%s6680_s21 + $0x16d8] sm:$0xff] }
 0x160   : > { %6246 = vmatpush3.bf16.msra.mxu0 %v6245_v62  ;;  %6152 = vmatprep.subr.bf16.mxu1 %v6151_v1  ;;  %v4624_v21 = vpop.f32.mrb[18].mxu0  ;;  %v6193_v62 = vpack.c.bf16 %v1205_v43, %v1204_v42  ;;  %v513_v1 = vld [vmem:[%s8573_s3 + $0x4b8] sm:$0xff]  ;;  %v6203_v43 = vpack.c.bf16 %v1227_v33, %v1226_v32  ;;  %v407_v0 = vld [vmem:[%s8573_s3 + $0x168] sm:$0xff]  ;;  %v1216_v32 = vld [vmem:[%s6680_s21 + $0x1370] sm:$0xff] }
 0x161   : > { %v1882_v22 = vadd.f32 %v4494_v15, %v7698_v9  ;;  %v4495_v24 = vpop.f32.mrb[20].mxu1  ;;  %6248 = vmatprep.subr.bf16.mxu0 %v6247_v8  ;;  %v4625_v26 = vpop.f32.mrb[19].mxu0  ;;  %v396_v9 = vld [vmem:[%s8573_s3 + $0x110] sm:$0xff]  ;;  %v1207_v8 = vld [vmem:[%s6680_s21 + $0x1328] sm:$0xff]  ;;  %v1225_v15 = vld [vmem:[%s6680_s21 + $0x13b8] sm:$0xff] }
 0x162   : > { %v4496_v31 = vpop.f32.mrb[21].mxu1  ;;  %v7825_v34 = vadd.f32 %v4625_v26, %v4624_v21  ;;  %v6197_v20 = vpack.c.bf16 %v1207_v8, %v1206_v7  ;;  %v571_v21 = vld [vmem:[%s8573_s3 + $0x688] sm:$0xff]  ;;  %v6199_v27 = vpack.c.bf16 %v1225_v15, %v1224_v14  ;;  %v1304_v26 = vld [vmem:[%s6680_s21 + $0x1630] sm:$0xff]  ;;  %v1326_v8 = vld [vmem:[%s6680_s21 + $0x16e0] sm:$0xff] }
 0x163   : > { %v4497_v35 = vadd.f32 %v4496_v31, %v4495_v24  ;;  %6154 = vmatpush3.bf16.msra.mxu1 %v6153_v23  ;;  %v7837_v40 = vadd.f32 %v7689_v63, %v1882_v22  ;;  %v1320_v23 = vld [vmem:[%s6680_s21 + $0x16b0] sm:$0xff]  ;;  %v519_v22 = vld [vmem:[%s8573_s3 + $0x4e8] sm:$0xff]  ;;  %v6297_v42 = vpack.c.bf16 %v1305_v61, %v1304_v26  ;;  %v1310_v15 = vld [vmem:[%s6680_s21 + $0x1660] sm:$0xff] }
 0x164   : > { %6250 = vmatpush3.bf16.msra.mxu0 %v6249_v46  ;;  %6188 = vmatprep.subr.bf16.mxu1 %v6187_v18  ;;  %v4627_v47 = vpop.f32.mrb[20].mxu0  ;;  %v1321_v46 = vld [vmem:[%s6680_s21 + $0x16b8] sm:$0xff]  ;;  %v1231_v7 = vld [vmem:[%s6680_s21 + $0x13e8] sm:$0xff] }
 0x165   : > { %v1887_v48 = vadd.f32 %v4497_v35, %v7725_v58  ;;  %v4498_v44 = vpop.f32.mrb[22].mxu1  ;;  %6284 = vmatprep.subr.bf16.mxu0 %v6283_v25  ;;  %v4628_v63 = vpop.f32.mrb[21].mxu0  ;;  %v454_v58 = vld [vmem:[%s8573_s3 + $0x2e0] sm:$0xff]  ;;  %v6293_v25 = vpack.c.bf16 %v1303_v13, %v1302_v10  ;;  %v6295_v31 = vpack.c.bf16 %v1321_v46, %v1320_v23  ;;  %v1323_v35 = vld [vmem:[%s6680_s21 + $0x16c8] sm:$0xff]  ;;  %v1217_v33 = vld [vmem:[%s6680_s21 + $0x1378] sm:$0xff] }
 0x166   : > { %v4499_v54 = vpop.f32.mrb[23].mxu1  ;;  %3065 = vmatmul.mubr.f32.vlgmr.msra.gmra.mrb[72].mxu1 %v396_v9  ;;  %v7848_v57 = vadd.f32 %v4628_v63, %v4627_v47  ;;  %v518_v9 = vld [vmem:[%s8573_s3 + $0x4e0] sm:$0xff]  ;;  %v576_v63 = vld [vmem:[%s8573_s3 + $0x6b0] sm:$0xff]  ;;  %v1327_v10 = vld [vmem:[%s6680_s21 + $0x16e8] sm:$0xff] }
 0x167   : > { %v4500_v59 = vadd.f32 %v4499_v54, %v4498_v44  ;;  %6190 = vmatpush3.bf16.msra.mxu1 %v6189_v36  ;;  %3320 = vmatmul.mubr.f32.vlgmr.msra.gmra.mrb[72].mxu0 %v402_v37  ;;  %v7860_v4 = vadd.f32 %v7712_v29, %v1887_v48  ;;  %v570_v36 = vld [vmem:[%s8573_s3 + $0x680] sm:$0xff]  ;;  %v6201_v37 = vpack.c.bf16 %v1209_v30, %v1208_v28  ;;  %v401_v48 = vld [vmem:[%s8573_s3 + $0x138] sm:$0xff]  ;;  %v1215_v14 = vld [vmem:[%s6680_s21 + $0x1368] sm:$0xff] }
 0x168   : > { %6286 = vmatpush3.bf16.msra.mxu0 %v6285_v41  ;;  %3069 = vmatprep.mubr.f32.mxu1 %v455_v39  ;;  %v4630_v38 = vpop.f32.mrb[22].mxu0  ;;  %v1210_v39 = vld [vmem:[%s6680_s21 + $0x1340] sm:$0xff]  ;;  %v577_v41 = vld [vmem:[%s8573_s3 + $0x6b8] sm:$0xff]  ;;  %v6307_v23 = vpack.c.bf16 %v1327_v10, %v1326_v8  ;;  %v1311_v46 = vld [vmem:[%s6680_s21 + $0x1668] sm:$0xff] }
 0x169   : > { %v1892_v11 = vadd.f32 %v4500_v59, %v7750_v55  ;;  %6192 = vmatprep.subr.bf16.mxu1 %v6191_v49  ;;  %6288 = vmatprep.subr.bf16.mxu0 %v6287_v51  ;;  %v4631_v29 = vpop.f32.mrb[23].mxu0  ;;  %v460_v55 = vld [vmem:[%s8573_s3 + $0x310] sm:$0xff]  ;;  %v1306_v47 = vld [vmem:[%s6680_s21 + $0x1640] sm:$0xff]  ;;  %v1307_v49 = vld [vmem:[%s6680_s21 + $0x1648] sm:$0xff]  ;;  %v6205_v54 = vpack.c.bf16 %v1211_v45, %v1210_v39 }
 0x16a   : > { %3070 = vmatmul.mubr.f32.gmra.mrb[74].mxu1 %v454_v58  ;;  %v7871_v18 = vadd.f32 %v4631_v29, %v4630_v38  ;;  %3324 = vmatprep.mubr.f32.mxu0 %v461_v3  ;;  %v1228_v51 = vld [vmem:[%s6680_s21 + $0x13d0] sm:$0xff]  ;;  %v6301_v56 = vpack.c.bf16 %v1307_v49, %v1306_v47  ;;  %v6303_v3 = vpack.c.bf16 %v1325_v53, %v1324_v52  ;;  %v1214_v13 = vld [vmem:[%s6680_s21 + $0x1360] sm:$0xff]  ;;  %v1379_v45 = vld [vmem:[%s6680_s21 + $0x1888] sm:$0xff] }
 0x16b   : > { %6194 = vmatpush3.bf16.msra.mxu1 %v6193_v62  ;;  %3074 = vmatprep.mubr.f32.mxu1 %v513_v1  ;;  %v7886_v24 = vadd.f32 %v7735_v50, %v1892_v11  ;;  %v1322_v50 = vld [vmem:[%s6680_s21 + $0x16c0] sm:$0xff]  ;;  %v6207_v59 = vpack.c.bf16 %v1229_v17, %v1228_v51  ;;  %v1212_v58 = vld [vmem:[%s6680_s21 + $0x1350] sm:$0xff]  ;;  %v1213_v62 = vld [vmem:[%s6680_s21 + $0x1358] sm:$0xff]  ;;  %v6213_v30 = vpack.c.bf16 %v1215_v14, %v1214_v13 }
 0x16c   : > { %6290 = vmatpush3.bf16.msra.mxu0 %v6289_v5  ;;  %6196 = vmatprep.subr.bf16.mxu1 %v6195_v6  ;;  %v6299_v44 = vpack.c.bf16 %v1323_v35, %v1322_v50  ;;  %v1308_v1 = vld [vmem:[%s6680_s21 + $0x1650] sm:$0xff]  ;;  %v1309_v5 = vld [vmem:[%s6680_s21 + $0x1658] sm:$0xff]  ;;  %v1230_v6 = vld [vmem:[%s6680_s21 + $0x13e0] sm:$0xff]  ;;  %v6209_v38 = vpack.c.bf16 %v1213_v62, %v1212_v58 }
 0x16d   : > { %6292 = vmatprep.subr.bf16.mxu0 %v6291_v12  ;;  %3325 = vmatmul.mubr.f32.gmra.mrb[74].mxu0 %v460_v55  ;;  %v6305_v11 = vpack.c.bf16 %v1309_v5, %v1308_v1  ;;  %v6211_v12 = vpack.c.bf16 %v1231_v7, %v1230_v6  ;;  %v1232_v55 = vld [vmem:[%s6680_s21 + $0x13f0] sm:$0xff]  ;;  %v1282_v39 = vld [vmem:[%s6680_s21 + $0x1580] sm:$0xff]  ;;  %v1267_v17 = vld [vmem:[%s6680_s21 + $0x1508] sm:$0xff] }
 0x16e   : > { %3075 = vmatmul.mubr.f32.gmra.mrb[76].mxu1 %v512_v19  ;;  %3329 = vmatprep.mubr.f32.mxu0 %v519_v22  ;;  %v1233_v19 = vld [vmem:[%s6680_s21 + $0x13f8] sm:$0xff]  ;;  %v1328_v22 = vld [vmem:[%s6680_s21 + $0x16f0] sm:$0xff]  ;;  %v1266_v51 = vld [vmem:[%s6680_s21 + $0x1500] sm:$0xff] }
 0x16f   : > { %6198 = vmatpush3.bf16.msra.mxu1 %v6197_v20  ;;  %3079 = vmatprep.mubr.f32.mxu1 %v571_v21  ;;  %v6215_v61 = vpack.c.bf16 %v1233_v19, %v1232_v55  ;;  %v1312_v50 = vld [vmem:[%s6680_s21 + $0x1670] sm:$0xff]  ;;  %v1285_v62 = vld [vmem:[%s6680_s21 + $0x1598] sm:$0xff]  ;;  %v6253_v7 = vpack.c.bf16 %v1267_v17, %v1266_v51  ;;  %v406_v8 = vld [vmem:[%s8573_s3 + $0x160] sm:$0xff] }
 0x170   : > { %6294 = vmatpush3.bf16.msra.mxu0 %v6293_v25  ;;  %6200 = vmatprep.subr.bf16.mxu1 %v6199_v27  ;;  %v1329_v25 = vld [vmem:[%s6680_s21 + $0x16f8] sm:$0xff]  ;;  %v1380_v1 = vld [vmem:[%s6680_s21 + $0x1890] sm:$0xff]  ;;  %v459_v10 = vld [vmem:[%s8573_s3 + $0x308] sm:$0xff] }
 0x171   : > { %6296 = vmatprep.subr.bf16.mxu0 %v6295_v31  ;;  %3330 = vmatmul.mubr.f32.gmra.mrb[76].mxu0 %v518_v9  ;;  %v6309_v31 = vpack.c.bf16 %v1311_v46, %v1310_v15  ;;  %v1269_v13 = vld [vmem:[%s6680_s21 + $0x1518] sm:$0xff]  ;;  %v1364_v14 = vld [vmem:[%s6680_s21 + $0x1810] sm:$0xff] }
 0x172   : > { %3080 = vmatmul.mubr.f32.gmra.mrb[78].mxu1 %v570_v36  ;;  %3334 = vmatprep.mubr.f32.mxu0 %v577_v41  ;;  %v6311_v36 = vpack.c.bf16 %v1329_v25, %v1328_v22  ;;  %v1283_v41 = vld [vmem:[%s6680_s21 + $0x1588] sm:$0xff]  ;;  %v1365_v19 = vld [vmem:[%s6680_s21 + $0x1818] sm:$0xff]  ;;  %v1382_v25 = vld [vmem:[%s6680_s21 + $0x18a0] sm:$0xff] }
 0x173   : > { %6202 = vmatpush3.bf16.msra.mxu1 %v6201_v37  ;;  %3234 = vmatprep.mubr.f32.mxu1 %v401_v48  ;;  %v1313_v37 = vld [vmem:[%s6680_s21 + $0x1678] sm:$0xff]  ;;  %v6217_v48 = vpack.c.bf16 %v1217_v33, %v1216_v32  ;;  %v6251_v49 = vpack.c.bf16 %v1283_v41, %v1282_v39  ;;  %v516_v51 = vld [vmem:[%s8573_s3 + $0x4d0] sm:$0xff] }
 0x174   : > { %6298 = vmatpush3.bf16.msra.mxu0 %v6297_v42  ;;  %6204 = vmatprep.subr.bf16.mxu1 %v6203_v43  ;;  %v1378_v43 = vld [vmem:[%s6680_s21 + $0x1880] sm:$0xff]  ;;  %v465_v32 = vld [vmem:[%s8573_s3 + $0x338] sm:$0xff] }
 0x175   : > { %6300 = vmatprep.subr.bf16.mxu0 %v6299_v44  ;;  %3335 = vmatmul.mubr.f32.gmra.mrb[78].mxu0 %v576_v63 }
 0x176   : > { %3489 = vmatprep.mubr.f32.mxu0 %v407_v0  ;;  %v1362_v0 = vld [vmem:[%s6680_s21 + $0x1800] sm:$0xff] }
 0x177   : > { %6206 = vmatpush3.bf16.msra.mxu1 %v6205_v54  ;;  %v6347_v54 = vpack.c.bf16 %v1379_v45, %v1378_v43  ;;  %v1367_v43 = vld [vmem:[%s6680_s21 + $0x1828] sm:$0xff]  ;;  %v1288_v45 = vld [vmem:[%s6680_s21 + $0x15b0] sm:$0xff] }
 0x178   : > { %6302 = vmatpush3.bf16.msra.mxu0 %v6301_v56  ;;  %6208 = vmatprep.subr.bf16.mxu1 %v6207_v59  ;;  %v1363_v56 = vld [vmem:[%s6680_s21 + $0x1808] sm:$0xff]  ;;  %v1284_v59 = vld [vmem:[%s6680_s21 + $0x1590] sm:$0xff] }
 0x179   : > { %v4577_v29 = vpop.f32.mrb[24].mxu1  ;;  %6304 = vmatprep.subr.bf16.mxu0 %v6303_v3  ;;  %v1381_v3 = vld [vmem:[%s6680_s21 + $0x1898] sm:$0xff]  ;;  %v6255_v46 = vpack.c.bf16 %v1285_v62, %v1284_v59 }
 0x17a   : > { %v4578_v20 = vpop.f32.mrb[25].mxu1  ;;  %v4709_v21 = vpop.f32.mrb[24].mxu0  ;;  %v6351_v55 = vpack.c.bf16 %v1381_v3, %v1380_v1  ;;  %v1273_v59 = vld [vmem:[%s6680_s21 + $0x1538] sm:$0xff]  ;;  %v1290_v1 = vld [vmem:[%s6680_s21 + $0x15c0] sm:$0xff]  ;;  %v1291_v3 = vld [vmem:[%s6680_s21 + $0x15c8] sm:$0xff] }
 0x17b   : > { %v4579_v27 = vadd.f32 %v4578_v20, %v4577_v29  ;;  %6210 = vmatpush3.bf16.msra.mxu1 %v6209_v38  ;;  %v4710_v28 = vpop.f32.mrb[25].mxu0  ;;  %v1286_v20 = vld [vmem:[%s6680_s21 + $0x15a0] sm:$0xff]  ;;  %v1369_v62 = vld [vmem:[%s6680_s21 + $0x1838] sm:$0xff] }
 0x17c   : > { %6306 = vmatpush3.bf16.msra.mxu0 %v6305_v11  ;;  %v7938_v26 = vadd.f32 %v4710_v28, %v4709_v21  ;;  %6212 = vmatprep.subr.bf16.mxu1 %v6211_v12  ;;  %v6349_v11 = vpack.c.bf16 %v1363_v56, %v1362_v0  ;;  %v1268_v12 = vld [vmem:[%s6680_s21 + $0x1510] sm:$0xff]  ;;  %v1287_v21 = vld [vmem:[%s6680_s21 + $0x15a8] sm:$0xff] }
 0x17d   : > { %v2047_v35 = vadd.f32 %v4579_v27, %v7814_v16  ;;  %v4580_v9 = vpop.f32.mrb[26].mxu1  ;;  %6308 = vmatprep.subr.bf16.mxu0 %v6307_v23  ;;  %v6313_v16 = vpack.c.bf16 %v1313_v37, %v1312_v50  ;;  %v1383_v27 = vld [vmem:[%s6680_s21 + $0x18a8] sm:$0xff]  ;;  %v6353_v50 = vpack.c.bf16 %v1365_v19, %v1364_v14  ;;  %v1366_v37 = vld [vmem:[%s6680_s21 + $0x1820] sm:$0xff]  ;;  %v1272_v56 = vld [vmem:[%s6680_s21 + $0x1530] sm:$0xff] }
 0x17e   : > { %v4581_v42 = vpop.f32.mrb[27].mxu1  ;;  %v1275_v14 = vld [vmem:[%s6680_s21 + $0x1548] sm:$0xff]  ;;  %v1293_v19 = vld [vmem:[%s6680_s21 + $0x15d8] sm:$0xff] }
 0x17f   : > { %v4582_v47 = vadd.f32 %v4581_v42, %v4580_v9  ;;  %6214 = vmatpush3.bf16.msra.mxu1 %v6213_v30  ;;  %v7950_v44 = vadd.f32 %v7802_v60, %v2047_v35  ;;  %v6259_v35 = vpack.c.bf16 %v1287_v21, %v1286_v20  ;;  %v1270_v9 = vld [vmem:[%s6680_s21 + $0x1520] sm:$0xff]  ;;  %v6355_v42 = vpack.c.bf16 %v1383_v27, %v1382_v25  ;;  %v1388_v20 = vld [vmem:[%s6680_s21 + $0x18d0] sm:$0xff]  ;;  %v1389_v21 = vld [vmem:[%s6680_s21 + $0x18d8] sm:$0xff] }
 0x180   : > { %6310 = vmatpush3.bf16.msra.mxu0 %v6309_v31  ;;  %6216 = vmatprep.subr.bf16.mxu1 %v6215_v61  ;;  %v4712_v52 = vpop.f32.mrb[26].mxu0  ;;  %v6257_v31 = vpack.c.bf16 %v1269_v13, %v1268_v12  ;;  %v517_v61 = vld [vmem:[%s8573_s3 + $0x4d8] sm:$0xff]  ;;  %v6267_v13 = vpack.c.bf16 %v1291_v3, %v1290_v1  ;;  %v411_v25 = vld [vmem:[%s8573_s3 + $0x188] sm:$0xff]  ;;  %v1280_v1 = vld [vmem:[%s6680_s21 + $0x1570] sm:$0xff] }
 0x181   : > { %v2052_v53 = vadd.f32 %v4582_v47, %v7837_v40  ;;  %v4583_v63 = vpop.f32.mrb[28].mxu1  ;;  %6312 = vmatprep.subr.bf16.mxu0 %v6311_v36  ;;  %v4713_v60 = vpop.f32.mrb[27].mxu0  ;;  %v400_v40 = vld [vmem:[%s8573_s3 + $0x130] sm:$0xff]  ;;  %v1271_v36 = vld [vmem:[%s6680_s21 + $0x1528] sm:$0xff]  ;;  %v1289_v47 = vld [vmem:[%s6680_s21 + $0x15b8] sm:$0xff] }
 0x182   : > { %v4584_v58 = vpop.f32.mrb[29].mxu1  ;;  %v7961_v5 = vadd.f32 %v4713_v60, %v4712_v52  ;;  %v6261_v17 = vpack.c.bf16 %v1271_v36, %v1270_v9  ;;  %v575_v52 = vld [vmem:[%s8573_s3 + $0x6a8] sm:$0xff]  ;;  %v6263_v0 = vpack.c.bf16 %v1289_v47, %v1288_v45  ;;  %v1368_v60 = vld [vmem:[%s6680_s21 + $0x1830] sm:$0xff]  ;;  %v1390_v36 = vld [vmem:[%s6680_s21 + $0x18e0] sm:$0xff] }
 0x183   : > { %v4585_v6 = vadd.f32 %v4584_v58, %v4583_v63  ;;  %6218 = vmatpush3.bf16.msra.mxu1 %v6217_v48  ;;  %v7973_v38 = vadd.f32 %v7825_v34, %v2052_v53  ;;  %v1384_v48 = vld [vmem:[%s6680_s21 + $0x18b0] sm:$0xff]  ;;  %v523_v53 = vld [vmem:[%s8573_s3 + $0x508] sm:$0xff]  ;;  %v6361_v12 = vpack.c.bf16 %v1369_v62, %v1368_v60  ;;  %v1374_v47 = vld [vmem:[%s6680_s21 + $0x1860] sm:$0xff] }
 0x184   : > { %6314 = vmatpush3.bf16.msra.mxu0 %v6313_v16  ;;  %6252 = vmatprep.subr.bf16.mxu1 %v6251_v49  ;;  %v4715_v15 = vpop.f32.mrb[28].mxu0  ;;  %v1385_v16 = vld [vmem:[%s6680_s21 + $0x18b8] sm:$0xff]  ;;  %v1295_v9 = vld [vmem:[%s6680_s21 + $0x15e8] sm:$0xff] }
 0x185   : > { %v2057_v29 = vadd.f32 %v4585_v6, %v7860_v4  ;;  %v4586_v23 = vpop.f32.mrb[30].mxu1  ;;  %6348 = vmatprep.subr.bf16.mxu0 %v6347_v54  ;;  %v4716_v34 = vpop.f32.mrb[29].mxu0  ;;  %v458_v4 = vld [vmem:[%s8573_s3 + $0x300] sm:$0xff]  ;;  %v6357_v54 = vpack.c.bf16 %v1367_v43, %v1366_v37  ;;  %v6359_v58 = vpack.c.bf16 %v1385_v16, %v1384_v48  ;;  %v1387_v6 = vld [vmem:[%s6680_s21 + $0x18c8] sm:$0xff]  ;;  %v1281_v3 = vld [vmem:[%s6680_s21 + $0x1578] sm:$0xff] }
 0x186   : > { %v4587_v22 = vpop.f32.mrb[31].mxu1  ;;  %3235 = vmatmul.mubr.f32.vlgmr.msra.gmra.mrb[80].mxu1 %v400_v40  ;;  %v7984_v28 = vadd.f32 %v4716_v34, %v4715_v15  ;;  %v522_v40 = vld [vmem:[%s8573_s3 + $0x500] sm:$0xff]  ;;  %v580_v34 = vld [vmem:[%s8573_s3 + $0x6d0] sm:$0xff]  ;;  %v1391_v37 = vld [vmem:[%s6680_s21 + $0x18e8] sm:$0xff] }
 0x187   : > { %v4588_v30 = vadd.f32 %v4587_v22, %v4586_v23  ;;  %6254 = vmatpush3.bf16.msra.mxu1 %v6253_v7  ;;  %3490 = vmatmul.mubr.f32.vlgmr.msra.gmra.mrb[80].mxu0 %v406_v8  ;;  %v7996_v33 = vadd.f32 %v7848_v57, %v2057_v29  ;;  %v574_v7 = vld [vmem:[%s8573_s3 + $0x6a0] sm:$0xff]  ;;  %v6265_v8 = vpack.c.bf16 %v1273_v59, %v1272_v56  ;;  %v405_v29 = vld [vmem:[%s8573_s3 + $0x158] sm:$0xff]  ;;  %v1279_v45 = vld [vmem:[%s6680_s21 + $0x1568] sm:$0xff] }
 0x188   : > { %6350 = vmatpush3.bf16.msra.mxu0 %v6349_v11  ;;  %3239 = vmatprep.mubr.f32.mxu1 %v459_v10  ;;  %v4718_v39 = vpop.f32.mrb[30].mxu0  ;;  %v1274_v10 = vld [vmem:[%s6680_s21 + $0x1540] sm:$0xff]  ;;  %v581_v11 = vld [vmem:[%s8573_s3 + $0x6d8] sm:$0xff]  ;;  %v6371_v48 = vpack.c.bf16 %v1391_v37, %v1390_v36  ;;  %v1375_v16 = vld [vmem:[%s6680_s21 + $0x1868] sm:$0xff] }
 0x189   : > { %v2062_v41 = vadd.f32 %v4588_v30, %v7886_v24  ;;  %6256 = vmatprep.subr.bf16.mxu1 %v6255_v46  ;;  %6352 = vmatprep.subr.bf16.mxu0 %v6351_v55  ;;  %v4719_v57 = vpop.f32.mrb[31].mxu0  ;;  %v464_v24 = vld [vmem:[%s8573_s3 + $0x330] sm:$0xff]  ;;  %v1370_v15 = vld [vmem:[%s6680_s21 + $0x1840] sm:$0xff]  ;;  %v1371_v46 = vld [vmem:[%s6680_s21 + $0x1848] sm:$0xff]  ;;  %v6269_v22 = vpack.c.bf16 %v1275_v14, %v1274_v10 }
 0x18a   : > { %3240 = vmatmul.mubr.f32.gmra.mrb[82].mxu1 %v458_v4  ;;  %v8007_v49 = vadd.f32 %v4719_v57, %v4718_v39  ;;  %3494 = vmatprep.mubr.f32.mxu0 %v465_v32  ;;  %v1292_v55 = vld [vmem:[%s6680_s21 + $0x15d0] sm:$0xff]  ;;  %v6365_v27 = vpack.c.bf16 %v1371_v46, %v1370_v15  ;;  %v6367_v32 = vpack.c.bf16 %v1389_v21, %v1388_v20  ;;  %v1278_v43 = vld [vmem:[%s6680_s21 + $0x1560] sm:$0xff]  ;;  %v1443_v14 = vld [vmem:[%s6680_s21 + $0x1a88] sm:$0xff] }
 0x18b   : > { %6258 = vmatpush3.bf16.msra.mxu1 %v6257_v31  ;;  %3244 = vmatprep.mubr.f32.mxu1 %v517_v61  ;;  %v8022_v63 = vadd.f32 %v7871_v18, %v2062_v41  ;;  %v1386_v18 = vld [vmem:[%s6680_s21 + $0x18c0] sm:$0xff]  ;;  %v6271_v30 = vpack.c.bf16 %v1293_v19, %v1292_v55  ;;  %v1276_v4 = vld [vmem:[%s6680_s21 + $0x1550] sm:$0xff]  ;;  %v1277_v31 = vld [vmem:[%s6680_s21 + $0x1558] sm:$0xff]  ;;  %v6277_v59 = vpack.c.bf16 %v1279_v45, %v1278_v43 }
 0x18c   : > { %6354 = vmatpush3.bf16.msra.mxu0 %v6353_v50  ;;  %6260 = vmatprep.subr.bf16.mxu1 %v6259_v35  ;;  %v6363_v23 = vpack.c.bf16 %v1387_v6, %v1386_v18  ;;  %v1372_v61 = vld [vmem:[%s6680_s21 + $0x1850] sm:$0xff]  ;;  %v1373_v50 = vld [vmem:[%s6680_s21 + $0x1858] sm:$0xff]  ;;  %v1294_v35 = vld [vmem:[%s6680_s21 + $0x15e0] sm:$0xff]  ;;  %v6273_v39 = vpack.c.bf16 %v1277_v31, %v1276_v4 }
 0x18d   : > { %6356 = vmatprep.subr.bf16.mxu0 %v6355_v42  ;;  %3495 = vmatmul.mubr.f32.gmra.mrb[82].mxu0 %v464_v24  ;;  %v6369_v41 = vpack.c.bf16 %v1373_v50, %v1372_v61  ;;  %v6275_v42 = vpack.c.bf16 %v1295_v9, %v1294_v35  ;;  %v1296_v24 = vld [vmem:[%s6680_s21 + $0x15f0] sm:$0xff]  ;;  %v1346_v10 = vld [vmem:[%s6680_s21 + $0x1780] sm:$0xff]  ;;  %v1331_v19 = vld [vmem:[%s6680_s21 + $0x1708] sm:$0xff] }
 0x18e   : > { %3245 = vmatmul.mubr.f32.gmra.mrb[84].mxu1 %v516_v51  ;;  %3499 = vmatprep.mubr.f32.mxu0 %v523_v53  ;;  %v1297_v51 = vld [vmem:[%s6680_s21 + $0x15f8] sm:$0xff]  ;;  %v1392_v53 = vld [vmem:[%s6680_s21 + $0x18f0] sm:$0xff]  ;;  %v1330_v55 = vld [vmem:[%s6680_s21 + $0x1700] sm:$0xff] }
 0x18f   : > { %6262 = vmatpush3.bf16.msra.mxu1 %v6261_v17  ;;  %3249 = vmatprep.mubr.f32.mxu1 %v575_v52  ;;  %v6279_v62 = vpack.c.bf16 %v1297_v51, %v1296_v24  ;;  %v1376_v18 = vld [vmem:[%s6680_s21 + $0x1870] sm:$0xff]  ;;  %v1349_v31 = vld [vmem:[%s6680_s21 + $0x1798] sm:$0xff]  ;;  %v6317_v9 = vpack.c.bf16 %v1331_v19, %v1330_v55  ;;  %v410_v36 = vld [vmem:[%s8573_s3 + $0x180] sm:$0xff] }
 0x190   : > { %6358 = vmatpush3.bf16.msra.mxu0 %v6357_v54  ;;  %6264 = vmatprep.subr.bf16.mxu1 %v6263_v0  ;;  %v1393_v54 = vld [vmem:[%s6680_s21 + $0x18f8] sm:$0xff]  ;;  %v1444_v61 = vld [vmem:[%s6680_s21 + $0x1a90] sm:$0xff]  ;;  %v463_v37 = vld [vmem:[%s8573_s3 + $0x328] sm:$0xff] }
 0x191   : > { %6360 = vmatprep.subr.bf16.mxu0 %v6359_v58  ;;  %3500 = vmatmul.mubr.f32.gmra.mrb[84].mxu0 %v522_v40  ;;  %v6373_v58 = vpack.c.bf16 %v1375_v16, %v1374_v47  ;;  %v1333_v43 = vld [vmem:[%s6680_s21 + $0x1718] sm:$0xff]  ;;  %v1428_v45 = vld [vmem:[%s6680_s21 + $0x1a10] sm:$0xff] }
 0x192   : > { %3250 = vmatmul.mubr.f32.gmra.mrb[86].mxu1 %v574_v7  ;;  %3504 = vmatprep.mubr.f32.mxu0 %v581_v11  ;;  %v6375_v7 = vpack.c.bf16 %v1393_v54, %v1392_v53  ;;  %v1347_v11 = vld [vmem:[%s6680_s21 + $0x1788] sm:$0xff]  ;;  %v1429_v51 = vld [vmem:[%s6680_s21 + $0x1a18] sm:$0xff]  ;;  %v1446_v54 = vld [vmem:[%s6680_s21 + $0x1aa0] sm:$0xff] }
 0x193   : > { %6266 = vmatpush3.bf16.msra.mxu1 %v6265_v8  ;;  %3404 = vmatprep.mubr.f32.mxu1 %v405_v29  ;;  %v1377_v8 = vld [vmem:[%s6680_s21 + $0x1878] sm:$0xff]  ;;  %v6281_v29 = vpack.c.bf16 %v1281_v3, %v1280_v1  ;;  %v6315_v46 = vpack.c.bf16 %v1347_v11, %v1346_v10  ;;  %v520_v55 = vld [vmem:[%s8573_s3 + $0x4f0] sm:$0xff] }
 0x194   : > { %6362 = vmatpush3.bf16.msra.mxu0 %v6361_v12  ;;  %6268 = vmatprep.subr.bf16.mxu1 %v6267_v13  ;;  %v1442_v13 = vld [vmem:[%s6680_s21 + $0x1a80] sm:$0xff]  ;;  %v469_v1 = vld [vmem:[%s8573_s3 + $0x358] sm:$0xff] }
 0x195   : > { %6364 = vmatprep.subr.bf16.mxu0 %v6363_v23  ;;  %3505 = vmatmul.mubr.f32.gmra.mrb[86].mxu0 %v580_v34 }
 0x196   : > { %3659 = vmatprep.mubr.f32.mxu0 %v411_v25  ;;  %v1426_v25 = vld [vmem:[%s6680_s21 + $0x1a00] sm:$0xff] }
 0x197   : > { %6270 = vmatpush3.bf16.msra.mxu1 %v6269_v22  ;;  %v6411_v22 = vpack.c.bf16 %v1443_v14, %v1442_v13  ;;  %v1431_v13 = vld [vmem:[%s6680_s21 + $0x1a28] sm:$0xff]  ;;  %v1352_v14 = vld [vmem:[%s6680_s21 + $0x17b0] sm:$0xff] }
 0x198   : > { %6366 = vmatpush3.bf16.msra.mxu0 %v6365_v27  ;;  %6272 = vmatprep.subr.bf16.mxu1 %v6271_v30  ;;  %v1427_v27 = vld [vmem:[%s6680_s21 + $0x1a08] sm:$0xff]  ;;  %v1348_v30 = vld [vmem:[%s6680_s21 + $0x1790] sm:$0xff] }
 0x199   : > { %v4665_v57 = vpop.f32.mrb[32].mxu1  ;;  %6368 = vmatprep.subr.bf16.mxu0 %v6367_v32  ;;  %v1445_v32 = vld [vmem:[%s6680_s21 + $0x1a98] sm:$0xff]  ;;  %v6319_v16 = vpack.c.bf16 %v1349_v31, %v1348_v30 }
 0x19a   : > { %v4666_v17 = vpop.f32.mrb[33].mxu1  ;;  %v4797_v52 = vpop.f32.mrb[32].mxu0  ;;  %v6415_v24 = vpack.c.bf16 %v1445_v32, %v1444_v61  ;;  %v1337_v30 = vld [vmem:[%s6680_s21 + $0x1738] sm:$0xff]  ;;  %v1354_v61 = vld [vmem:[%s6680_s21 + $0x17c0] sm:$0xff]  ;;  %v1355_v32 = vld [vmem:[%s6680_s21 + $0x17c8] sm:$0xff] }
 0x19b   : > { %v4667_v0 = vadd.f32 %v4666_v17, %v4665_v57  ;;  %6274 = vmatpush3.bf16.msra.mxu1 %v6273_v39  ;;  %v4798_v56 = vpop.f32.mrb[33].mxu0  ;;  %v1350_v17 = vld [vmem:[%s6680_s21 + $0x17a0] sm:$0xff]  ;;  %v1433_v31 = vld [vmem:[%s6680_s21 + $0x1a38] sm:$0xff] }
 0x19c   : > { %6370 = vmatpush3.bf16.msra.mxu0 %v6369_v41  ;;  %v8074_v60 = vadd.f32 %v4798_v56, %v4797_v52  ;;  %6276 = vmatprep.subr.bf16.mxu1 %v6275_v42  ;;  %v6413_v41 = vpack.c.bf16 %v1427_v27, %v1426_v25  ;;  %v1332_v42 = vld [vmem:[%s6680_s21 + $0x1710] sm:$0xff]  ;;  %v1351_v52 = vld [vmem:[%s6680_s21 + $0x17a8] sm:$0xff] }
 0x19d   : > { %v2217_v6 = vadd.f32 %v4667_v0, %v7950_v44  ;;  %v4668_v40 = vpop.f32.mrb[34].mxu1  ;;  %6372 = vmatprep.subr.bf16.mxu0 %v6371_v48  ;;  %v6377_v44 = vpack.c.bf16 %v1377_v8, %v1376_v18  ;;  %v1447_v0 = vld [vmem:[%s6680_s21 + $0x1aa8] sm:$0xff]  ;;  %v6417_v18 = vpack.c.bf16 %v1429_v51, %v1428_v45  ;;  %v1430_v8 = vld [vmem:[%s6680_s21 + $0x1a20] sm:$0xff]  ;;  %v1336_v27 = vld [vmem:[%s6680_s21 + $0x1730] sm:$0xff] }
 0x19e   : > { %v4669_v12 = vpop.f32.mrb[35].mxu1  ;;  %v1339_v45 = vld [vmem:[%s6680_s21 + $0x1748] sm:$0xff]  ;;  %v1357_v51 = vld [vmem:[%s6680_s21 + $0x17d8] sm:$0xff] }
 0x19f   : > { %v4670_v15 = vadd.f32 %v4669_v12, %v4668_v40  ;;  %6278 = vmatpush3.bf16.msra.mxu1 %v6277_v59  ;;  %v8086_v23 = vadd.f32 %v7938_v26, %v2217_v6  ;;  %v6323_v6 = vpack.c.bf16 %v1351_v52, %v1350_v17  ;;  %v1334_v40 = vld [vmem:[%s6680_s21 + $0x1720] sm:$0xff]  ;;  %v6419_v12 = vpack.c.bf16 %v1447_v0, %v1446_v54  ;;  %v1452_v17 = vld [vmem:[%s6680_s21 + $0x1ad0] sm:$0xff]  ;;  %v1453_v52 = vld [vmem:[%s6680_s21 + $0x1ad8] sm:$0xff] }
 0x1a0   : > { %6374 = vmatpush3.bf16.msra.mxu0 %v6373_v58  ;;  %6280 = vmatprep.subr.bf16.mxu1 %v6279_v62  ;;  %v4800_v20 = vpop.f32.mrb[34].mxu0  ;;  %v6321_v58 = vpack.c.bf16 %v1333_v43, %v1332_v42  ;;  %v521_v62 = vld [vmem:[%s8573_s3 + $0x4f8] sm:$0xff]  ;;  %v6331_v43 = vpack.c.bf16 %v1355_v32, %v1354_v61  ;;  %v1340_v54 = vld [vmem:[%s6680_s21 + $0x1750] sm:$0xff]  ;;  %v415_v0 = vld [vmem:[%s8573_s3 + $0x1a8] sm:$0xff] }
 0x1a1   : > { %v2222_v21 = vadd.f32 %v4670_v15, %v7973_v38  ;;  %v4671_v34 = vpop.f32.mrb[36].mxu1  ;;  %6376 = vmatprep.subr.bf16.mxu0 %v6375_v7  ;;  %v4801_v26 = vpop.f32.mrb[35].mxu0  ;;  %v404_v38 = vld [vmem:[%s8573_s3 + $0x150] sm:$0xff]  ;;  %v1335_v7 = vld [vmem:[%s6680_s21 + $0x1728] sm:$0xff]  ;;  %v1353_v15 = vld [vmem:[%s6680_s21 + $0x17b8] sm:$0xff] }
 0x1a2   : > { %v4672_v4 = vpop.f32.mrb[37].mxu1  ;;  %v8097_v50 = vadd.f32 %v4801_v26, %v4800_v20  ;;  %v6325_v19 = vpack.c.bf16 %v1335_v7, %v1334_v40  ;;  %v579_v20 = vld [vmem:[%s8573_s3 + $0x6c8] sm:$0xff]  ;;  %v6327_v25 = vpack.c.bf16 %v1353_v15, %v1352_v14  ;;  %v1432_v26 = vld [vmem:[%s6680_s21 + $0x1a30] sm:$0xff]  ;;  %v1437_v40 = vld [vmem:[%s6680_s21 + $0x1a58] sm:$0xff] }
 0x1a3   : > { %v4673_v35 = vadd.f32 %v4672_v4, %v4671_v34  ;;  %6282 = vmatpush3.bf16.msra.mxu1 %v6281_v29  ;;  %v8109_v39 = vadd.f32 %v7961_v5, %v2222_v21  ;;  %v1448_v29 = vld [vmem:[%s6680_s21 + $0x1ab0] sm:$0xff]  ;;  %v527_v21 = vld [vmem:[%s8573_s3 + $0x528] sm:$0xff]  ;;  %v6425_v42 = vpack.c.bf16 %v1433_v31, %v1432_v26  ;;  %v1358_v7 = vld [vmem:[%s6680_s21 + $0x17e0] sm:$0xff] }
 0x1a4   : > { %6378 = vmatpush3.bf16.msra.mxu0 %v6377_v44  ;;  %6316 = vmatprep.subr.bf16.mxu1 %v6315_v46  ;;  %v4803_v47 = vpop.f32.mrb[36].mxu0  ;;  %v1449_v44 = vld [vmem:[%s6680_s21 + $0x1ab8] sm:$0xff] }
 0x1a5   : > { %v2227_v57 = vadd.f32 %v4673_v35, %v7996_v33  ;;  %v4674_v48 = vpop.f32.mrb[38].mxu1  ;;  %6412 = vmatprep.subr.bf16.mxu0 %v6411_v22  ;;  %v4804_v5 = vpop.f32.mrb[37].mxu0  ;;  %v462_v33 = vld [vmem:[%s8573_s3 + $0x320] sm:$0xff]  ;;  %v6421_v22 = vpack.c.bf16 %v1431_v13, %v1430_v8  ;;  %v6423_v4 = vpack.c.bf16 %v1449_v44, %v1448_v29  ;;  %v1451_v35 = vld [vmem:[%s6680_s21 + $0x1ac8] sm:$0xff]  ;;  %v4039_v14 = vld [vmem:[%s8576_s6 + $0x18] sm:$0xff] }
 0x1a6   : > { %v4675_v53 = vpop.f32.mrb[39].mxu1  ;;  %3405 = vmatmul.mubr.f32.vlgmr.msra.gmra.mrb[88].mxu1 %v404_v38  ;;  %v8120_v56 = vadd.f32 %v4804_v5, %v4803_v47  ;;  %v526_v38 = vld [vmem:[%s8573_s3 + $0x520] sm:$0xff]  ;;  %v584_v5 = vld [vmem:[%s8573_s3 + $0x6f0] sm:$0xff]  ;;  %v1359_v8 = vld [vmem:[%s6680_s21 + $0x17e8] sm:$0xff] }
 0x1a7   : > { %v4676_v59 = vadd.f32 %v4675_v53, %v4674_v48  ;;  %6318 = vmatpush3.bf16.msra.mxu1 %v6317_v9  ;;  %3660 = vmatmul.mubr.f32.vlgmr.msra.gmra.mrb[88].mxu0 %v410_v36  ;;  %v8132_v3 = vadd.f32 %v7984_v28, %v2227_v57  ;;  %v578_v9 = vld [vmem:[%s8573_s3 + $0x6c0] sm:$0xff]  ;;  %v6329_v36 = vpack.c.bf16 %v1337_v30, %v1336_v27  ;;  %v409_v57 = vld [vmem:[%s8573_s3 + $0x178] sm:$0xff]  ;;  %v1343_v29 = vld [vmem:[%s6680_s21 + $0x1768] sm:$0xff] }
 0x1a8   : > { %6414 = vmatpush3.bf16.msra.mxu0 %v6413_v41  ;;  %3409 = vmatprep.mubr.f32.mxu1 %v463_v37  ;;  %v4806_v10 = vpop.f32.mrb[38].mxu0  ;;  %v1338_v37 = vld [vmem:[%s6680_s21 + $0x1740] sm:$0xff]  ;;  %v585_v41 = vld [vmem:[%s8573_s3 + $0x6f8] sm:$0xff]  ;;  %v1456_v30 = vld [vmem:[%s6680_s21 + $0x1af0] sm:$0xff] }
 0x1a9   : > { %v2232_v11 = vadd.f32 %v4676_v59, %v8022_v63  ;;  %6320 = vmatprep.subr.bf16.mxu1 %v6319_v16  ;;  %6416 = vmatprep.subr.bf16.mxu0 %v6415_v24  ;;  %v4807_v28 = vpop.f32.mrb[39].mxu0  ;;  %v468_v63 = vld [vmem:[%s8573_s3 + $0x350] sm:$0xff]  ;;  %v1434_v47 = vld [vmem:[%s6680_s21 + $0x1a40] sm:$0xff]  ;;  %v1435_v16 = vld [vmem:[%s6680_s21 + $0x1a48] sm:$0xff]  ;;  %v6333_v53 = vpack.c.bf16 %v1339_v45, %v1338_v37 }
 0x1aa   : > { %3410 = vmatmul.mubr.f32.gmra.mrb[90].mxu1 %v462_v33  ;;  %v8143_v46 = vadd.f32 %v4807_v28, %v4806_v10  ;;  %3664 = vmatprep.mubr.f32.mxu0 %v469_v1  ;;  %v1356_v24 = vld [vmem:[%s6680_s21 + $0x17d0] sm:$0xff]  ;;  %v4037_v59 = vld [vmem:[%s8576_s6 + $0x8] sm:$0xff]  ;;  %v6429_v33 = vpack.c.bf16 %v1435_v16, %v1434_v47  ;;  %v1454_v10 = vld [vmem:[%s6680_s21 + $0x1ae0] sm:$0xff]  ;;  %v6339_v28 = vpack.c.bf16 %v1359_v8, %v1358_v7 }
 0x1ab   : > { %6322 = vmatpush3.bf16.msra.mxu1 %v6321_v58  ;;  %3414 = vmatprep.mubr.f32.mxu1 %v521_v62  ;;  %v8158_v34 = vadd.f32 %v8007_v49, %v2232_v11  ;;  %v1450_v49 = vld [vmem:[%s6680_s21 + $0x1ac0] sm:$0xff]  ;;  %v6335_v58 = vpack.c.bf16 %v1357_v51, %v1356_v24  ;;  %v1341_v62 = vld [vmem:[%s6680_s21 + $0x1758] sm:$0xff]  ;;  %v1436_v1 = vld [vmem:[%s6680_s21 + $0x1a50] sm:$0xff] }
 0x1ac   : > { %6418 = vmatpush3.bf16.msra.mxu0 %v6417_v18  ;;  %6324 = vmatprep.subr.bf16.mxu1 %v6323_v6  ;;  %v6427_v48 = vpack.c.bf16 %v1451_v35, %v1450_v49  ;;  %v4036_v18 = vld [vmem:[%s8576_s6] sm:$0xff]  ;;  %v6431_v6 = vpack.c.bf16 %v1453_v52, %v1452_v17  ;;  %v1455_v11 = vld [vmem:[%s6680_s21 + $0x1ae8] sm:$0xff]  ;;  %v6433_v15 = vpack.c.bf16 %v1437_v40, %v1436_v1  ;;  %v1457_v26 = vld [vmem:[%s6680_s21 + $0x1af8] sm:$0xff] }
 0x1ad   : > { %6420 = vmatprep.subr.bf16.mxu0 %v6419_v12  ;;  %3665 = vmatmul.mubr.f32.gmra.mrb[90].mxu0 %v468_v63  ;;  %v6337_v12 = vpack.c.bf16 %v1341_v62, %v1340_v54  ;;  %v1342_v13 = vld [vmem:[%s6680_s21 + $0x1760] sm:$0xff]  ;;  %v4038_v63 = vld [vmem:[%s8576_s6 + $0x10] sm:$0xff]  ;;  %v1411_v47 = vld [vmem:[%s6680_s21 + $0x1988] sm:$0xff] }
 0x1ae   : > { %3415 = vmatmul.mubr.f32.gmra.mrb[92].mxu1 %v520_v55  ;;  %3669 = vmatprep.mubr.f32.mxu0 %v527_v21  ;;  %v1438_v44 = vld [vmem:[%s6680_s21 + $0x1a60] sm:$0xff]  ;;  %v1360_v21 = vld [vmem:[%s6680_s21 + $0x17f0] sm:$0xff]  ;;  %v6341_v61 = vpack.c.bf16 %v1343_v29, %v1342_v13  ;;  %v1395_v52 = vld [vmem:[%s6680_s21 + $0x1908] sm:$0xff]  ;;  %v6595_v29 = vmov 0.0|0.0  }
 0x1af   : > { %6326 = vmatpush3.bf16.msra.mxu1 %v6325_v19  ;;  %3419 = vmatprep.mubr.f32.mxu1 %v579_v20  ;;  %v6435_v19 = vpack.c.bf16 %v1455_v11, %v1454_v10  ;;  %v1439_v20 = vld [vmem:[%s6680_s21 + $0x1a68] sm:$0xff]  ;;  %v1410_v45 = vld [vmem:[%s6680_s21 + $0x1980] sm:$0xff]  ;;  %v1413_v62 = vld [vmem:[%s6680_s21 + $0x1998] sm:$0xff] }
 0x1b0   : > { %6422 = vmatpush3.bf16.msra.mxu0 %v6421_v22  ;;  %6328 = vmatprep.subr.bf16.mxu1 %v6327_v25  ;;  %v1361_v22 = vld [vmem:[%s6680_s21 + $0x17f8] sm:$0xff]  ;;  %v6437_v49 = vpack.c.bf16 %v1439_v20, %v1438_v44  ;;  %v6379_v51 = vpack.c.bf16 %v1411_v47, %v1410_v45  ;;  %v1394_v17 = vld [vmem:[%s6680_s21 + $0x1900] sm:$0xff]  ;;  %v467_v7 = vld [vmem:[%s8573_s3 + $0x348] sm:$0xff] }
 0x1b1   : > { %6424 = vmatprep.subr.bf16.mxu0 %v6423_v4  ;;  %3670 = vmatmul.mubr.f32.gmra.mrb[92].mxu0 %v526_v38  ;;  %v6343_v35 = vpack.c.bf16 %v1361_v22, %v1360_v21  ;;  %v1344_v38 = vld [vmem:[%s6680_s21 + $0x1770] sm:$0xff]  ;;  %v414_v40 = vld [vmem:[%s8573_s3 + $0x1a0] sm:$0xff]  ;;  %v583_v47 = vld [vmem:[%s8573_s3 + $0x6e8] sm:$0xff] }
 0x1b2   : > { %3420 = vmatmul.mubr.f32.gmra.mrb[94].mxu1 %v578_v9  ;;  %3674 = vmatprep.mubr.f32.mxu0 %v585_v41  ;;  %v1345_v9 = vld [vmem:[%s6680_s21 + $0x1778] sm:$0xff]  ;;  %v1396_v11 = vld [vmem:[%s6680_s21 + $0x1910] sm:$0xff] }
 0x1b3   : > { %6330 = vmatpush3.bf16.msra.mxu1 %v6329_v36  ;;  %3574 = vmatprep.mubr.f32.mxu1 %v409_v57  ;;  %v1440_v36 = vld [vmem:[%s6680_s21 + $0x1a70] sm:$0xff]  ;;  %v6345_v16 = vpack.c.bf16 %v1345_v9, %v1344_v38 }
 0x1b4   : > { %6426 = vmatpush3.bf16.msra.mxu0 %v6425_v42  ;;  %6332 = vmatprep.subr.bf16.mxu1 %v6331_v43  ;;  %v6439_v42 = vpack.c.bf16 %v1457_v26, %v1456_v30  ;;  %v1441_v43 = vld [vmem:[%s6680_s21 + $0x1a78] sm:$0xff]  ;;  %v1492_v13 = vld [vmem:[%s6680_s21 + $0x1c10] sm:$0xff] }
 0x1b5   : > { %6428 = vmatprep.subr.bf16.mxu0 %v6427_v48  ;;  %3675 = vmatmul.mubr.f32.gmra.mrb[94].mxu0 %v584_v5  ;;  %v473_v26 = vld [vmem:[%s8573_s3 + $0x378] sm:$0xff] }
 0x1b6   : > { %3829 = vmatprep.mubr.f32.mxu0 %v415_v0  ;;  %4047 = vperm.xlu1 %6554, %v4037_v59   ;;  %v1490_v0 = vld [vmem:[%s6680_s21 + $0x1c00] sm:$0xff]  ;;  %v1491_v59 = vld [vmem:[%s6680_s21 + $0x1c08] sm:$0xff] }
 0x1b7   : > { %6334 = vmatpush3.bf16.msra.mxu1 %v6333_v53  ;;  %4042 = vperm.xlu0 %6553, %v4036_v18   ;;  %v6476_v10 = vpack.c.bf16 %v1491_v59, %v1490_v0  ;;  %v582_v0 = vld [vmem:[%s8573_s3 + $0x6e0] sm:$0xff] }
 0x1b8   : > { %6430 = vmatpush3.bf16.msra.mxu0 %v6429_v33  ;;  %6336 = vmatprep.subr.bf16.mxu1 %v6335_v58 }
 0x1b9   : > { %v4753_v55 = vpop.f32.mrb[40].mxu1  ;;  %6432 = vmatprep.subr.bf16.mxu0 %v6431_v6  ;;  %v408_v6 = vld [vmem:[%s8573_s3 + $0x170] sm:$0xff] }
 0x1ba   : > { %v4754_v25 = vpop.f32.mrb[41].mxu1  ;;  %v4885_v27 = vpop.f32.mrb[40].mxu0  ;;  %4057 = vperm.xlu1 %6554, %v4039_v14  }
 0x1bb   : > { %v4755_v4 = vadd.f32 %v4754_v25, %v4753_v55  ;;  %6338 = vmatpush3.bf16.msra.mxu1 %v6337_v12  ;;  %v4886_v31 = vpop.f32.mrb[41].mxu0  ;;  %4052 = vperm.xlu0 %6553, %v4038_v63   ;;  %v1397_v12 = vld [vmem:[%s6680_s21 + $0x1918] sm:$0xff]  ;;  %v1414_v55 = vld [vmem:[%s6680_s21 + $0x19a0] sm:$0xff] }
 0x1bc   : > { %6434 = vmatpush3.bf16.msra.mxu0 %v6433_v15  ;;  %v8222_v32 = vadd.f32 %v4886_v31, %v4885_v27  ;;  %6340 = vmatprep.subr.bf16.mxu1 %v6339_v28  ;;  %v1493_v63 = vld [vmem:[%s6680_s21 + $0x1c18] sm:$0xff]  ;;  %v6385_v25 = vpack.c.bf16 %v1397_v12, %v1396_v11  ;;  %v588_v11 = vld [vmem:[%s8573_s3 + $0x710] sm:$0xff] }
 0x1bd   : > { %v2387_v37 = vadd.f32 %v4755_v4, %v8086_v23  ;;  %v4756_v41 = vpop.f32.mrb[42].mxu1  ;;  %6436 = vmatprep.subr.bf16.mxu0 %v6435_v19  ;;  %v6441_v23 = vpack.c.bf16 %v1441_v43, %v1440_v36  ;;  %v1415_v19 = vld [vmem:[%s6680_s21 + $0x19a8] sm:$0xff]  ;;  %v525_v27 = vld [vmem:[%s8573_s3 + $0x518] sm:$0xff]  ;;  %v6479_v4 = vpack.c.bf16 %v1493_v63, %v1492_v13  ;;  %v472_v43 = vld [vmem:[%s8573_s3 + $0x370] sm:$0xff] }
 0x1be   : > { %v4757_v57 = vpop.f32.mrb[43].mxu1  ;;  %v6387_v31 = vpack.c.bf16 %v1415_v19, %v1414_v55  ;;  %v1495_v36 = vld [vmem:[%s6680_s21 + $0x1c28] sm:$0xff]  ;;  %v1500_v63 = vld [vmem:[%s6680_s21 + $0x1c50] sm:$0xff]  ;;  %v1501_v55 = vld [vmem:[%s6680_s21 + $0x1c58] sm:$0xff] }
 0x1bf   : > { %v4758_v48 = vadd.f32 %v4757_v57, %v4756_v41  ;;  %6342 = vmatpush3.bf16.msra.mxu1 %v6341_v61  ;;  %v8232_v24 = vadd.f32 %v8074_v60, %v2387_v37  ;;  %v1412_v60 = vld [vmem:[%s6680_s21 + $0x1990] sm:$0xff]  ;;  %v1398_v61 = vld [vmem:[%s6680_s21 + $0x1920] sm:$0xff]  ;;  %v1417_v37 = vld [vmem:[%s6680_s21 + $0x19b8] sm:$0xff] }
 0x1c0   : > { %6438 = vmatpush3.bf16.msra.mxu0 %v6437_v49  ;;  %6344 = vmatprep.subr.bf16.mxu1 %v6343_v35  ;;  %v4888_v5 = vpop.f32.mrb[42].mxu0  ;;  %v6383_v44 = vpack.c.bf16 %v1413_v62, %v1412_v60  ;;  %v1399_v49 = vld [vmem:[%s6680_s21 + $0x1928] sm:$0xff]  ;;  %v1494_v35 = vld [vmem:[%s6680_s21 + $0x1c20] sm:$0xff] }
 0x1c1   : > { %v2392_v53 = vadd.f32 %v4758_v48, %v8109_v39  ;;  %v4759_v54 = vpop.f32.mrb[44].mxu1  ;;  %6440 = vmatprep.subr.bf16.mxu0 %v6439_v42  ;;  %v4889_v33 = vpop.f32.mrb[43].mxu0  ;;  %v6381_v39 = vpack.c.bf16 %v1395_v52, %v1394_v17  ;;  %v6389_v45 = vpack.c.bf16 %v1399_v49, %v1398_v61  ;;  %v531_v48 = vld [vmem:[%s8573_s3 + $0x548] sm:$0xff]  ;;  %v1401_v17 = vld [vmem:[%s6680_s21 + $0x1938] sm:$0xff]  ;;  %v1496_v52 = vld [vmem:[%s6680_s21 + $0x1c30] sm:$0xff] }
 0x1c2   : > { %v4760_v58 = vpop.f32.mrb[45].mxu1  ;;  %v8241_v1 = vadd.f32 %v4889_v33, %v4888_v5  ;;  %v1497_v5 = vld [vmem:[%s6680_s21 + $0x1c38] sm:$0xff]  ;;  %v1402_v33 = vld [vmem:[%s6680_s21 + $0x1940] sm:$0xff]  ;;  %v419_v13 = vld [vmem:[%s8573_s3 + $0x1c8] sm:$0xff] }
 0x1c3   : > { %v4761_v18 = vadd.f32 %v4760_v58, %v4759_v54  ;;  %6346 = vmatpush3.bf16.msra.mxu1 %v6345_v16  ;;  %v8253_v8 = vadd.f32 %v8097_v50, %v2392_v53  ;;  %v6482_v16 = vpack.c.bf16 %v1495_v36, %v1494_v35  ;;  %v1418_v53 = vld [vmem:[%s6680_s21 + $0x19c0] sm:$0xff]  ;;  %v1419_v54 = vld [vmem:[%s6680_s21 + $0x19c8] sm:$0xff]  ;;  %v589_v58 = vld [vmem:[%s8573_s3 + $0x718] sm:$0xff]  ;;  %v6485_v60 = vpack.c.bf16 %v1497_v5, %v1496_v52 }
 0x1c4   : > { %6442 = vmatpush3.bf16.msra.mxu0 %v6441_v23  ;;  %6380 = vmatprep.subr.bf16.mxu1 %v6379_v51  ;;  %v4891_v14 = vpop.f32.mrb[44].mxu0  ;;  %v1400_v51 = vld [vmem:[%s6680_s21 + $0x1930] sm:$0xff]  ;;  %v6395_v62 = vpack.c.bf16 %v1419_v54, %v1418_v53  ;;  %v1422_v19 = vld [vmem:[%s6680_s21 + $0x19e0] sm:$0xff]  ;;  %v1425_v49 = vld [vmem:[%s6680_s21 + $0x19f8] sm:$0xff] }
 0x1c5   : > { %v2397_v15 = vadd.f32 %v4761_v18, %v8132_v3  ;;  %v4762_v28 = vpop.f32.mrb[46].mxu1  ;;  %6475 = vmatprep.subr.bf16.mxu0 %v6595_v29  ;;  %v4892_v20 = vpop.f32.mrb[45].mxu0  ;;  %v466_v3 = vld [vmem:[%s8573_s3 + $0x340] sm:$0xff]  ;;  %v6393_v59 = vpack.c.bf16 %v1401_v17, %v1400_v51  ;;  %v1403_v18 = vld [vmem:[%s6680_s21 + $0x1948] sm:$0xff]  ;;  %v1424_v61 = vld [vmem:[%s6680_s21 + $0x19f0] sm:$0xff] }
 0x1c6   : > { %v4763_v50 = vpop.f32.mrb[47].mxu1  ;;  %3575 = vmatmul.mubr.f32.vlgmr.msra.gmra.mrb[96].mxu1 %v408_v6  ;;  %v8263_v21 = vadd.f32 %v4892_v20, %v4891_v14  ;;  %v1498_v6 = vld [vmem:[%s6680_s21 + $0x1c40] sm:$0xff]  ;;  %v6397_v12 = vpack.c.bf16 %v1403_v18, %v1402_v33  ;;  %v1423_v20 = vld [vmem:[%s6680_s21 + $0x19e8] sm:$0xff] }
 0x1c7   : > { %v4764_v22 = vadd.f32 %v4763_v50, %v4762_v28  ;;  %6382 = vmatpush3.bf16.msra.mxu1 %v6381_v39  ;;  %3830 = vmatmul.mubr.f32.vlgmr.msra.gmra.mrb[96].mxu0 %v414_v40  ;;  %v8272_v30 = vadd.f32 %v8120_v56, %v2397_v15  ;;  %v1416_v56 = vld [vmem:[%s6680_s21 + $0x19b0] sm:$0xff]  ;;  %v413_v39 = vld [vmem:[%s8573_s3 + $0x198] sm:$0xff]  ;;  %v1499_v40 = vld [vmem:[%s6680_s21 + $0x1c48] sm:$0xff] }
 0x1c8   : > { %6477 = vmatpush1.bf16.msra.mxu0 %v6476_v10  ;;  %3579 = vmatprep.mubr.f32.mxu1 %v467_v7  ;;  %v4894_v38 = vpop.f32.mrb[46].mxu0  ;;  %v6391_v23 = vpack.c.bf16 %v1417_v37, %v1416_v56  ;;  %v1420_v7 = vld [vmem:[%s6680_s21 + $0x19d0] sm:$0xff]  ;;  %v1421_v10 = vld [vmem:[%s6680_s21 + $0x19d8] sm:$0xff]  ;;  %v6488_v14 = vpack.c.bf16 %v1499_v40, %v1498_v6  ;;  %v1474_v51 = vld [vmem:[%s6680_s21 + $0x1b80] sm:$0xff] }
 0x1c9   : > { %v2402_v9 = vadd.f32 %v4764_v22, %v8158_v34  ;;  %6384 = vmatprep.subr.bf16.mxu1 %v6383_v44  ;;  %6478 = vmatprep.subr.bf16.mxu0 %v6595_v29  ;;  %v4895_v41 = vpop.f32.mrb[47].mxu0  ;;  %v524_v34 = vld [vmem:[%s8573_s3 + $0x510] sm:$0xff]  ;;  %v6399_v15 = vpack.c.bf16 %v1421_v10, %v1420_v7  ;;  %v1405_v44 = vld [vmem:[%s6680_s21 + $0x1958] sm:$0xff]  ;;  %v6491_v22 = vpack.c.bf16 %v1501_v55, %v1500_v63  ;;  %v1475_v17 = vld [vmem:[%s6680_s21 + $0x1b88] sm:$0xff] }
 0x1ca   : > { %3580 = vmatmul.mubr.f32.gmra.mrb[98].mxu1 %v466_v3  ;;  %v8285_v42 = vadd.f32 %v4895_v41, %v4894_v38  ;;  %3834 = vmatprep.mubr.f32.mxu0 %v473_v26  ;;  %v1404_v28 = vld [vmem:[%s6680_s21 + $0x1950] sm:$0xff]  ;;  %v6403_v3 = vpack.c.bf16 %v1423_v20, %v1422_v19  ;;  %v1502_v26 = vld [vmem:[%s6680_s21 + $0x1c60] sm:$0xff]  ;;  %v1507_v18 = vld [vmem:[%s6680_s21 + $0x1c88] sm:$0xff] }
 0x1cb   : > { %6386 = vmatpush3.bf16.msra.mxu1 %v6385_v25  ;;  %3584 = vmatprep.mubr.f32.mxu1 %v525_v27  ;;  %v8297_v57 = vadd.f32 %v8143_v46, %v2402_v9  ;;  %v530_v46 = vld [vmem:[%s8573_s3 + $0x540] sm:$0xff]  ;;  %v6401_v50 = vpack.c.bf16 %v1405_v44, %v1404_v28  ;;  %v1407_v27 = vld [vmem:[%s6680_s21 + $0x1968] sm:$0xff]  ;;  %v1476_v6 = vld [vmem:[%s6680_s21 + $0x1b90] sm:$0xff] }
 0x1cc   : > { %6480 = vmatpush1.bf16.msra.mxu0 %v6479_v4  ;;  %6388 = vmatprep.subr.bf16.mxu1 %v6387_v31  ;;  %v1406_v25 = vld [vmem:[%s6680_s21 + $0x1960] sm:$0xff]  ;;  %v1503_v31 = vld [vmem:[%s6680_s21 + $0x1c68] sm:$0xff]  ;;  %v1460_v28 = vld [vmem:[%s6680_s21 + $0x1b10] sm:$0xff] }
 0x1cd   : > { %6481 = vmatprep.subr.bf16.mxu0 %v6595_v29  ;;  %3835 = vmatmul.mubr.f32.gmra.mrb[98].mxu0 %v472_v43  ;;  %v6405_v56 = vpack.c.bf16 %v1407_v27, %v1406_v25  ;;  %v6494_v41 = vpack.c.bf16 %v1503_v31, %v1502_v26  ;;  %v6407_v43 = vpack.c.bf16 %v1425_v49, %v1424_v61  ;;  %v1506_v33 = vld [vmem:[%s6680_s21 + $0x1c80] sm:$0xff]  ;;  %v1461_v44 = vld [vmem:[%s6680_s21 + $0x1b18] sm:$0xff]  ;;  %v1508_v63 = vld [vmem:[%s6680_s21 + $0x1c90] sm:$0xff] }
 0x1ce   : > { %3585 = vmatmul.mubr.f32.gmra.mrb[100].mxu1 %v524_v34  ;;  %3839 = vmatprep.mubr.f32.mxu0 %v531_v48  ;;  %v1408_v34 = vld [vmem:[%s6680_s21 + $0x1970] sm:$0xff]  ;;  %v529_v31 = vld [vmem:[%s8573_s3 + $0x538] sm:$0xff] }
 0x1cf   : > { %6390 = vmatpush3.bf16.msra.mxu1 %v6389_v45  ;;  %3589 = vmatprep.mubr.f32.mxu1 %v583_v47  ;;  %v1409_v45 = vld [vmem:[%s6680_s21 + $0x1978] sm:$0xff]  ;;  %v1504_v47 = vld [vmem:[%s6680_s21 + $0x1c70] sm:$0xff] }
 0x1d0   : > { %6483 = vmatpush1.bf16.msra.mxu0 %v6482_v16  ;;  %6392 = vmatprep.subr.bf16.mxu1 %v6391_v23  ;;  %v1505_v23 = vld [vmem:[%s6680_s21 + $0x1c78] sm:$0xff]  ;;  %v6409_v53 = vpack.c.bf16 %v1409_v45, %v1408_v34  ;;  %v1480_v34 = vld [vmem:[%s6680_s21 + $0x1bb0] sm:$0xff] }
 0x1d1   : > { %6484 = vmatprep.subr.bf16.mxu0 %v6595_v29  ;;  %3840 = vmatmul.mubr.f32.gmra.mrb[100].mxu0 %v530_v46  ;;  %v6443_v46 = vpack.c.bf16 %v1475_v17, %v1474_v51  ;;  %v1481_v45 = vld [vmem:[%s6680_s21 + $0x1bb8] sm:$0xff] }
 0x1d2   : > { %3590 = vmatmul.mubr.f32.gmra.mrb[102].mxu1 %v582_v0  ;;  %3844 = vmatprep.mubr.f32.mxu0 %v589_v58  ;;  %v1458_v0 = vld [vmem:[%s6680_s21 + $0x1b00] sm:$0xff]  ;;  %v6455_v17 = vpack.c.bf16 %v1481_v45, %v1480_v34  ;;  %v1472_v34 = vld [vmem:[%s6680_s21 + $0x1b70] sm:$0xff]  ;;  %v1473_v45 = vld [vmem:[%s6680_s21 + $0x1b78] sm:$0xff] }
 0x1d3   : > { %6394 = vmatpush3.bf16.msra.mxu1 %v6393_v59  ;;  %3744 = vmatprep.mubr.f32.mxu1 %v413_v39  ;;  %v1459_v59 = vld [vmem:[%s6680_s21 + $0x1b08] sm:$0xff]  ;;  %v1477_v39 = vld [vmem:[%s6680_s21 + $0x1b98] sm:$0xff] }
 0x1d4   : > { %6486 = vmatpush1.bf16.msra.mxu0 %v6485_v60  ;;  %6396 = vmatprep.subr.bf16.mxu1 %v6395_v62 }
 0x1d5   : > { %6487 = vmatprep.subr.bf16.mxu0 %v6595_v29  ;;  %3845 = vmatmul.mubr.f32.gmra.mrb[102].mxu0 %v588_v11  ;;  %v6445_v11 = vpack.c.bf16 %v1459_v59, %v1458_v0  ;;  %v1483_v0 = vld [vmem:[%s6680_s21 + $0x1bc8] sm:$0xff] }
 0x1d6   : > { %4313 = vmatprep.mubr.msk.f32.mxu0 %vm1542_vm0, %v419_v13 }
 0x1d7   : > { %6398 = vmatpush3.bf16.msra.mxu1 %v6397_v12  ;;  %v471_v12 = vld [vmem:[%s8573_s3 + $0x368] sm:$0xff] }
 0x1d8   : > { %6489 = vmatpush1.bf16.msra.mxu0 %v6488_v14  ;;  %6400 = vmatprep.subr.bf16.mxu1 %v6399_v15  ;;  %v6500_v14 = vpack.c.bf16 %v1507_v18, %v1506_v33  ;;  %v6447_v15 = vpack.c.bf16 %v1477_v39, %v1476_v6  ;;  %v1466_v33 = vld [vmem:[%s6680_s21 + $0x1b40] sm:$0xff]  ;;  %v417_v6 = vld [vmem:[%s8573_s3 + $0x1b8] sm:$0xff]  ;;  %v1515_v39 = vld [vmem:[%s6680_s21 + $0x1cc8] sm:$0xff] }
 0x1d9   : > { %v4841_v4 = vpop.f32.mrb[48].mxu1  ;;  %6490 = vmatprep.subr.bf16.mxu0 %v6595_v29  ;;  %v1514_v18 = vld [vmem:[%s6680_s21 + $0x1cc0] sm:$0xff] }
 0x1da   : > { %v4842_v35 = vpop.f32.mrb[49].mxu1  ;;  %v4973_v38 = vpop.f32.mrb[48].mxu0 }
 0x1db   : > { %v4843_v9 = vadd.f32 %v4842_v35, %v4841_v4  ;;  %6402 = vmatpush3.bf16.msra.mxu1 %v6401_v50  ;;  %v4974_v36 = vpop.f32.mrb[49].mxu0  ;;  %v1509_v50 = vld [vmem:[%s6680_s21 + $0x1c98] sm:$0xff]  ;;  %v6449_v4 = vpack.c.bf16 %v1461_v44, %v1460_v28  ;;  %v1486_v44 = vld [vmem:[%s6680_s21 + $0x1be0] sm:$0xff] }
 0x1dc   : > { %6492 = vmatpush1.bf16.msra.mxu0 %v6491_v22  ;;  %v8349_v37 = vadd.f32 %v4974_v36, %v4973_v38  ;;  %6404 = vmatprep.subr.bf16.mxu1 %v6403_v3  ;;  %v1478_v22 = vld [vmem:[%s6680_s21 + $0x1ba0] sm:$0xff]  ;;  %v1479_v3 = vld [vmem:[%s6680_s21 + $0x1ba8] sm:$0xff]  ;;  %v6503_v49 = vpack.c.bf16 %v1509_v50, %v1508_v63  ;;  %v1517_v28 = vld [vmem:[%s6680_s21 + $0x1cd8] sm:$0xff] }
 0x1dd   : > { %v2557_v48 = vadd.f32 %v4843_v9, %v8232_v24  ;;  %v4844_v16 = vpop.f32.mrb[50].mxu1  ;;  %6493 = vmatprep.subr.bf16.mxu0 %v6595_v29  ;;  %v6497_v24 = vpack.c.bf16 %v1505_v23, %v1504_v47  ;;  %v6451_v35 = vpack.c.bf16 %v1479_v3, %v1478_v22  ;;  %v1462_v38 = vld [vmem:[%s6680_s21 + $0x1b20] sm:$0xff]  ;;  %v1463_v9 = vld [vmem:[%s6680_s21 + $0x1b28] sm:$0xff] }
 0x1de   : > { %v4845_v52 = vpop.f32.mrb[51].mxu1  ;;  %v1510_v36 = vld [vmem:[%s6680_s21 + $0x1ca0] sm:$0xff]  ;;  %v1487_v63 = vld [vmem:[%s6680_s21 + $0x1be8] sm:$0xff] }
 0x1df   : > { %v4846_v5 = vadd.f32 %v4845_v52, %v4844_v16  ;;  %6406 = vmatpush3.bf16.msra.mxu1 %v6405_v56  ;;  %v8360_v54 = vadd.f32 %v8222_v32, %v2557_v48  ;;  %v6453_v48 = vpack.c.bf16 %v1463_v9, %v1462_v38  ;;  %v587_v16 = vld [vmem:[%s8573_s3 + $0x708] sm:$0xff]  ;;  %v1464_v52 = vld [vmem:[%s6680_s21 + $0x1b30] sm:$0xff]  ;;  %v6467_v22 = vpack.c.bf16 %v1487_v63, %v1486_v44  ;;  %v1470_v3 = vld [vmem:[%s6680_s21 + $0x1b60] sm:$0xff] }
 0x1e0   : > { %6495 = vmatpush1.bf16.msra.mxu0 %v6494_v41  ;;  %6408 = vmatprep.subr.bf16.mxu1 %v6407_v43  ;;  %v4976_v58 = vpop.f32.mrb[50].mxu0  ;;  %v1511_v43 = vld [vmem:[%s6680_s21 + $0x1ca8] sm:$0xff]  ;;  %v4028_v44 = vld [vmem:[%s8574_s4] sm:$0xff] }
 0x1e1   : > { %v2562_v60 = vadd.f32 %v4846_v5, %v8253_v8  ;;  %v4847_v62 = vpop.f32.mrb[52].mxu1  ;;  %6496 = vmatprep.subr.bf16.mxu0 %v6595_v29  ;;  %v4977_v32 = vpop.f32.mrb[51].mxu0  ;;  %v412_v8 = vld [vmem:[%s8573_s3 + $0x190] sm:$0xff]  ;;  %v6506_v51 = vpack.c.bf16 %v1511_v43, %v1510_v36  ;;  %v1465_v5 = vld [vmem:[%s6680_s21 + $0x1b38] sm:$0xff] }
 0x1e2   : > { %v4848_v40 = vpop.f32.mrb[53].mxu1  ;;  %v8370_v7 = vadd.f32 %v4977_v32, %v4976_v58  ;;  %v6457_v59 = vpack.c.bf16 %v1465_v5, %v1464_v52  ;;  %v1484_v32 = vld [vmem:[%s6680_s21 + $0x1bd0] sm:$0xff]  ;;  %v6473_v52 = vpack.c.bf16 %v1473_v45, %v1472_v34 }
 0x1e3   : > { %v4849_v10 = vadd.f32 %v4848_v40, %v4847_v62  ;;  %6410 = vmatpush3.bf16.msra.mxu1 %v6409_v53  ;;  %v8379_v13 = vadd.f32 %v8241_v1, %v2562_v60  ;;  %v1512_v53 = vld [vmem:[%s6680_s21 + $0x1cb0] sm:$0xff]  ;;  %v1467_v62 = vld [vmem:[%s6680_s21 + $0x1b48] sm:$0xff]  ;;  %v1485_v40 = vld [vmem:[%s6680_s21 + $0x1bd8] sm:$0xff] }
 0x1e4   : > { %6498 = vmatpush1.bf16.msra.mxu0 %v6497_v24  ;;  %6444 = vmatprep.subr.bf16.mxu1 %v6443_v46  ;;  %v4979_v55 = vpop.f32.mrb[52].mxu0  ;;  %v1513_v24 = vld [vmem:[%s6680_s21 + $0x1cb8] sm:$0xff]  ;;  %v1482_v46 = vld [vmem:[%s6680_s21 + $0x1bc0] sm:$0xff]  ;;  %v4034_v36 = vld [vmem:[%s8445_s9 + $0x10] sm:$0xff] }
 0x1e5   : > { %v2567_v19 = vadd.f32 %v4849_v10, %v8272_v30  ;;  %v4850_v20 = vpop.f32.mrb[54].mxu1  ;;  %6499 = vmatprep.subr.bf16.mxu0 %v6595_v29  ;;  %v4980_v25 = vpop.f32.mrb[53].mxu0  ;;  %v470_v30 = vld [vmem:[%s8573_s3 + $0x360] sm:$0xff]  ;;  %v6509_v58 = vpack.c.bf16 %v1513_v24, %v1512_v53  ;;  %v6459_v60 = vpack.c.bf16 %v1483_v0, %v1482_v46  ;;  %v6461_v10 = vpack.c.bf16 %v1467_v62, %v1466_v33  ;;  %v535_v0 = vld [vmem:[%s8573_s3 + $0x568] sm:$0xff] }
 0x1e6   : > { %v4851_v1 = vpop.f32.mrb[55].mxu1  ;;  %3745 = vmatmul.mubr.f32.vlgmr.msra.gmra.mrb[104].mxu1 %v412_v8  ;;  %v8389_v27 = vadd.f32 %v4980_v25, %v4979_v55  ;;  %v6512_v8 = vpack.c.bf16 %v1515_v39, %v1514_v18  ;;  %v4032_v55 = vld [vmem:[%s8445_s9] sm:$0xff]  ;;  %v1471_v25 = vld [vmem:[%s6680_s21 + $0x1b68] sm:$0xff] }
 0x1e7   : > { %v4852_v26 = vadd.f32 %v4851_v1, %v4850_v20  ;;  %6446 = vmatpush3.bf16.msra.mxu1 %v6445_v11  ;;  %3749 = vmatprep.mubr.f32.mxu1 %v471_v12  ;;  %v8398_v61 = vadd.f32 %v8263_v21, %v2567_v19  ;;  %v6463_v11 = vpack.c.bf16 %v1485_v40, %v1484_v32  ;;  %v1468_v12 = vld [vmem:[%s6680_s21 + $0x1b50] sm:$0xff]  ;;  %v4033_v19 = vld [vmem:[%s8445_s9 + $0x8] sm:$0xff]  ;;  %v593_v32 = vld [vmem:[%s8573_s3 + $0x738] sm:$0xff] }
 0x1e8   : > { %6501 = vmatpush1.bf16.msra.mxu0 %v6500_v14  ;;  %6448 = vmatprep.subr.bf16.mxu1 %v6447_v15  ;;  %v4982_v56 = vpop.f32.mrb[54].mxu0  ;;  %v1469_v14 = vld [vmem:[%s6680_s21 + $0x1b58] sm:$0xff]  ;;  %v1516_v15 = vld [vmem:[%s6680_s21 + $0x1cd0] sm:$0xff]  ;;  %v6469_v9 = vpack.c.bf16 %v1471_v25, %v1470_v3  ;;  %v475_v62 = vld [vmem:[%s8573_s3 + $0x388] sm:$0xff] }
 0x1e9   : > { %v2572_v41 = vadd.f32 %v4852_v26, %v8297_v57  ;;  %6502 = vmatprep.subr.bf16.mxu0 %v6595_v29  ;;  %v4983_v21 = vpop.f32.mrb[55].mxu0  ;;  %v528_v57 = vld [vmem:[%s8573_s3 + $0x530] sm:$0xff]  ;;  %v6465_v20 = vpack.c.bf16 %v1469_v14, %v1468_v12  ;;  %v6515_v50 = vpack.c.bf16 %v1517_v28, %v1516_v15  ;;  %v6517_v26 = vpack.c.bf16 %v4033_v19, %v4032_v55  ;;  %v533_v14 = vld [vmem:[%s8573_s3 + $0x558] sm:$0xff] }
 0x1ea   : > { %3750 = vmatmul.mubr.f32.gmra.mrb[106].mxu1 %v470_v30  ;;  %v8408_v47 = vadd.f32 %v4983_v21, %v4982_v56  ;;  %v1488_v30 = vld [vmem:[%s6680_s21 + $0x1bf0] sm:$0xff]  ;;  %v4035_v56 = vld [vmem:[%s8445_s9 + $0x18] sm:$0xff] }
 0x1eb   : > { %6450 = vmatpush3.bf16.msra.mxu1 %v6449_v4  ;;  %3754 = vmatprep.mubr.f32.mxu1 %v529_v31  ;;  %v8417_v23 = vadd.f32 %v8285_v42, %v2572_v41  ;;  %v586_v42 = vld [vmem:[%s8573_s3 + $0x700] sm:$0xff]  ;;  %v1489_v4 = vld [vmem:[%s6680_s21 + $0x1bf8] sm:$0xff]  ;;  %v532_v55 = vld [vmem:[%s8573_s3 + $0x550] sm:$0xff] }
 0x1ec   : > { %6504 = vmatpush1.bf16.msra.mxu0 %v6503_v49  ;;  %6452 = vmatprep.subr.bf16.mxu1 %v6451_v35  ;;  %v6471_v43 = vpack.c.bf16 %v1489_v4, %v1488_v30 }
 0x1ed   : > { %6505 = vmatprep.subr.bf16.mxu0 %v6595_v29 }
 0x1ee   : > { %3755 = vmatmul.mubr.f32.gmra.mrb[108].mxu1 %v528_v57 }
 0x1ef   : > { %6454 = vmatpush3.bf16.msra.mxu1 %v6453_v48  ;;  %3759 = vmatprep.mubr.f32.mxu1 %v587_v16  ;;  %v477_v48 = vld [vmem:[%s8573_s3 + $0x398] sm:$0xff] }
 0x1f0   : > { %6507 = vmatpush1.bf16.msra.mxu0 %v6506_v51  ;;  %6456 = vmatprep.subr.bf16.mxu1 %v6455_v17  ;;  %v6521_v51 = vpack.c.bf16 %v4035_v56, %v4034_v36 }
 0x1f1   : > { %6508 = vmatprep.subr.bf16.mxu0 %v6595_v29 }
 0x1f2   : > { %3760 = vmatmul.mubr.f32.gmra.mrb[110].mxu1 %v586_v42 }
 0x1f3   : > { %6458 = vmatpush3.bf16.msra.mxu1 %v6457_v59  ;;  %3914 = vmatprep.mubr.f32.mxu1 %v417_v6 }
 0x1f4   : > { %6510 = vmatpush1.bf16.msra.mxu0 %v6509_v58  ;;  %6460 = vmatprep.subr.bf16.mxu1 %v6459_v60  ;;  %v416_v58 = vld [vmem:[%s8573_s3 + $0x1b0] sm:$0xff]  ;;  %v534_v60 = vld [vmem:[%s8573_s3 + $0x560] sm:$0xff] }
 0x1f5   : > { %6511 = vmatprep.subr.bf16.mxu0 %v6595_v29 }
 0x1f7   : > { %6462 = vmatpush3.bf16.msra.mxu1 %v6461_v10 }
 0x1f8   : > { %6513 = vmatpush1.bf16.msra.mxu0 %v6512_v8  ;;  %6464 = vmatprep.subr.bf16.mxu1 %v6463_v11  ;;  %v474_v11 = vld [vmem:[%s8573_s3 + $0x380] sm:$0xff] }
 0x1f9   : > { %v4929_v1 = vpop.f32.mrb[56].mxu1  ;;  %6514 = vmatprep.subr.bf16.mxu0 %v6595_v29  ;;  %v418_v29 = vld [vmem:[%s8573_s3 + $0x1c0] sm:$0xff] }
 0x1fa   : > { %v4930_v31 = vpop.f32.mrb[57].mxu1  ;;  %v5061_v49 = vpop.f32.mrb[56].mxu0 }
 0x1fb   : > { %v4931_v35 = vadd.f32 %v4930_v31, %v4929_v1  ;;  %6466 = vmatpush3.bf16.msra.mxu1 %v6465_v20  ;;  %v5062_v38 = vpop.f32.mrb[57].mxu0  ;;  %v591_v20 = vld [vmem:[%s8573_s3 + $0x728] sm:$0xff] }
 0x1fc   : > { %6516 = vmatpush1.bf16.msra.mxu0 %v6515_v50  ;;  %v8463_v41 = vadd.f32 %v5062_v38, %v5061_v49  ;;  %6468 = vmatprep.subr.bf16.mxu1 %v6467_v22  ;;  %v4030_v50 = vld [vmem:[%s8574_s4 + $0x10] sm:$0xff]  ;;  %v4031_v22 = vld [vmem:[%s8574_s4 + $0x18] sm:$0xff] }
 0x1fd   : > { %v2727_v21 = vadd.f32 %v4931_v35, %v8360_v54  ;;  %v4932_v57 = vpop.f32.mrb[58].mxu1  ;;  %6518 = vmatprep.subr.bf16.mxu0 %v6517_v26  ;;  %v476_v54 = vld [vmem:[%s8573_s3 + $0x390] sm:$0xff] }
 0x1fe   : > { %v4933_v16 = vpop.f32.mrb[59].mxu1 }
 0x1ff   : > { %v4934_v17 = vadd.f32 %v4933_v16, %v4932_v57  ;;  %4000 = vmatmul.mubr.f32.vlgmr.msra.gmra.mrb[104].mxu0 %v418_v29  ;;  %6470 = vmatpush3.bf16.msra.mxu1 %v6469_v9  ;;  %v8475_v5 = vadd.f32 %v8349_v37, %v2727_v21 }
 0x200   : > { %4314 = vmatprep.mubr.msk.f32.mxu0 %vm1542_vm0, %v477_v48  ;;  %6472 = vmatprep.subr.bf16.mxu1 %v6471_v43  ;;  %v5064_v53 = vpop.f32.mrb[58].mxu0 }
 0x201   : > { %v2732_v24 = vadd.f32 %v4934_v17, %v8379_v13  ;;  %v4935_v46 = vpop.f32.mrb[60].mxu1  ;;  %6520 = vmatpush3.bf16.msra.mxu0 %v6517_v26  ;;  %v5065_v42 = vpop.f32.mrb[59].mxu0 }
 0x202   : > { %v4936_v59 = vpop.f32.mrb[61].mxu1  ;;  %6522 = vmatprep.subr.bf16.mxu0 %v6521_v51  ;;  %v8485_v37 = vadd.f32 %v5065_v42, %v5064_v53 }
 0x203   : > { %v4937_v33 = vadd.f32 %v4936_v59, %v4935_v46  ;;  %4005 = vmatmul.mubr.f32.gmra.mrb[106].mxu0 %v476_v54  ;;  %6474 = vmatpush3.bf16.msra.mxu1 %v6473_v52  ;;  %v2817_v13 = vadd.f32 %v8370_v7, %v2732_v24 }
 0x204   : > { %4315 = vmatprep.mubr.msk.f32.mxu0 %vm1542_vm0, %v535_v0  ;;  %v5067_v18 = vpop.f32.mrb[60].mxu0 }
 0x205   : > { %v2737_v6 = vadd.f32 %v4937_v33, %v8398_v61  ;;  %v4938_v39 = vpop.f32.mrb[62].mxu1  ;;  %6524 = vmatpush3.bf16.msra.mxu0 %v6521_v51  ;;  %v5068_v7 = vpop.f32.mrb[61].mxu0  ;;  %v592_v61 = vld [vmem:[%s8573_s3 + $0x730] sm:$0xff] }
 0x206   : > { %v4939_v40 = vpop.f32.mrb[63].mxu1  ;;  %3915 = vmatmul.mubr.f32.vlgmr.msra.gmra.mrb[112].mxu1 %v416_v58  ;;  %v5069_v10 = vadd.f32 %v5068_v7, %v5067_v18 }
 0x207   : > { %v4940_v8 = vadd.f32 %v4939_v40, %v4938_v39  ;;  %4010 = vmatmul.mubr.f32.gmra.mrb[108].mxu0 %v534_v60  ;;  %3919 = vmatprep.mubr.f32.mxu1 %v475_v62  ;;  %v2822_v12 = vadd.f32 %v8389_v27, %v2737_v6 }
 0x208   : > { %4316 = vmatprep.mubr.msk.f32.mxu0 %vm1542_vm0, %v593_v32  ;;  %v5070_v15 = vpop.f32.mrb[62].mxu0 }
 0x209   : > { %v2742_v28 = vadd.f32 %v4940_v8, %v8417_v23  ;;  %v5071_v63 = vpop.f32.mrb[63].mxu0  ;;  %v4029_v23 = vld [vmem:[%s8574_s4 + $0x8] sm:$0xff] }
 0x20a   : > { %3920 = vmatmul.mubr.f32.gmra.mrb[114].mxu1 %v474_v11  ;;  %v5072_v27 = vadd.f32 %v5071_v63, %v5070_v15 }
 0x20b   : > { %4015 = vmatmul.mubr.f32.gmra.mrb[110].mxu0 %v592_v61  ;;  %3924 = vmatprep.mubr.f32.mxu1 %v533_v14  ;;  %v2827_v19 = vadd.f32 %v8408_v47, %v2742_v28  ;;  %v590_v47 = vld [vmem:[%s8573_s3 + $0x720] sm:$0xff] }
 0x20c   : > { %5573 = vmatprep.mubr.msk.f32.mxu0 %vm4060_vm1, %v4028_v44 }
 0x20e   : > { %3925 = vmatmul.mubr.f32.gmra.mrb[116].mxu1 %v532_v55 }
 0x20f   : > { %5574 = vmatmul.mubr.msk.f32.vlgmr.msra.gmra.mrb[112].mxu0 %vm4060_vm1, %v4029_v23  ;;  %3929 = vmatprep.mubr.f32.mxu1 %v591_v20 }
 0x210   : > { %5576 = vmatprep.mubr.msk.f32.mxu0 %vm4060_vm1, %v4030_v50 }
 0x212   : > { %3930 = vmatmul.mubr.f32.gmra.mrb[118].mxu1 %v590_v47 }
 0x213   : > { %5577 = vmatmul.mubr.msk.f32.gmra.mrb[114].mxu0 %vm4060_vm1, %v4031_v22 }
 0x219   : > { %v5017_v3 = vpop.f32.mrb[64].mxu1 }
 0x21a   : > { %v5018_v25 = vpop.f32.mrb[65].mxu1  ;;  %v5149_v1 = vpop.f32.mrb[64].mxu0 }
 0x21b   : > { %v5019_v26 = vadd.f32 %v5018_v25, %v5017_v3  ;;  %v5150_v30 = vpop.f32.mrb[65].mxu0 }
 0x21c   : > { %v5151_v4 = vadd.f32 %v5150_v30, %v5149_v1 }
 0x21d   : > { %v2897_v31 = vadd.f32 %v5019_v26, %v8475_v5  ;;  %v5020_v49 = vpop.f32.mrb[66].mxu1 }
 0x21e   : > { %v5021_v35 = vpop.f32.mrb[67].mxu1 }
 0x21f   : > { %v5022_v38 = vadd.f32 %v5021_v35, %v5020_v49  ;;  %v2982_v9 = vadd.f32 %v8463_v41, %v2897_v31 }
 0x220   : > { %v5152_v36 = vpop.f32.mrb[66].mxu0 }
 0x221   : > { %v2902_v56 = vadd.f32 %v5022_v38, %v2817_v13  ;;  %v5023_v29 = vpop.f32.mrb[68].mxu1  ;;  %v5153_v43 = vpop.f32.mrb[67].mxu0 }
 0x222   : > { %v5024_v34 = vpop.f32.mrb[69].mxu1  ;;  %v5154_v45 = vadd.f32 %v5153_v43, %v5152_v36 }
 0x223   : > { %v5025_v21 = vadd.f32 %v5024_v34, %v5023_v29  ;;  %v2987_v57 = vadd.f32 %v8485_v37, %v2902_v56 }
 0x224   : > { %v5155_v48 = vpop.f32.mrb[68].mxu0 }
 0x225   : > { %v2907_v16 = vadd.f32 %v5025_v21, %v2822_v12  ;;  %v5026_v51 = vpop.f32.mrb[70].mxu1  ;;  %v5156_v17 = vpop.f32.mrb[69].mxu0 }
 0x226   : > { %v5027_v52 = vpop.f32.mrb[71].mxu1  ;;  %v5157_v5 = vadd.f32 %v5156_v17, %v5155_v48 }
 0x227   : > { %v5028_v54 = vadd.f32 %v5027_v52, %v5026_v51  ;;  %v2992_v53 = vadd.f32 %v5069_v10, %v2907_v16 }
 0x228   : > { %v5158_v24 = vpop.f32.mrb[70].mxu0 }
 0x229   : > { %v2912_v46 = vadd.f32 %v5028_v54, %v2827_v19  ;;  %v5159_v41 = vpop.f32.mrb[71].mxu0 }
 0x22a   : > { %v5160_v0 = vadd.f32 %v5159_v41, %v5158_v24 }
 0x22b   : > { %v2997_v42 = vadd.f32 %v5072_v27, %v2912_v46 }
 0x239   : > { %v5105_v59 = vpop.f32.mrb[72].mxu1 }
 0x23a   : > { %v5106_v33 = vpop.f32.mrb[73].mxu1  ;;  %v5237_v58 = vpop.f32.mrb[72].mxu0 }
 0x23b   : > { %v5107_v13 = vadd.f32 %v5106_v33, %v5105_v59  ;;  %v5238_v60 = vpop.f32.mrb[73].mxu0 }
 0x23c   : > { %v5239_v62 = vadd.f32 %v5238_v60, %v5237_v58 }
 0x23d   : > { %v3067_v37 = vadd.f32 %v5107_v13, %v2982_v9  ;;  %v5108_v18 = vpop.f32.mrb[74].mxu1 }
 0x23e   : > { %v5109_v6 = vpop.f32.mrb[75].mxu1 }
 0x23f   : > { %v5110_v39 = vadd.f32 %v5109_v6, %v5108_v18  ;;  %v3152_v32 = vadd.f32 %v5151_v4, %v3067_v37 }
 0x240   : > { %v5240_v7 = vpop.f32.mrb[74].mxu0 }
 0x241   : > { %v3072_v40 = vadd.f32 %v5110_v39, %v2987_v57  ;;  %v5111_v8 = vpop.f32.mrb[76].mxu1  ;;  %v5241_v10 = vpop.f32.mrb[75].mxu0 }
 0x242   : > { %v5112_v11 = vpop.f32.mrb[77].mxu1  ;;  %v5242_v12 = vadd.f32 %v5241_v10, %v5240_v7 }
 0x243   : > { %v5113_v61 = vadd.f32 %v5112_v11, %v5111_v8  ;;  %v3157_v14 = vadd.f32 %v5154_v45, %v3072_v40 }
 0x244   : > { %v5243_v15 = vpop.f32.mrb[76].mxu0 }
 0x245   : > { %v3077_v28 = vadd.f32 %v5113_v61, %v2992_v53  ;;  %v5114_v44 = vpop.f32.mrb[78].mxu1  ;;  %v5244_v63 = vpop.f32.mrb[77].mxu0 }
 0x246   : > { %v5115_v27 = vpop.f32.mrb[79].mxu1  ;;  %v5245_v55 = vadd.f32 %v5244_v63, %v5243_v15 }
 0x247   : > { %v5116_v19 = vadd.f32 %v5115_v27, %v5114_v44  ;;  %v3162_v23 = vadd.f32 %v5157_v5, %v3077_v28 }
 0x248   : > { %v5246_v20 = vpop.f32.mrb[78].mxu0 }
 0x249   : > { %v3082_v50 = vadd.f32 %v5116_v19, %v2997_v42  ;;  %v5247_v47 = vpop.f32.mrb[79].mxu0 }
 0x24a   : > { %v5248_v22 = vadd.f32 %v5247_v47, %v5246_v20 }
 0x24b   : > { %v3167_v3 = vadd.f32 %v5160_v0, %v3082_v50 }
 0x259   : > { %v5193_v25 = vpop.f32.mrb[80].mxu1 }
 0x25a   : > { %v5194_v1 = vpop.f32.mrb[81].mxu1  ;;  %v5325_v26 = vpop.f32.mrb[80].mxu0 }
 0x25b   : > { %v5195_v30 = vadd.f32 %v5194_v1, %v5193_v25  ;;  %v5326_v4 = vpop.f32.mrb[81].mxu0 }
 0x25c   : > { %v5327_v31 = vadd.f32 %v5326_v4, %v5325_v26 }
 0x25d   : > { %v3237_v49 = vadd.f32 %v5195_v30, %v3152_v32  ;;  %v5196_v35 = vpop.f32.mrb[82].mxu1 }
 0x25e   : > { %v5197_v38 = vpop.f32.mrb[83].mxu1 }
 0x25f   : > { %v5198_v9 = vadd.f32 %v5197_v38, %v5196_v35  ;;  %v3322_v36 = vadd.f32 %v5239_v62, %v3237_v49 }
 0x260   : > { %v5328_v56 = vpop.f32.mrb[82].mxu0 }
 0x261   : > { %v3242_v29 = vadd.f32 %v5198_v9, %v3157_v14  ;;  %v5199_v43 = vpop.f32.mrb[84].mxu1  ;;  %v5329_v34 = vpop.f32.mrb[83].mxu0 }
 0x262   : > { %v5200_v45 = vpop.f32.mrb[85].mxu1  ;;  %v5330_v21 = vadd.f32 %v5329_v34, %v5328_v56 }
 0x263   : > { %v5201_v57 = vadd.f32 %v5200_v45, %v5199_v43  ;;  %v3327_v48 = vadd.f32 %v5242_v12, %v3242_v29 }
 0x264   : > { %v5331_v16 = vpop.f32.mrb[84].mxu0 }
 0x265   : > { %v3247_v51 = vadd.f32 %v5201_v57, %v3162_v23  ;;  %v5202_v17 = vpop.f32.mrb[86].mxu1  ;;  %v5332_v52 = vpop.f32.mrb[85].mxu0 }
 0x266   : > { %v5203_v5 = vpop.f32.mrb[87].mxu1  ;;  %v5333_v54 = vadd.f32 %v5332_v52, %v5331_v16 }
 0x267   : > { %v5204_v53 = vadd.f32 %v5203_v5, %v5202_v17  ;;  %v3332_v24 = vadd.f32 %v5245_v55, %v3247_v51 }
 0x268   : > { %v5334_v46 = vpop.f32.mrb[86].mxu0 }
 0x269   : > { %v3252_v41 = vadd.f32 %v5204_v53, %v3167_v3  ;;  %v5335_v0 = vpop.f32.mrb[87].mxu0 }
 0x26a   : > { %v5336_v42 = vadd.f32 %v5335_v0, %v5334_v46 }
 0x26b   : > { %v3337_v59 = vadd.f32 %v5248_v22, %v3252_v41 }
 0x279   : > { %v5281_v33 = vpop.f32.mrb[88].mxu1 }
 0x27a   : > { %v5282_v58 = vpop.f32.mrb[89].mxu1  ;;  %v5413_v13 = vpop.f32.mrb[88].mxu0 }
 0x27b   : > { %v5283_v60 = vadd.f32 %v5282_v58, %v5281_v33  ;;  %v5414_v62 = vpop.f32.mrb[89].mxu0 }
 0x27c   : > { %v5415_v37 = vadd.f32 %v5414_v62, %v5413_v13 }
 0x27d   : > { %v3407_v18 = vadd.f32 %v5283_v60, %v3322_v36  ;;  %v5284_v6 = vpop.f32.mrb[90].mxu1 }
 0x27e   : > { %v5285_v39 = vpop.f32.mrb[91].mxu1 }
 0x27f   : > { %v5286_v32 = vadd.f32 %v5285_v39, %v5284_v6  ;;  %v3492_v7 = vadd.f32 %v5327_v31, %v3407_v18 }
 0x280   : > { %v5416_v40 = vpop.f32.mrb[90].mxu0 }
 0x281   : > { %v3412_v8 = vadd.f32 %v5286_v32, %v3327_v48  ;;  %v5287_v10 = vpop.f32.mrb[92].mxu1  ;;  %v5417_v11 = vpop.f32.mrb[91].mxu0 }
 0x282   : > { %v5288_v12 = vpop.f32.mrb[93].mxu1  ;;  %v5418_v61 = vadd.f32 %v5417_v11, %v5416_v40 }
 0x283   : > { %v5289_v14 = vadd.f32 %v5288_v12, %v5287_v10  ;;  %v3497_v15 = vadd.f32 %v5330_v21, %v3412_v8 }
 0x284   : > { %v5419_v28 = vpop.f32.mrb[92].mxu0 }
 0x285   : > { %v3417_v44 = vadd.f32 %v5289_v14, %v3332_v24  ;;  %v5290_v63 = vpop.f32.mrb[94].mxu1  ;;  %v5420_v27 = vpop.f32.mrb[93].mxu0 }
 0x286   : > { %v5291_v55 = vpop.f32.mrb[95].mxu1  ;;  %v5421_v19 = vadd.f32 %v5420_v27, %v5419_v28 }
 0x287   : > { %v5292_v23 = vadd.f32 %v5291_v55, %v5290_v63  ;;  %v3502_v20 = vadd.f32 %v5333_v54, %v3417_v44  ;;  %v4175_v55 = vlaneseq }
 0x288   : > { %v5422_v50 = vpop.f32.mrb[94].mxu0 }
 0x289   : > { %v3422_v47 = vadd.f32 %v5292_v23, %v3337_v59  ;;  %v5423_v22 = vpop.f32.mrb[95].mxu0 }
 0x28a   : > { %v5424_v3 = vadd.f32 %v5423_v22, %v5422_v50  ;;  %v4172_v50 = vstv %s4171_s15  ;;  %v4176_v22 = vshrl.u32 %v4175_v55, 7 }
 0x28b   : > { %v3507_v25 = vadd.f32 %v5336_v42, %v3422_v47 }
 0x299   : > { %v5369_v1 = vpop.f32.mrb[96].mxu1 }
 0x29a   : > { %v5370_v26 = vpop.f32.mrb[97].mxu1  ;;  %v5501_v30 = vpop.f32.mrb[96].mxu0 }
 0x29b   : > { %v5371_v4 = vadd.f32 %v5370_v26, %v5369_v1  ;;  %v5502_v31 = vpop.f32.mrb[97].mxu0 }
 0x29c   : > { %v5503_v49 = vadd.f32 %v5502_v31, %v5501_v30  ;;  %v4177_v31 = vsub.s32 0, %v4176_v22 }
 0x29d   : > { %v3577_v35 = vadd.f32 %v5371_v4, %v3492_v7  ;;  %v5372_v38 = vpop.f32.mrb[98].mxu1 }
 0x29e   : > { %v5373_v9 = vpop.f32.mrb[99].mxu1 }
 0x29f   : > { %v5374_v36 = vadd.f32 %v5373_v9, %v5372_v38  ;;  %v3662_v56 = vadd.f32 %v5415_v37, %v3577_v35  ;;  %v4048_v9 = vpop.permute.xlu1 %4047 }
 0x2a0   : > { %v5504_v29 = vpop.f32.mrb[98].mxu0 }
 0x2a1   : > { %v3582_v43 = vadd.f32 %v5374_v36, %v3497_v15  ;;  %v5375_v34 = vpop.f32.mrb[100].mxu1  ;;  %v5505_v45 = vpop.f32.mrb[99].mxu0 }
 0x2a2   : > { %v5376_v21 = vpop.f32.mrb[101].mxu1  ;;  %v5506_v57 = vadd.f32 %v5505_v45, %v5504_v29 }
 0x2a3   : > { %v5377_v48 = vadd.f32 %v5376_v21, %v5375_v34  ;;  %v3667_v16 = vadd.f32 %v5418_v61, %v3582_v43  ;;  %v4043_v43 = vpop.permute.xlu0 %4042 }
 0x2a4   : > { %v5507_v51 = vpop.f32.mrb[100].mxu0 }
 0x2a5   : > { %v3587_v17 = vadd.f32 %v5377_v48, %v3502_v20  ;;  %v5378_v52 = vpop.f32.mrb[102].mxu1  ;;  %v5508_v5 = vpop.f32.mrb[101].mxu0  ;;  %v4170_v20 = vld [vmem:[%s8577_s7] sm:$0x1] }
 0x2a6   : > { %v5379_v54 = vpop.f32.mrb[103].mxu1  ;;  %v5509_v53 = vadd.f32 %v5508_v5, %v5507_v51  ;;  %vm4173_vm2 = vcmp.ge.s32.totalorder %v4170_v20, %v4172_v50 }
 0x2a7   : > { %v5380_v24 = vadd.f32 %v5379_v54, %v5378_v52  ;;  %v3672_v46 = vadd.f32 %v5421_v19, %v3587_v17  ;;  %v4174_v38 = vsel %vm4173_vm2, 1, %v6594_v2 }
 0x2a8   : > { %v5510_v41 = vpop.f32.mrb[102].mxu0  ;;  %v4178_v21 = vrot.slane %v4174_v38, %v4177_v31 }
 0x2a9   : > { %v3592_v0 = vadd.f32 %v5380_v24, %v3507_v25  ;;  %v5511_v42 = vpop.f32.mrb[103].mxu0 }
 0x2aa   : > { %v5512_v59 = vadd.f32 %v5511_v42, %v5510_v41  ;;  %vm4179_vm3 = vcmp.eq.s32.totalorder %v4178_v21, 1 }
 0x2ab   : > { %v3677_v33 = vadd.f32 %v5424_v3, %v3592_v0 }
 0x2b9   : > { %v5457_v58 = vpop.f32.mrb[104].mxu1 }
 0x2ba   : > { %v5458_v13 = vpop.f32.mrb[105].mxu1 }
 0x2bb   : > { %v5459_v60 = vadd.f32 %v5458_v13, %v5457_v58 }
 0x2bd   : > { %v3747_v62 = vadd.f32 %v5459_v60, %v3662_v56  ;;  %v5460_v37 = vpop.f32.mrb[106].mxu1 }
 0x2be   : > { %v5461_v18 = vpop.f32.mrb[107].mxu1 }
 0x2bf   : > { %v5462_v6 = vadd.f32 %v5461_v18, %v5460_v37  ;;  %v3832_v39 = vadd.f32 %v5503_v49, %v3747_v62 }
 0x2c1   : > { %v3752_v32 = vadd.f32 %v5462_v6, %v3667_v16  ;;  %v5463_v7 = vpop.f32.mrb[108].mxu1 }
 0x2c2   : > { %v5464_v40 = vpop.f32.mrb[109].mxu1 }
 0x2c3   : > { %v3837_v8 = vadd.f32 %v5506_v57, %v3752_v32  ;;  %v5465_v10 = vadd.f32 %v5464_v40, %v5463_v7 }
 0x2c5   : > { %v3757_v11 = vadd.f32 %v5465_v10, %v3672_v46  ;;  %v5466_v12 = vpop.f32.mrb[110].mxu1 }
 0x2c6   : > { %v5467_v61 = vpop.f32.mrb[111].mxu1 }
 0x2c7   : > { %v3842_v14 = vadd.f32 %v5509_v53, %v3757_v11  ;;  %v5468_v15 = vadd.f32 %v5467_v61, %v5466_v12  ;;  %v4058_v53 = vpop.permute.xlu1 %4057 }
 0x2c9   : > { %v3762_v28 = vadd.f32 %v5468_v15, %v3677_v33  ;;  %v4053_v33 = vpop.permute.xlu0 %4052 }
 0x2cb   : > { %v3847_v44 = vadd.f32 %v5512_v59, %v3762_v28 }
 0x2d2   : > { %v4001_v63 = vpop.f32.mrb[104].mxu0 }
 0x2d3   : > { %v4003_v27 = vpop.f32.mrb[105].mxu0 }
 0x2d6   : > { %v4006_v19 = vpop.f32.mrb[106].mxu0 }
 0x2d7   : > { %v4008_v23 = vpop.f32.mrb[107].mxu0 }
 0x2d9   : > { %v5545_v47 = vpop.f32.mrb[112].mxu1 }
 0x2da   : > { %v5546_v3 = vpop.f32.mrb[113].mxu1  ;;  %v4011_v25 = vpop.f32.mrb[108].mxu0 }
 0x2db   : > { %v5547_v1 = vadd.f32 %v5546_v3, %v5545_v47  ;;  %v4013_v26 = vpop.f32.mrb[109].mxu0 }
 0x2dd   : > { %v3917_v30 = vadd.f32 %v5547_v1, %v3832_v39  ;;  %v5548_v4 = vpop.f32.mrb[114].mxu1 }
 0x2de   : > { %v5549_v49 = vpop.f32.mrb[115].mxu1  ;;  %v4016_v35 = vpop.f32.mrb[110].mxu0 }
 0x2df   : > { %v4002_v36 = vadd.f32 %v4001_v63, %v3917_v30  ;;  %v5550_v56 = vadd.f32 %v5549_v49, %v5548_v4  ;;  %v4018_v29 = vpop.f32.mrb[111].mxu0 }
 0x2e1   : > { %v3922_v34 = vadd.f32 %v5550_v56, %v3837_v8  ;;  %v5551_v45 = vpop.f32.mrb[116].mxu1  ;;  %v4020_v16 = vmax.f32 %v4002_v36, 0.0 }
 0x2e2   : > { %v5575_v57 = vpop.f32.mrb[112].mxu0  ;;  %v5552_v48 = vpop.f32.mrb[117].mxu1 }
 0x2e3   : > { %v4007_v51 = vadd.f32 %v4006_v19, %v3922_v34  ;;  %v4145_v17 = vadd.f32 %v5575_v57, %v4048_v9  ;;  %v5553_v52 = vadd.f32 %v5552_v48, %v5551_v45  ;;  %v4139_v5 = vpop.f32.mrb[113].mxu0  ;;  %v4024_v62 = vmin.f32 %v4020_v16, 20.0 }
 0x2e4   : > { %v4140_v54 = vadd.f32 %v4139_v5, %v4043_v43 }
 0x2e5   : > { %v4021_v24 = vmax.f32 %v4007_v51, 0.0  ;;  %v4159_v46 = vmax.f32 %v4145_v17, 0.0  ;;  %v3927_v2 = vadd.f32 %v5553_v52, %v3842_v14  ;;  %v5554_v41 = vpop.f32.mrb[118].mxu1 }
 0x2e6   : > { %v4158_v0 = vmax.f32 %v4140_v54, 0.0  ;;  %v5578_v42 = vpop.f32.mrb[114].mxu0  ;;  %v5555_v59 = vpop.f32.mrb[119].mxu1 }
 0x2e7   : > { %v4025_v58 = vmin.f32 %v4021_v24, 20.0  ;;  %v4163_v13 = vmin.f32 %v4159_v46, 20.0  ;;  %v4012_v60 = vadd.f32 %v4011_v25, %v3927_v2  ;;  %v4149_v37 = vpop.f32.mrb[115].mxu0  ;;  %v4155_v6 = vadd.f32 %v5578_v42, %v4058_v53 }
 0x2e8   : > { %v4162_v18 = vmin.f32 %v4158_v0, 20.0  ;;  %v5556_v39 = vadd.f32 %v5555_v59, %v5554_v41  ;;  %v4150_v32 = vadd.f32 %v4149_v37, %v4053_v33 }
 0x2e9   : > { %v4167_v7 = vadd.f32 %v4163_v13, %v4025_v58  ;;  %v4022_v40 = vmax.f32 %v4012_v60, 0.0  ;;  %v4161_v15 = vmax.f32 %v4155_v6, 0.0 }
 0x2ea   : > { %v4166_v8 = vadd.f32 %v4162_v18, %v4024_v62  ;;  %v3932_v10 = vadd.f32 %v5556_v39, %v3847_v44  ;;  %v4160_v11 = vmax.f32 %v4150_v32, 0.0 }
 0x2eb   : > { %v4181_v12 = vsel %vm4179_vm3, 0.0, %v4167_v7  ;;  %v4026_v61 = vmin.f32 %v4022_v40, 20.0  ;;  %v4165_v19 = vmin.f32 %v4161_v15, 20.0 }
 0x2ec   : > { %4185 = vst.msk [vmem:[%s361_s19 + $0x8] sm:$0xff] %vm4060_vm1, %v4181_v12  ;;  %v4180_v14 = vsel %vm4179_vm3, 0.0, %v4166_v8  ;;  %v4017_v28 = vadd.f32 %v4016_v35, %v3932_v10  ;;  %v4164_v63 = vmin.f32 %v4160_v11, 20.0 }
 0x2ed   : > { %4184 = vst.msk [vmem:[%s361_s19] sm:$0xff] %vm4060_vm1, %v4180_v14 }
 0x2ee   : > { %v4023_v27 = vmax.f32 %v4017_v28, 0.0  ;;  %v4168_v55 = vadd.f32 %v4164_v63, %v4026_v61 }
 0x2f0   : > { %v4027_v23 = vmin.f32 %v4023_v27, 20.0  ;;  %v4182_v20 = vsel %vm4179_vm3, 0.0, %v4168_v55 }
 0x2f1   : > { %4186 = vst.msk [vmem:[%s361_s19 + $0x10] sm:$0xff] %vm4060_vm1, %v4182_v20 }
 0x2f2   : > { %v4169_v44 = vadd.f32 %v4165_v19, %v4027_v23 }
 0x2f4   : > { %v4183_v50 = vsel %vm4179_vm3, 0.0, %v4169_v44 }
 0x2f5   : > { %4187 = vst.msk [vmem:[%s361_s19 + $0x18] sm:$0xff] %vm4060_vm1, %v4183_v50 }
 0x2f6 PF: > { %s24_s12 = sadd.s32 1, %s6591_s12   ;;  %s8579_s10 = smov %s6587_s11 }
 0x2f7   : > { %p21_p10 = scmp.ge.s32.totalorder %s24_s12, 4   ;;  %s8580_s11 = smov %s8582_s0 }
 0x2f9   :  { %23 = sbr.rel (!%p21_p10) target bundleno = 17 (0x11), region = 84 }

</bundles_post_ra>
